<compile_context>
chip_gen: v7x
topology: tpu7x:2x2x1
jax: 0.10.0
libtpu: 0.0.40
codegen_flags: <defaults>
</compile_context>

<pallas_src>
import jax
import jax.numpy as jnp
from jax.experimental import pallas as pl
from jax.experimental.pallas import tpu as pltpu

# ----------------------- small ViT configuration (scaled-down vit_b_16) -----------------------
IMG = 32            # ResizeModel target spatial size (vit_b_16 uses 224; scaled down)
PATCH = 16          # patch size of vit_b_16
C_IN = 3            # RGB input
EMBED = 32          # embed_dim (vit_b_16: 768)
HEADS = 4           # num attention heads (vit_b_16: 12)
HEAD_DIM = EMBED // HEADS
MLP = 64            # MLP hidden dim (vit_b_16: 3072)
LAYERS = 2          # encoder depth (vit_b_16: 12)
NUM_PATCH = (IMG // PATCH) ** 2           # 4
SEQ = NUM_PATCH + 1                       # 5 (+1 class token)
SEQ_PAD = 8                               # sequence padded to the sublane tile (8)
CLS_POS = NUM_PATCH                       # class token kept at row 4 of each padded sequence
PATCH_DIM = C_IN * PATCH * PATCH          # 768
LN_EPS = 1e-6                             # torchvision ViT LayerNorm eps

NUM_USERS = 6
NUM_LOC = 5 + 1                           # num_locations + 1
NUM_ACT = 9 + 1                           # num_activities + 1
D1 = NUM_USERS * 2
D2 = NUM_USERS * NUM_LOC
D3 = NUM_USERS * NUM_ACT
HEAD_OUT = D1 + D2 + D3                   # 108
HEAD_PAD = 128                            # lane-dense padded width for the fused head output

# ----- misc slab row layout (one (32, 128) f32 array carries every small parameter) -----
(_R_LN1G, _R_LN1B, _R_BQKV, _R_BO, _R_LN2G, _R_LN2B, _R_B1, _R_B2) = range(8)
_ROWS_PER_LAYER = 8
_R_LNFG = LAYERS * _ROWS_PER_LAYER        # 16
_R_LNFB = _R_LNFG + 1                     # 17
_R_HEADB = _R_LNFG + 2                    # 18
_R_ADD = _R_LNFG + 3                      # 19 .. 26 (8 rows: patch add terms, cls add term, zeros)
MISC_ROWS = 32


# --------------------------------------- fused Pallas kernel ----------------------------------
def _layernorm(x, g, b):
    mu = jnp.mean(x, axis=-1, keepdims=True)
    var = jnp.mean((x - mu) ** 2, axis=-1, keepdims=True)
    return (x - mu) * jax.lax.rsqrt(var + LN_EPS) * g + b


def _vit_kernel(patches_ref, conv_w_ref, slab_a_ref, w2_ref, heads_w_ref, misc_ref, out_ref):
    f32 = jnp.float32
    bf16 = jnp.bfloat16
    BT = out_ref.shape[0]            # batch samples in this grid block (multiple of 8)
    N = BT * SEQ_PAD                 # token rows in this block
    HB = HEADS * BT

    misc = misc_ref[...]             # (32, 128) f32: all small parameters

    # ---- patch embedding: only real patch rows are DMA'd; padded token layout is built here ----
    emb = jnp.dot(patches_ref[...], conv_w_ref[...],
                  preferred_element_type=f32)                       # (BT*NUM_PATCH, EMBED) f32
    emb = emb.reshape(BT, NUM_PATCH, EMBED)
    add = misc[_R_ADD:_R_ADD + SEQ_PAD, :EMBED]                     # (8, 32): pos/bias/cls add terms
    tail = jnp.zeros((BT, SEQ_PAD - NUM_PATCH, EMBED), f32)
    xf = (jnp.concatenate([emb, tail], axis=1) + add[None, :, :]).reshape(N, EMBED)

    # additive key-padding mask: padded key positions (rows >= SEQ) are never attended to
    key_idx = jax.lax.broadcasted_iota(jnp.int32, (SEQ_PAD, SEQ_PAD), 1)
    neg_mask = jnp.where(key_idx < SEQ, 0.0, -1e9).astype(f32)

    for l in range(LAYERS):          # static unroll; all layer weights stay VMEM-resident
        base = l * _ROWS_PER_LAYER
        slab = slab_a_ref[l]                                        # (EMBED, 192) bf16
        wqkv = slab[:, 0:3 * EMBED]                                 # (32, 96)  (1/sqrt(d) folded into Q cols)
        wo = slab[:, 3 * EMBED:4 * EMBED].reshape(HEADS, HEAD_DIM, EMBED)   # (4, 8, 32)
        w1 = slab[:, 4 * EMBED:4 * EMBED + MLP]                     # (32, 64)
        w2 = w2_ref[l]                                              # (64, 32) bf16

        ln1_g = misc[base + _R_LN1G:base + _R_LN1G + 1, :EMBED]
        ln1_b = misc[base + _R_LN1B:base + _R_LN1B + 1, :EMBED]
        bqkv = misc[base + _R_BQKV:base + _R_BQKV + 1, :3 * EMBED]
        bo = misc[base + _R_BO:base + _R_BO + 1, :EMBED]
        ln2_g = misc[base + _R_LN2G:base + _R_LN2G + 1, :EMBED]
        ln2_b = misc[base + _R_LN2B:base + _R_LN2B + 1, :EMBED]
        b1 = misc[base + _R_B1:base + _R_B1 + 1, :MLP]
        b2 = misc[base + _R_B2:base + _R_B2 + 1, :EMBED]

        # ----- multi-head self-attention (fused QKV projection) -----
        h = _layernorm(xf, ln1_g, ln1_b)                            # (N, EMBED) f32
        qkv = jnp.dot(h.astype(bf16), wqkv, preferred_element_type=f32) + bqkv   # (N, 96)
        # heads -> batch axis via two canonical minor-dim transposes (lane layout is
        # (which, head, dim)-major, so groups come out in q0..q3,k0..k3,v0..v3 order).
        qkv_t = jnp.transpose(qkv)                                  # (96, N)
        qkv_t = qkv_t.reshape(3 * HEADS, HEAD_DIM, N)               # (12, 8, N)  free leading split
        qkv_t = jnp.transpose(qkv_t, (0, 2, 1))                     # (12, N, 8)
        q = qkv_t[0:HEADS].reshape(HB, SEQ_PAD, HEAD_DIM)           # (HB, 8, 8)
        k = qkv_t[HEADS:2 * HEADS].reshape(HB, SEQ_PAD, HEAD_DIM)
        v = qkv_t[2 * HEADS:3 * HEADS].reshape(HB, SEQ_PAD, HEAD_DIM)

        s = jnp.einsum('nqd,nkd->nqk', q, k, preferred_element_type=f32) + neg_mask[None]
        s = s - jnp.max(s, axis=-1, keepdims=True)
        p = jnp.exp(s)
        p = p * pl.reciprocal(jnp.sum(p, axis=-1, keepdims=True), approx=True)
        ctx = jnp.einsum('nqk,nkd->nqd', p, v, preferred_element_type=f32)       # (HB, 8, 8)

        # per-head output projection + sum over heads (no heads->lane relayout needed)
        ctx = ctx.reshape(HEADS, N, HEAD_DIM).astype(bf16)
        attn_h = jnp.einsum('hnd,hde->hne', ctx, wo, preferred_element_type=f32)  # (4, N, 32)
        attn = attn_h[0]
        for hh in range(1, HEADS):
            attn = attn + attn_h[hh]
        xf = xf + attn + bo

        # ----- MLP -----
        h2 = _layernorm(xf, ln2_g, ln2_b)
        h2 = jnp.dot(h2.astype(bf16), w1, preferred_element_type=f32) + b1
        # TODO(synk): PyTorch nn.GELU default is exact (erf); tanh-approx GELU used for Mosaic lowering safety.
        h2 = jax.nn.gelu(h2, approximate=True)
        h2 = jnp.dot(h2.astype(bf16), w2, preferred_element_type=f32) + b2
        xf = xf + h2

    # ----- final LayerNorm on the class token + fused (lane-dense) classification heads -----
    cls = xf.reshape(BT, SEQ_PAD, EMBED)[:, CLS_POS, :]             # (BT, EMBED)
    lnf_g = misc[_R_LNFG:_R_LNFG + 1, :EMBED]
    lnf_b = misc[_R_LNFB:_R_LNFB + 1, :EMBED]
    heads_b = misc[_R_HEADB:_R_HEADB + 1, :]                        # (1, 128)
    cls = _layernorm(cls, lnf_g, lnf_b)
    out_ref[...] = (jnp.dot(cls.astype(bf16), heads_w_ref[...],
                            preferred_element_type=f32) + heads_b)  # (BT, 128)


# ------------------------------------------ glue ----------------------------------------------
def extract_patches(x):
    # x: (B, C, H, W) -> (B, N, C*P*P), row-major over the (h', w') patch grid
    B, C, H, W = x.shape
    gh, gw = H // PATCH, W // PATCH
    x = x.reshape(B, C, gh, PATCH, gw, PATCH)
    x = x.transpose(0, 2, 4, 1, 3, 5)                               # (B, gh, gw, C, P, P)
    return x.reshape(B, gh * gw, C * PATCH * PATCH)


def _pack_params(params):
    """Packs parameters into: conv_w(bf16), slab_a(bf16), w2(bf16), heads_w(bf16), misc(f32)."""
    bf16 = jnp.bfloat16
    scale = 1.0 / (HEAD_DIM ** 0.5)

    conv_w = params["conv_w"].astype(bf16)                          # (768, 32)
    heads_w = jnp.pad(
        jnp.concatenate([params["h1_w"], params["h2_w"], params["h3_w"]], axis=1),
        ((0, 0), (0, HEAD_PAD - HEAD_OUT))).astype(bf16)            # (32, 128)

    misc = jnp.zeros((MISC_ROWS, HEAD_PAD), jnp.float32)

    def put(m, row, vec):
        vec = vec.astype(jnp.float32).reshape(-1)
        return m.at[row, :vec.shape[0]].set(vec)

    slab_a, w2s = [], []
    for l, lp in enumerate(params["layers"]):
        qkv_w = lp["qkv_w"]                                          # (32, 96): [q | k | v] columns
        wqkv = jnp.concatenate([qkv_w[:, :EMBED] * scale, qkv_w[:, EMBED:]], axis=1)
        slab_a.append(jnp.concatenate([wqkv, lp["out_w"], lp["w1"]], axis=1).astype(bf16))  # (32, 192)
        w2s.append(lp["w2"].astype(bf16))                            # (64, 32)

        qkv_b = lp["qkv_b"].reshape(-1)
        qkv_b = jnp.concatenate([qkv_b[:EMBED] * scale, qkv_b[EMBED:]])

        base = l * _ROWS_PER_LAYER
        misc = put(misc, base + _R_LN1G, lp["ln1_g"])
        misc = put(misc, base + _R_LN1B, lp["ln1_b"])
        misc = put(misc, base + _R_BQKV, qkv_b)
        misc = put(misc, base + _R_BO, lp["out_b"])
        misc = put(misc, base + _R_LN2G, lp["ln2_g"])
        misc = put(misc, base + _R_LN2B, lp["ln2_b"])
        misc = put(misc, base + _R_B1, lp["b1"])
        misc = put(misc, base + _R_B2, lp["b2"])

    misc = put(misc, _R_LNFG, params["ln_g"])
    misc = put(misc, _R_LNFB, params["ln_b"])
    misc = put(misc, _R_HEADB, jnp.concatenate(
        [params["h1_b"].reshape(-1), params["h2_b"].reshape(-1), params["h3_b"].reshape(-1)]))

    # per-token additive term in the in-kernel layout: rows 0..3 = conv bias + pos[1..4]
    # (patch slots), row 4 = cls token + pos[0] (class slot), rows 5..7 = zeros (padding).
    pos = params["pos"][0]                                           # (SEQ, EMBED)
    add_rows = jnp.concatenate([
        params["conv_b"].reshape(1, EMBED) + pos[1:SEQ],
        params["cls"].reshape(1, EMBED) + pos[0:1],
        jnp.zeros((SEQ_PAD - SEQ, EMBED), jnp.float32),
    ], axis=0)                                                       # (8, 32)
    misc = misc.at[_R_ADD:_R_ADD + SEQ_PAD, :EMBED].set(add_rows)

    return conv_w, jnp.stack(slab_a), jnp.stack(w2s), heads_w, misc


def vision_transformer_forward(params, x):
    """x: (B, C, H, W) NCHW float32 -> (y1, y2, y3)."""
    B = x.shape[0]
    # TODO(synk): ResizeModel source not provided; implemented as bilinear resize to (IMG, IMG).
    x = jax.image.resize(x, (B, C_IN, IMG, IMG), method="bilinear").astype(jnp.float32)

    patches = extract_patches(x)                                     # (B, NUM_PATCH, 768)

    # batch tiling: BT samples per grid step, BT a multiple of 8 (unmasked output stores),
    # capped at 128 so double-buffered blocks fit comfortably on v7x's smaller VMEM.
    BT = 128 if B >= 128 else ((B + 7) // 8) * 8
    B_pad = ((B + BT - 1) // BT) * BT
    if B_pad != B:
        patches = jnp.pad(patches, ((0, B_pad - B), (0, 0), (0, 0)))
    patches = patches.reshape(B_pad * NUM_PATCH, PATCH_DIM).astype(jnp.bfloat16)

    conv_w, slab_a, w2, heads_w, misc = _pack_params(params)

    grid = (B_pad // BT,)
    y = pl.pallas_call(
        _vit_kernel,
        out_shape=jax.ShapeDtypeStruct((B_pad, HEAD_PAD), jnp.float32),
        grid=grid,
        in_specs=[
            pl.BlockSpec((BT * NUM_PATCH, PATCH_DIM), lambda i: (i, 0)),      # patches (pipelined)
            pl.BlockSpec((PATCH_DIM, EMBED), lambda i: (0, 0)),               # conv_proj weight
            pl.BlockSpec((LAYERS, EMBED, 6 * EMBED), lambda i: (0, 0, 0)),    # [wqkv | wo | w1] slab
            pl.BlockSpec((LAYERS, MLP, EMBED), lambda i: (0, 0, 0)),          # w2 slab
            pl.BlockSpec((EMBED, HEAD_PAD), lambda i: (0, 0)),                # fused heads weight
            pl.BlockSpec((MISC_ROWS, HEAD_PAD), lambda i: (0, 0)),            # small f32 params
        ],
        out_specs=pl.BlockSpec((BT, HEAD_PAD), lambda i: (i, 0)),
        compiler_params=pltpu.CompilerParams(
            dimension_semantics=("parallel",),      # shard batch blocks across TensorCores
            vmem_limit_bytes=64 * 1024 * 1024,      # actual usage is a few MB; 64 MiB is safe on v5e/v6e/v7x
        ),
    )(patches, conv_w, slab_a, w2, heads_w, misc)

    y = y[:B]
    return y[:, :D1], y[:, D1:D1 + D2], y[:, D1 + D2:D1 + D2 + D3]


def init_params(key):
    kit = iter(jax.random.split(key, 128))

    def nrm(shape, scale=0.02):
        return (scale * jax.random.normal(next(kit), shape)).astype(jnp.float32)

    p = {
        "conv_w": nrm((C_IN * PATCH * PATCH, EMBED)),                # conv_proj weight, flattened
        "conv_b": jnp.zeros((1, EMBED), jnp.float32),
        "cls": nrm((1, 1, EMBED)),
        "pos": nrm((1, SEQ, EMBED)),
        "ln_g": jnp.ones((1, EMBED), jnp.float32),
        "ln_b": jnp.zeros((1, EMBED), jnp.float32),
        "h1_w": nrm((EMBED, D1)),
        "h1_b": jnp.zeros((1, D1), jnp.float32),
        "h2_w": nrm((EMBED, D2)),
        "h2_b": jnp.zeros((1, D2), jnp.float32),
        "h3_w": nrm((EMBED, D3)),
        "h3_b": jnp.zeros((1, D3), jnp.float32),
    }
    layers = []
    for _ in range(LAYERS):
        layers.append(dict(
            ln1_g=jnp.ones((1, EMBED), jnp.float32), ln1_b=jnp.zeros((1, EMBED), jnp.float32),
            qkv_w=nrm((EMBED, 3 * EMBED)), qkv_b=jnp.zeros((1, 3 * EMBED), jnp.float32),
            out_w=nrm((EMBED, EMBED)), out_b=jnp.zeros((1, EMBED), jnp.float32),
            ln2_g=jnp.ones((1, EMBED), jnp.float32), ln2_b=jnp.zeros((1, EMBED), jnp.float32),
            w1=nrm((EMBED, MLP)), b1=jnp.zeros((1, MLP), jnp.float32),
            w2=nrm((MLP, EMBED)), b2=jnp.zeros((1, EMBED), jnp.float32),
        ))
    p["layers"] = layers
    return p


# ------------------------------------------ main ----------------------------------------------
if __name__ == "__main__":
    key = jax.random.PRNGKey(0)
    pkey, xkey = jax.random.split(key)
    params = init_params(pkey)

    # small NCHW input; ResizeModel maps it to (B, 3, IMG, IMG)
    x = jax.random.normal(xkey, (2, 3, 16, 16), dtype=jnp.float32)

    fwd = jax.jit(vision_transformer_forward)
    y1, y2, y3 = fwd(params, x)
    jax.block_until_ready((y1, y2, y3))

    assert y1.shape == (2, D1)
    assert y2.shape == (2, D2)
    assert y3.shape == (2, D3)
    assert bool(jnp.all(jnp.isfinite(y1))) and bool(jnp.all(jnp.isfinite(y2))) and bool(jnp.all(jnp.isfinite(y3)))
    print("KERNEL_OK")
</pallas_src>

<mosaic_0001>
module attributes {stable_mosaic.version = 11 : i64} {
  func.func @_vit_kernel(%arg0: i32, %arg1: memref<32x768xbf16, #tpu.memory_space<vmem>>, %arg2: memref<768x32xbf16, #tpu.memory_space<vmem>>, %arg3: memref<2x32x192xbf16, #tpu.memory_space<vmem>>, %arg4: memref<2x64x32xbf16, #tpu.memory_space<vmem>>, %arg5: memref<32x128xbf16, #tpu.memory_space<vmem>>, %arg6: memref<32x128xf32, #tpu.memory_space<vmem>>, %arg7: memref<8x128xf32, #tpu.memory_space<vmem>>) attributes {dimension_semantics = [#tpu.dimension_semantics<parallel>], iteration_bounds = array<i64: 1>, scalar_prefetch = 0 : i64, scratch_operands = 0 : i64, tpu.core_type = #tpu.core_type<tc>, window_params = [{transform_indices = @transform_0, window_bounds = array<i64: 32, 768>}, {pipeline_mode = #tpu.pipeline_mode<synchronous>, transform_indices = @transform_1, window_bounds = array<i64: 768, 32>}, {pipeline_mode = #tpu.pipeline_mode<synchronous>, transform_indices = @transform_2, window_bounds = array<i64: 2, 32, 192>}, {pipeline_mode = #tpu.pipeline_mode<synchronous>, transform_indices = @transform_3, window_bounds = array<i64: 2, 64, 32>}, {pipeline_mode = #tpu.pipeline_mode<synchronous>, transform_indices = @transform_4, window_bounds = array<i64: 32, 128>}, {pipeline_mode = #tpu.pipeline_mode<synchronous>, transform_indices = @transform_5, window_bounds = array<i64: 32, 128>}, {transform_indices = @transform_6, window_bounds = array<i64: 8, 128>}]} {
    %c0 = arith.constant 0 : index
    %c0_0 = arith.constant 0 : index
    %0 = vector.load %arg6[%c0, %c0_0] : memref<32x128xf32, #tpu.memory_space<vmem>>, vector<32x128xf32>
    %c0_1 = arith.constant 0 : index
    %c0_2 = arith.constant 0 : index
    %1 = vector.load %arg1[%c0_1, %c0_2] : memref<32x768xbf16, #tpu.memory_space<vmem>>, vector<32x768xbf16>
    %c0_3 = arith.constant 0 : index
    %c0_4 = arith.constant 0 : index
    %2 = vector.load %arg2[%c0_3, %c0_4] : memref<768x32xbf16, #tpu.memory_space<vmem>>, vector<768x32xbf16>
    %cst = arith.constant dense<0.000000e+00> : vector<32x32xf32>
    %3 = tpu.matmul %1, %2, %cst {dimension_numbers = #tpu.dot_dimension_numbers<[1], [0], [0], [1], [0, 0, 1, 1], [], []>} : vector<32x768xbf16>, vector<768x32xbf16>, vector<32x32xf32> -> vector<32x32xf32>
    %4 = vector.shape_cast %3 : vector<32x32xf32> to vector<8x4x32xf32>
    %5 = vector.extract_strided_slice %0 {offsets = [19, 0], sizes = [8, 32], strides = [1, 1]} : vector<32x128xf32> to vector<8x32xf32>
    %cst_5 = arith.constant 0.000000e+00 : f32
    %6 = vector.broadcast %cst_5 : f32 to vector<8x4x32xf32>
    %7 = tpu.concatenate %4, %6 in 1 : vector<8x4x32xf32>, vector<8x4x32xf32> -> vector<8x8x32xf32>
    %8 = vector.shape_cast %5 : vector<8x32xf32> to vector<1x8x32xf32>
    %9 = vector.broadcast %8 : vector<1x8x32xf32> to vector<8x8x32xf32>
    %10 = arith.addf %7, %9 : vector<8x8x32xf32>
    %11 = vector.shape_cast %10 : vector<8x8x32xf32> to vector<64x32xf32>
    %12 = tpu.iota {dimensions = array<i32: 1>} : vector<8x8xi32>
    %c5_i32 = arith.constant 5 : i32
    %13 = vector.broadcast %c5_i32 : i32 to vector<8x8xi32>
    %14 = arith.cmpi slt, %12, %13 : vector<8x8xi32>
    %cst_6 = arith.constant 0.000000e+00 : f32
    %cst_7 = arith.constant -1.000000e+09 : f32
    %15 = vector.broadcast %cst_6 : f32 to vector<8x8xf32>
    %16 = vector.broadcast %cst_7 : f32 to vector<8x8xf32>
    %17 = arith.select %14, %15, %16 : vector<8x8xi1>, vector<8x8xf32>
    %c0_8 = arith.constant 0 : index
    %c0_9 = arith.constant 0 : index
    %c0_10 = arith.constant 0 : index
    %18 = vector.load %arg3[%c0_8, %c0_9, %c0_10] : memref<2x32x192xbf16, #tpu.memory_space<vmem>>, vector<1x32x192xbf16>
    %19 = vector.shape_cast %18 : vector<1x32x192xbf16> to vector<32x192xbf16>
    %20 = vector.extract_strided_slice %19 {offsets = [0, 0], sizes = [32, 96], strides = [1, 1]} : vector<32x192xbf16> to vector<32x96xbf16>
    %21 = vector.extract_strided_slice %19 {offsets = [0, 96], sizes = [32, 32], strides = [1, 1]} : vector<32x192xbf16> to vector<32x32xbf16>
    %22 = vector.shape_cast %21 : vector<32x32xbf16> to vector<4x8x32xbf16>
    %23 = vector.extract_strided_slice %19 {offsets = [0, 128], sizes = [32, 64], strides = [1, 1]} : vector<32x192xbf16> to vector<32x64xbf16>
    %c0_11 = arith.constant 0 : index
    %c0_12 = arith.constant 0 : index
    %c0_13 = arith.constant 0 : index
    %24 = vector.load %arg4[%c0_11, %c0_12, %c0_13] : memref<2x64x32xbf16, #tpu.memory_space<vmem>>, vector<1x64x32xbf16>
    %25 = vector.shape_cast %24 : vector<1x64x32xbf16> to vector<64x32xbf16>
    %26 = vector.extract_strided_slice %0 {offsets = [0, 0], sizes = [1, 32], strides = [1, 1]} : vector<32x128xf32> to vector<1x32xf32>
    %27 = vector.extract_strided_slice %0 {offsets = [1, 0], sizes = [1, 32], strides = [1, 1]} : vector<32x128xf32> to vector<1x32xf32>
    %28 = vector.extract_strided_slice %0 {offsets = [2, 0], sizes = [1, 96], strides = [1, 1]} : vector<32x128xf32> to vector<1x96xf32>
    %29 = vector.extract_strided_slice %0 {offsets = [3, 0], sizes = [1, 32], strides = [1, 1]} : vector<32x128xf32> to vector<1x32xf32>
    %30 = vector.extract_strided_slice %0 {offsets = [4, 0], sizes = [1, 32], strides = [1, 1]} : vector<32x128xf32> to vector<1x32xf32>
    %31 = vector.extract_strided_slice %0 {offsets = [5, 0], sizes = [1, 32], strides = [1, 1]} : vector<32x128xf32> to vector<1x32xf32>
    %32 = vector.extract_strided_slice %0 {offsets = [6, 0], sizes = [1, 64], strides = [1, 1]} : vector<32x128xf32> to vector<1x64xf32>
    %33 = vector.extract_strided_slice %0 {offsets = [7, 0], sizes = [1, 32], strides = [1, 1]} : vector<32x128xf32> to vector<1x32xf32>
    %cst_14 = arith.constant dense<0.000000e+00> : vector<64xf32>
    %34 = vector.multi_reduction <add>, %11, %cst_14 [1] : vector<64x32xf32> to vector<64xf32>
    %35 = vector.shape_cast %34 : vector<64xf32> to vector<64x1xf32>
    %cst_15 = arith.constant 3.200000e+01 : f32
    %36 = vector.broadcast %cst_15 : f32 to vector<64x1xf32>
    %37 = arith.divf %35, %36 : vector<64x1xf32>
    %38 = vector.broadcast %37 : vector<64x1xf32> to vector<64x32xf32>
    %39 = arith.subf %11, %38 : vector<64x32xf32>
    %40 = arith.mulf %39, %39 : vector<64x32xf32>
    %cst_16 = arith.constant dense<0.000000e+00> : vector<64xf32>
    %41 = vector.multi_reduction <add>, %40, %cst_16 [1] : vector<64x32xf32> to vector<64xf32>
    %42 = vector.shape_cast %41 : vector<64xf32> to vector<64x1xf32>
    %cst_17 = arith.constant 3.200000e+01 : f32
    %43 = vector.broadcast %cst_17 : f32 to vector<64x1xf32>
    %44 = arith.divf %42, %43 : vector<64x1xf32>
    %45 = vector.broadcast %37 : vector<64x1xf32> to vector<64x32xf32>
    %46 = arith.subf %11, %45 : vector<64x32xf32>
    %cst_18 = arith.constant 9.99999997E-7 : f32
    %47 = vector.broadcast %cst_18 : f32 to vector<64x1xf32>
    %48 = arith.addf %44, %47 : vector<64x1xf32>
    %49 = math.rsqrt %48 : vector<64x1xf32>
    %50 = vector.broadcast %49 : vector<64x1xf32> to vector<64x32xf32>
    %51 = arith.mulf %46, %50 : vector<64x32xf32>
    %52 = vector.broadcast %26 : vector<1x32xf32> to vector<64x32xf32>
    %53 = arith.mulf %51, %52 : vector<64x32xf32>
    %54 = vector.broadcast %27 : vector<1x32xf32> to vector<64x32xf32>
    %55 = arith.addf %53, %54 : vector<64x32xf32>
    %56 = arith.truncf %55 : vector<64x32xf32> to vector<64x32xbf16>
    %cst_19 = arith.constant dense<0.000000e+00> : vector<64x96xf32>
    %57 = tpu.matmul %56, %20, %cst_19 {dimension_numbers = #tpu.dot_dimension_numbers<[1], [0], [0], [1], [0, 0, 1, 1], [], []>} : vector<64x32xbf16>, vector<32x96xbf16>, vector<64x96xf32> -> vector<64x96xf32>
    %58 = vector.broadcast %28 : vector<1x96xf32> to vector<64x96xf32>
    %59 = arith.addf %57, %58 : vector<64x96xf32>
    %60 = tpu.transpose %59, [1, 0] : vector<64x96xf32> -> vector<96x64xf32>
    %61 = vector.shape_cast %60 : vector<96x64xf32> to vector<12x8x64xf32>
    %62 = tpu.transpose %61, [0, 2, 1] : vector<12x8x64xf32> -> vector<12x64x8xf32>
    %63 = vector.extract_strided_slice %62 {offsets = [0, 0, 0], sizes = [4, 64, 8], strides = [1, 1, 1]} : vector<12x64x8xf32> to vector<4x64x8xf32>
    %64 = vector.shape_cast %63 : vector<4x64x8xf32> to vector<32x8x8xf32>
    %65 = vector.extract_strided_slice %62 {offsets = [4, 0, 0], sizes = [4, 64, 8], strides = [1, 1, 1]} : vector<12x64x8xf32> to vector<4x64x8xf32>
    %66 = vector.shape_cast %65 : vector<4x64x8xf32> to vector<32x8x8xf32>
    %67 = vector.extract_strided_slice %62 {offsets = [8, 0, 0], sizes = [4, 64, 8], strides = [1, 1, 1]} : vector<12x64x8xf32> to vector<4x64x8xf32>
    %68 = vector.shape_cast %67 : vector<4x64x8xf32> to vector<32x8x8xf32>
    "tpu.trace_start"() <{level = 10 : i32, message = "nqd,nkd->nqk"}> : () -> ()
    %cst_20 = arith.constant dense<0.000000e+00> : vector<32x8x8xf32>
    %69 = tpu.matmul %64, %66, %cst_20 {dimension_numbers = #tpu.dot_dimension_numbers<[2], [2], [1], [1], [0, 0, 0, 1, 1, 1], [0], [0]>} : vector<32x8x8xf32>, vector<32x8x8xf32>, vector<32x8x8xf32> -> vector<32x8x8xf32>
    "tpu.trace_stop"() : () -> ()
    %70 = vector.shape_cast %17 : vector<8x8xf32> to vector<1x8x8xf32>
    %71 = vector.broadcast %70 : vector<1x8x8xf32> to vector<32x8x8xf32>
    %72 = arith.addf %69, %71 : vector<32x8x8xf32>
    %cst_21 = arith.constant dense<0xFF800000> : vector<32x8xf32>
    %73 = vector.multi_reduction <maximumf>, %72, %cst_21 [2] : vector<32x8x8xf32> to vector<32x8xf32>
    %74 = vector.shape_cast %73 : vector<32x8xf32> to vector<32x8x1xf32>
    %75 = vector.broadcast %74 : vector<32x8x1xf32> to vector<32x8x8xf32>
    %76 = arith.subf %72, %75 : vector<32x8x8xf32>
    %77 = math.exp %76 : vector<32x8x8xf32>
    %cst_22 = arith.constant dense<0.000000e+00> : vector<32x8xf32>
    %78 = vector.multi_reduction <add>, %77, %cst_22 [2] : vector<32x8x8xf32> to vector<32x8xf32>
    %79 = vector.shape_cast %78 : vector<32x8xf32> to vector<32x8x1xf32>
    %80 = tpu.reciprocal %79 {approx = true} : vector<32x8x1xf32> -> vector<32x8x1xf32>
    %81 = vector.broadcast %80 : vector<32x8x1xf32> to vector<32x8x8xf32>
    %82 = arith.mulf %77, %81 : vector<32x8x8xf32>
    "tpu.trace_start"() <{level = 10 : i32, message = "nqk,nkd->nqd"}> : () -> ()
    %cst_23 = arith.constant dense<0.000000e+00> : vector<32x8x8xf32>
    %83 = tpu.matmul %82, %68, %cst_23 {dimension_numbers = #tpu.dot_dimension_numbers<[2], [1], [1], [2], [0, 0, 0, 1, 1, 2], [0], [0]>} : vector<32x8x8xf32>, vector<32x8x8xf32>, vector<32x8x8xf32> -> vector<32x8x8xf32>
    "tpu.trace_stop"() : () -> ()
    %84 = vector.shape_cast %83 : vector<32x8x8xf32> to vector<4x64x8xf32>
    %85 = arith.truncf %84 : vector<4x64x8xf32> to vector<4x64x8xbf16>
    "tpu.trace_start"() <{level = 10 : i32, message = "hnd,hde->hne"}> : () -> ()
    %cst_24 = arith.constant dense<0.000000e+00> : vector<4x64x32xf32>
    %86 = tpu.matmul %85, %22, %cst_24 {dimension_numbers = #tpu.dot_dimension_numbers<[2], [1], [1], [2], [0, 0, 0, 1, 1, 2], [0], [0]>} : vector<4x64x8xbf16>, vector<4x8x32xbf16>, vector<4x64x32xf32> -> vector<4x64x32xf32>
    "tpu.trace_stop"() : () -> ()
    %87 = vector.extract_strided_slice %86 {offsets = [0, 0, 0], sizes = [1, 64, 32], strides = [1, 1, 1]} : vector<4x64x32xf32> to vector<1x64x32xf32>
    %88 = vector.shape_cast %87 : vector<1x64x32xf32> to vector<64x32xf32>
    %89 = vector.extract_strided_slice %86 {offsets = [1, 0, 0], sizes = [1, 64, 32], strides = [1, 1, 1]} : vector<4x64x32xf32> to vector<1x64x32xf32>
    %90 = vector.shape_cast %89 : vector<1x64x32xf32> to vector<64x32xf32>
    %91 = arith.addf %88, %90 : vector<64x32xf32>
    %92 = vector.extract_strided_slice %86 {offsets = [2, 0, 0], sizes = [1, 64, 32], strides = [1, 1, 1]} : vector<4x64x32xf32> to vector<1x64x32xf32>
    %93 = vector.shape_cast %92 : vector<1x64x32xf32> to vector<64x32xf32>
    %94 = arith.addf %91, %93 : vector<64x32xf32>
    %95 = vector.extract_strided_slice %86 {offsets = [3, 0, 0], sizes = [1, 64, 32], strides = [1, 1, 1]} : vector<4x64x32xf32> to vector<1x64x32xf32>
    %96 = vector.shape_cast %95 : vector<1x64x32xf32> to vector<64x32xf32>
    %97 = arith.addf %94, %96 : vector<64x32xf32>
    %98 = arith.addf %11, %97 : vector<64x32xf32>
    %99 = vector.broadcast %29 : vector<1x32xf32> to vector<64x32xf32>
    %100 = arith.addf %98, %99 : vector<64x32xf32>
    %cst_25 = arith.constant dense<0.000000e+00> : vector<64xf32>
    %101 = vector.multi_reduction <add>, %100, %cst_25 [1] : vector<64x32xf32> to vector<64xf32>
    %102 = vector.shape_cast %101 : vector<64xf32> to vector<64x1xf32>
    %cst_26 = arith.constant 3.200000e+01 : f32
    %103 = vector.broadcast %cst_26 : f32 to vector<64x1xf32>
    %104 = arith.divf %102, %103 : vector<64x1xf32>
    %105 = vector.broadcast %104 : vector<64x1xf32> to vector<64x32xf32>
    %106 = arith.subf %100, %105 : vector<64x32xf32>
    %107 = arith.mulf %106, %106 : vector<64x32xf32>
    %cst_27 = arith.constant dense<0.000000e+00> : vector<64xf32>
    %108 = vector.multi_reduction <add>, %107, %cst_27 [1] : vector<64x32xf32> to vector<64xf32>
    %109 = vector.shape_cast %108 : vector<64xf32> to vector<64x1xf32>
    %cst_28 = arith.constant 3.200000e+01 : f32
    %110 = vector.broadcast %cst_28 : f32 to vector<64x1xf32>
    %111 = arith.divf %109, %110 : vector<64x1xf32>
    %112 = vector.broadcast %104 : vector<64x1xf32> to vector<64x32xf32>
    %113 = arith.subf %100, %112 : vector<64x32xf32>
    %cst_29 = arith.constant 9.99999997E-7 : f32
    %114 = vector.broadcast %cst_29 : f32 to vector<64x1xf32>
    %115 = arith.addf %111, %114 : vector<64x1xf32>
    %116 = math.rsqrt %115 : vector<64x1xf32>
    %117 = vector.broadcast %116 : vector<64x1xf32> to vector<64x32xf32>
    %118 = arith.mulf %113, %117 : vector<64x32xf32>
    %119 = vector.broadcast %30 : vector<1x32xf32> to vector<64x32xf32>
    %120 = arith.mulf %118, %119 : vector<64x32xf32>
    %121 = vector.broadcast %31 : vector<1x32xf32> to vector<64x32xf32>
    %122 = arith.addf %120, %121 : vector<64x32xf32>
    %123 = arith.truncf %122 : vector<64x32xf32> to vector<64x32xbf16>
    %cst_30 = arith.constant dense<0.000000e+00> : vector<64x64xf32>
    %124 = tpu.matmul %123, %23, %cst_30 {dimension_numbers = #tpu.dot_dimension_numbers<[1], [0], [0], [1], [0, 0, 1, 1], [], []>} : vector<64x32xbf16>, vector<32x64xbf16>, vector<64x64xf32> -> vector<64x64xf32>
    %125 = vector.broadcast %32 : vector<1x64xf32> to vector<64x64xf32>
    %126 = arith.addf %124, %125 : vector<64x64xf32>
    %127 = arith.mulf %126, %126 : vector<64x64xf32>
    %128 = arith.mulf %126, %127 : vector<64x64xf32>
    %cst_31 = arith.constant 4.471500e-02 : f32
    %129 = vector.broadcast %cst_31 : f32 to vector<64x64xf32>
    %130 = arith.mulf %129, %128 : vector<64x64xf32>
    %131 = arith.addf %126, %130 : vector<64x64xf32>
    %cst_32 = arith.constant 0.797884583 : f32
    %132 = vector.broadcast %cst_32 : f32 to vector<64x64xf32>
    %133 = arith.mulf %132, %131 : vector<64x64xf32>
    %134 = math.tanh %133 : vector<64x64xf32>
    %cst_33 = arith.constant 1.000000e+00 : f32
    %135 = vector.broadcast %cst_33 : f32 to vector<64x64xf32>
    %136 = arith.addf %135, %134 : vector<64x64xf32>
    %cst_34 = arith.constant 5.000000e-01 : f32
    %137 = vector.broadcast %cst_34 : f32 to vector<64x64xf32>
    %138 = arith.mulf %137, %136 : vector<64x64xf32>
    %139 = arith.mulf %126, %138 : vector<64x64xf32>
    %140 = arith.truncf %139 : vector<64x64xf32> to vector<64x64xbf16>
    %cst_35 = arith.constant dense<0.000000e+00> : vector<64x32xf32>
    %141 = tpu.matmul %140, %25, %cst_35 {dimension_numbers = #tpu.dot_dimension_numbers<[1], [0], [0], [1], [0, 0, 1, 1], [], []>} : vector<64x64xbf16>, vector<64x32xbf16>, vector<64x32xf32> -> vector<64x32xf32>
    %142 = vector.broadcast %33 : vector<1x32xf32> to vector<64x32xf32>
    %143 = arith.addf %141, %142 : vector<64x32xf32>
    %144 = arith.addf %100, %143 : vector<64x32xf32>
    %c1 = arith.constant 1 : index
    %c0_36 = arith.constant 0 : index
    %c0_37 = arith.constant 0 : index
    %145 = vector.load %arg3[%c1, %c0_36, %c0_37] : memref<2x32x192xbf16, #tpu.memory_space<vmem>>, vector<1x32x192xbf16>
    %146 = vector.shape_cast %145 : vector<1x32x192xbf16> to vector<32x192xbf16>
    %147 = vector.extract_strided_slice %146 {offsets = [0, 0], sizes = [32, 96], strides = [1, 1]} : vector<32x192xbf16> to vector<32x96xbf16>
    %148 = vector.extract_strided_slice %146 {offsets = [0, 96], sizes = [32, 32], strides = [1, 1]} : vector<32x192xbf16> to vector<32x32xbf16>
    %149 = vector.shape_cast %148 : vector<32x32xbf16> to vector<4x8x32xbf16>
    %150 = vector.extract_strided_slice %146 {offsets = [0, 128], sizes = [32, 64], strides = [1, 1]} : vector<32x192xbf16> to vector<32x64xbf16>
    %c1_38 = arith.constant 1 : index
    %c0_39 = arith.constant 0 : index
    %c0_40 = arith.constant 0 : index
    %151 = vector.load %arg4[%c1_38, %c0_39, %c0_40] : memref<2x64x32xbf16, #tpu.memory_space<vmem>>, vector<1x64x32xbf16>
    %152 = vector.shape_cast %151 : vector<1x64x32xbf16> to vector<64x32xbf16>
    %153 = vector.extract_strided_slice %0 {offsets = [8, 0], sizes = [1, 32], strides = [1, 1]} : vector<32x128xf32> to vector<1x32xf32>
    %154 = vector.extract_strided_slice %0 {offsets = [9, 0], sizes = [1, 32], strides = [1, 1]} : vector<32x128xf32> to vector<1x32xf32>
    %155 = vector.extract_strided_slice %0 {offsets = [10, 0], sizes = [1, 96], strides = [1, 1]} : vector<32x128xf32> to vector<1x96xf32>
    %156 = vector.extract_strided_slice %0 {offsets = [11, 0], sizes = [1, 32], strides = [1, 1]} : vector<32x128xf32> to vector<1x32xf32>
    %157 = vector.extract_strided_slice %0 {offsets = [12, 0], sizes = [1, 32], strides = [1, 1]} : vector<32x128xf32> to vector<1x32xf32>
    %158 = vector.extract_strided_slice %0 {offsets = [13, 0], sizes = [1, 32], strides = [1, 1]} : vector<32x128xf32> to vector<1x32xf32>
    %159 = vector.extract_strided_slice %0 {offsets = [14, 0], sizes = [1, 64], strides = [1, 1]} : vector<32x128xf32> to vector<1x64xf32>
    %160 = vector.extract_strided_slice %0 {offsets = [15, 0], sizes = [1, 32], strides = [1, 1]} : vector<32x128xf32> to vector<1x32xf32>
    %cst_41 = arith.constant dense<0.000000e+00> : vector<64xf32>
    %161 = vector.multi_reduction <add>, %144, %cst_41 [1] : vector<64x32xf32> to vector<64xf32>
    %162 = vector.shape_cast %161 : vector<64xf32> to vector<64x1xf32>
    %cst_42 = arith.constant 3.200000e+01 : f32
    %163 = vector.broadcast %cst_42 : f32 to vector<64x1xf32>
    %164 = arith.divf %162, %163 : vector<64x1xf32>
    %165 = vector.broadcast %164 : vector<64x1xf32> to vector<64x32xf32>
    %166 = arith.subf %144, %165 : vector<64x32xf32>
    %167 = arith.mulf %166, %166 : vector<64x32xf32>
    %cst_43 = arith.constant dense<0.000000e+00> : vector<64xf32>
    %168 = vector.multi_reduction <add>, %167, %cst_43 [1] : vector<64x32xf32> to vector<64xf32>
    %169 = vector.shape_cast %168 : vector<64xf32> to vector<64x1xf32>
    %cst_44 = arith.constant 3.200000e+01 : f32
    %170 = vector.broadcast %cst_44 : f32 to vector<64x1xf32>
    %171 = arith.divf %169, %170 : vector<64x1xf32>
    %172 = vector.broadcast %164 : vector<64x1xf32> to vector<64x32xf32>
    %173 = arith.subf %144, %172 : vector<64x32xf32>
    %cst_45 = arith.constant 9.99999997E-7 : f32
    %174 = vector.broadcast %cst_45 : f32 to vector<64x1xf32>
    %175 = arith.addf %171, %174 : vector<64x1xf32>
    %176 = math.rsqrt %175 : vector<64x1xf32>
    %177 = vector.broadcast %176 : vector<64x1xf32> to vector<64x32xf32>
    %178 = arith.mulf %173, %177 : vector<64x32xf32>
    %179 = vector.broadcast %153 : vector<1x32xf32> to vector<64x32xf32>
    %180 = arith.mulf %178, %179 : vector<64x32xf32>
    %181 = vector.broadcast %154 : vector<1x32xf32> to vector<64x32xf32>
    %182 = arith.addf %180, %181 : vector<64x32xf32>
    %183 = arith.truncf %182 : vector<64x32xf32> to vector<64x32xbf16>
    %cst_46 = arith.constant dense<0.000000e+00> : vector<64x96xf32>
    %184 = tpu.matmul %183, %147, %cst_46 {dimension_numbers = #tpu.dot_dimension_numbers<[1], [0], [0], [1], [0, 0, 1, 1], [], []>} : vector<64x32xbf16>, vector<32x96xbf16>, vector<64x96xf32> -> vector<64x96xf32>
    %185 = vector.broadcast %155 : vector<1x96xf32> to vector<64x96xf32>
    %186 = arith.addf %184, %185 : vector<64x96xf32>
    %187 = tpu.transpose %186, [1, 0] : vector<64x96xf32> -> vector<96x64xf32>
    %188 = vector.shape_cast %187 : vector<96x64xf32> to vector<12x8x64xf32>
    %189 = tpu.transpose %188, [0, 2, 1] : vector<12x8x64xf32> -> vector<12x64x8xf32>
    %190 = vector.extract_strided_slice %189 {offsets = [0, 0, 0], sizes = [4, 64, 8], strides = [1, 1, 1]} : vector<12x64x8xf32> to vector<4x64x8xf32>
    %191 = vector.shape_cast %190 : vector<4x64x8xf32> to vector<32x8x8xf32>
    %192 = vector.extract_strided_slice %189 {offsets = [4, 0, 0], sizes = [4, 64, 8], strides = [1, 1, 1]} : vector<12x64x8xf32> to vector<4x64x8xf32>
    %193 = vector.shape_cast %192 : vector<4x64x8xf32> to vector<32x8x8xf32>
    %194 = vector.extract_strided_slice %189 {offsets = [8, 0, 0], sizes = [4, 64, 8], strides = [1, 1, 1]} : vector<12x64x8xf32> to vector<4x64x8xf32>
    %195 = vector.shape_cast %194 : vector<4x64x8xf32> to vector<32x8x8xf32>
    "tpu.trace_start"() <{level = 10 : i32, message = "nqd,nkd->nqk"}> : () -> ()
    %cst_47 = arith.constant dense<0.000000e+00> : vector<32x8x8xf32>
    %196 = tpu.matmul %191, %193, %cst_47 {dimension_numbers = #tpu.dot_dimension_numbers<[2], [2], [1], [1], [0, 0, 0, 1, 1, 1], [0], [0]>} : vector<32x8x8xf32>, vector<32x8x8xf32>, vector<32x8x8xf32> -> vector<32x8x8xf32>
    "tpu.trace_stop"() : () -> ()
    %197 = vector.shape_cast %17 : vector<8x8xf32> to vector<1x8x8xf32>
    %198 = vector.broadcast %197 : vector<1x8x8xf32> to vector<32x8x8xf32>
    %199 = arith.addf %196, %198 : vector<32x8x8xf32>
    %cst_48 = arith.constant dense<0xFF800000> : vector<32x8xf32>
    %200 = vector.multi_reduction <maximumf>, %199, %cst_48 [2] : vector<32x8x8xf32> to vector<32x8xf32>
    %201 = vector.shape_cast %200 : vector<32x8xf32> to vector<32x8x1xf32>
    %202 = vector.broadcast %201 : vector<32x8x1xf32> to vector<32x8x8xf32>
    %203 = arith.subf %199, %202 : vector<32x8x8xf32>
    %204 = math.exp %203 : vector<32x8x8xf32>
    %cst_49 = arith.constant dense<0.000000e+00> : vector<32x8xf32>
    %205 = vector.multi_reduction <add>, %204, %cst_49 [2] : vector<32x8x8xf32> to vector<32x8xf32>
    %206 = vector.shape_cast %205 : vector<32x8xf32> to vector<32x8x1xf32>
    %207 = tpu.reciprocal %206 {approx = true} : vector<32x8x1xf32> -> vector<32x8x1xf32>
    %208 = vector.broadcast %207 : vector<32x8x1xf32> to vector<32x8x8xf32>
    %209 = arith.mulf %204, %208 : vector<32x8x8xf32>
    "tpu.trace_start"() <{level = 10 : i32, message = "nqk,nkd->nqd"}> : () -> ()
    %cst_50 = arith.constant dense<0.000000e+00> : vector<32x8x8xf32>
    %210 = tpu.matmul %209, %195, %cst_50 {dimension_numbers = #tpu.dot_dimension_numbers<[2], [1], [1], [2], [0, 0, 0, 1, 1, 2], [0], [0]>} : vector<32x8x8xf32>, vector<32x8x8xf32>, vector<32x8x8xf32> -> vector<32x8x8xf32>
    "tpu.trace_stop"() : () -> ()
    %211 = vector.shape_cast %210 : vector<32x8x8xf32> to vector<4x64x8xf32>
    %212 = arith.truncf %211 : vector<4x64x8xf32> to vector<4x64x8xbf16>
    "tpu.trace_start"() <{level = 10 : i32, message = "hnd,hde->hne"}> : () -> ()
    %cst_51 = arith.constant dense<0.000000e+00> : vector<4x64x32xf32>
    %213 = tpu.matmul %212, %149, %cst_51 {dimension_numbers = #tpu.dot_dimension_numbers<[2], [1], [1], [2], [0, 0, 0, 1, 1, 2], [0], [0]>} : vector<4x64x8xbf16>, vector<4x8x32xbf16>, vector<4x64x32xf32> -> vector<4x64x32xf32>
    "tpu.trace_stop"() : () -> ()
    %214 = vector.extract_strided_slice %213 {offsets = [0, 0, 0], sizes = [1, 64, 32], strides = [1, 1, 1]} : vector<4x64x32xf32> to vector<1x64x32xf32>
    %215 = vector.shape_cast %214 : vector<1x64x32xf32> to vector<64x32xf32>
    %216 = vector.extract_strided_slice %213 {offsets = [1, 0, 0], sizes = [1, 64, 32], strides = [1, 1, 1]} : vector<4x64x32xf32> to vector<1x64x32xf32>
    %217 = vector.shape_cast %216 : vector<1x64x32xf32> to vector<64x32xf32>
    %218 = arith.addf %215, %217 : vector<64x32xf32>
    %219 = vector.extract_strided_slice %213 {offsets = [2, 0, 0], sizes = [1, 64, 32], strides = [1, 1, 1]} : vector<4x64x32xf32> to vector<1x64x32xf32>
    %220 = vector.shape_cast %219 : vector<1x64x32xf32> to vector<64x32xf32>
    %221 = arith.addf %218, %220 : vector<64x32xf32>
    %222 = vector.extract_strided_slice %213 {offsets = [3, 0, 0], sizes = [1, 64, 32], strides = [1, 1, 1]} : vector<4x64x32xf32> to vector<1x64x32xf32>
    %223 = vector.shape_cast %222 : vector<1x64x32xf32> to vector<64x32xf32>
    %224 = arith.addf %221, %223 : vector<64x32xf32>
    %225 = arith.addf %144, %224 : vector<64x32xf32>
    %226 = vector.broadcast %156 : vector<1x32xf32> to vector<64x32xf32>
    %227 = arith.addf %225, %226 : vector<64x32xf32>
    %cst_52 = arith.constant dense<0.000000e+00> : vector<64xf32>
    %228 = vector.multi_reduction <add>, %227, %cst_52 [1] : vector<64x32xf32> to vector<64xf32>
    %229 = vector.shape_cast %228 : vector<64xf32> to vector<64x1xf32>
    %cst_53 = arith.constant 3.200000e+01 : f32
    %230 = vector.broadcast %cst_53 : f32 to vector<64x1xf32>
    %231 = arith.divf %229, %230 : vector<64x1xf32>
    %232 = vector.broadcast %231 : vector<64x1xf32> to vector<64x32xf32>
    %233 = arith.subf %227, %232 : vector<64x32xf32>
    %234 = arith.mulf %233, %233 : vector<64x32xf32>
    %cst_54 = arith.constant dense<0.000000e+00> : vector<64xf32>
    %235 = vector.multi_reduction <add>, %234, %cst_54 [1] : vector<64x32xf32> to vector<64xf32>
    %236 = vector.shape_cast %235 : vector<64xf32> to vector<64x1xf32>
    %cst_55 = arith.constant 3.200000e+01 : f32
    %237 = vector.broadcast %cst_55 : f32 to vector<64x1xf32>
    %238 = arith.divf %236, %237 : vector<64x1xf32>
    %239 = vector.broadcast %231 : vector<64x1xf32> to vector<64x32xf32>
    %240 = arith.subf %227, %239 : vector<64x32xf32>
    %cst_56 = arith.constant 9.99999997E-7 : f32
    %241 = vector.broadcast %cst_56 : f32 to vector<64x1xf32>
    %242 = arith.addf %238, %241 : vector<64x1xf32>
    %243 = math.rsqrt %242 : vector<64x1xf32>
    %244 = vector.broadcast %243 : vector<64x1xf32> to vector<64x32xf32>
    %245 = arith.mulf %240, %244 : vector<64x32xf32>
    %246 = vector.broadcast %157 : vector<1x32xf32> to vector<64x32xf32>
    %247 = arith.mulf %245, %246 : vector<64x32xf32>
    %248 = vector.broadcast %158 : vector<1x32xf32> to vector<64x32xf32>
    %249 = arith.addf %247, %248 : vector<64x32xf32>
    %250 = arith.truncf %249 : vector<64x32xf32> to vector<64x32xbf16>
    %cst_57 = arith.constant dense<0.000000e+00> : vector<64x64xf32>
    %251 = tpu.matmul %250, %150, %cst_57 {dimension_numbers = #tpu.dot_dimension_numbers<[1], [0], [0], [1], [0, 0, 1, 1], [], []>} : vector<64x32xbf16>, vector<32x64xbf16>, vector<64x64xf32> -> vector<64x64xf32>
    %252 = vector.broadcast %159 : vector<1x64xf32> to vector<64x64xf32>
    %253 = arith.addf %251, %252 : vector<64x64xf32>
    %254 = arith.mulf %253, %253 : vector<64x64xf32>
    %255 = arith.mulf %253, %254 : vector<64x64xf32>
    %cst_58 = arith.constant 4.471500e-02 : f32
    %256 = vector.broadcast %cst_58 : f32 to vector<64x64xf32>
    %257 = arith.mulf %256, %255 : vector<64x64xf32>
    %258 = arith.addf %253, %257 : vector<64x64xf32>
    %cst_59 = arith.constant 0.797884583 : f32
    %259 = vector.broadcast %cst_59 : f32 to vector<64x64xf32>
    %260 = arith.mulf %259, %258 : vector<64x64xf32>
    %261 = math.tanh %260 : vector<64x64xf32>
    %cst_60 = arith.constant 1.000000e+00 : f32
    %262 = vector.broadcast %cst_60 : f32 to vector<64x64xf32>
    %263 = arith.addf %262, %261 : vector<64x64xf32>
    %cst_61 = arith.constant 5.000000e-01 : f32
    %264 = vector.broadcast %cst_61 : f32 to vector<64x64xf32>
    %265 = arith.mulf %264, %263 : vector<64x64xf32>
    %266 = arith.mulf %253, %265 : vector<64x64xf32>
    %267 = arith.truncf %266 : vector<64x64xf32> to vector<64x64xbf16>
    %cst_62 = arith.constant dense<0.000000e+00> : vector<64x32xf32>
    %268 = tpu.matmul %267, %152, %cst_62 {dimension_numbers = #tpu.dot_dimension_numbers<[1], [0], [0], [1], [0, 0, 1, 1], [], []>} : vector<64x64xbf16>, vector<64x32xbf16>, vector<64x32xf32> -> vector<64x32xf32>
    %269 = vector.broadcast %160 : vector<1x32xf32> to vector<64x32xf32>
    %270 = arith.addf %268, %269 : vector<64x32xf32>
    %271 = arith.addf %227, %270 : vector<64x32xf32>
    %272 = vector.shape_cast %271 : vector<64x32xf32> to vector<8x8x32xf32>
    %273 = vector.extract_strided_slice %272 {offsets = [0, 4, 0], sizes = [8, 1, 32], strides = [1, 1, 1]} : vector<8x8x32xf32> to vector<8x1x32xf32>
    %274 = vector.shape_cast %273 : vector<8x1x32xf32> to vector<8x32xf32>
    %275 = vector.extract_strided_slice %0 {offsets = [16, 0], sizes = [1, 32], strides = [1, 1]} : vector<32x128xf32> to vector<1x32xf32>
    %276 = vector.extract_strided_slice %0 {offsets = [17, 0], sizes = [1, 32], strides = [1, 1]} : vector<32x128xf32> to vector<1x32xf32>
    %277 = vector.extract_strided_slice %0 {offsets = [18, 0], sizes = [1, 128], strides = [1, 1]} : vector<32x128xf32> to vector<1x128xf32>
    %cst_63 = arith.constant dense<0.000000e+00> : vector<8xf32>
    %278 = vector.multi_reduction <add>, %274, %cst_63 [1] : vector<8x32xf32> to vector<8xf32>
    %279 = vector.shape_cast %278 : vector<8xf32> to vector<8x1xf32>
    %cst_64 = arith.constant 3.200000e+01 : f32
    %280 = vector.broadcast %cst_64 : f32 to vector<8x1xf32>
    %281 = arith.divf %279, %280 : vector<8x1xf32>
    %282 = vector.broadcast %281 : vector<8x1xf32> to vector<8x32xf32>
    %283 = arith.subf %274, %282 : vector<8x32xf32>
    %284 = arith.mulf %283, %283 : vector<8x32xf32>
    %cst_65 = arith.constant dense<0.000000e+00> : vector<8xf32>
    %285 = vector.multi_reduction <add>, %284, %cst_65 [1] : vector<8x32xf32> to vector<8xf32>
    %286 = vector.shape_cast %285 : vector<8xf32> to vector<8x1xf32>
    %cst_66 = arith.constant 3.200000e+01 : f32
    %287 = vector.broadcast %cst_66 : f32 to vector<8x1xf32>
    %288 = arith.divf %286, %287 : vector<8x1xf32>
    %289 = vector.broadcast %281 : vector<8x1xf32> to vector<8x32xf32>
    %290 = arith.subf %274, %289 : vector<8x32xf32>
    %cst_67 = arith.constant 9.99999997E-7 : f32
    %291 = vector.broadcast %cst_67 : f32 to vector<8x1xf32>
    %292 = arith.addf %288, %291 : vector<8x1xf32>
    %293 = math.rsqrt %292 : vector<8x1xf32>
    %294 = vector.broadcast %293 : vector<8x1xf32> to vector<8x32xf32>
    %295 = arith.mulf %290, %294 : vector<8x32xf32>
    %296 = vector.broadcast %275 : vector<1x32xf32> to vector<8x32xf32>
    %297 = arith.mulf %295, %296 : vector<8x32xf32>
    %298 = vector.broadcast %276 : vector<1x32xf32> to vector<8x32xf32>
    %299 = arith.addf %297, %298 : vector<8x32xf32>
    %300 = arith.truncf %299 : vector<8x32xf32> to vector<8x32xbf16>
    %c0_68 = arith.constant 0 : index
    %c0_69 = arith.constant 0 : index
    %301 = vector.load %arg5[%c0_68, %c0_69] : memref<32x128xbf16, #tpu.memory_space<vmem>>, vector<32x128xbf16>
    %cst_70 = arith.constant dense<0.000000e+00> : vector<8x128xf32>
    %302 = tpu.matmul %300, %301, %cst_70 {dimension_numbers = #tpu.dot_dimension_numbers<[1], [0], [0], [1], [0, 0, 1, 1], [], []>} : vector<8x32xbf16>, vector<32x128xbf16>, vector<8x128xf32> -> vector<8x128xf32>
    %303 = vector.broadcast %277 : vector<1x128xf32> to vector<8x128xf32>
    %304 = arith.addf %302, %303 : vector<8x128xf32>
    %c0_71 = arith.constant 0 : index
    %c0_72 = arith.constant 0 : index
    %305 = vector.load %arg7[%c0_71, %c0_72] : memref<8x128xf32, #tpu.memory_space<vmem>>, vector<8x128xf32>
    tpu.vector_store %arg7[%c0_71, %c0_72], %304 {strides = array<i32>} : memref<8x128xf32, #tpu.memory_space<vmem>>, vector<8x128xf32>,
    return
  }
  func.func @transform_0(%arg0: i32) -> (i32, i32) {
    %c0_i32 = arith.constant 0 : i32
    %c0_i32_0 = arith.constant 0 : i32
    return %arg0, %c0_i32 : i32, i32
  }
  func.func @transform_1(%arg0: i32) -> (i32, i32) {
    %c0_i32 = arith.constant 0 : i32
    %c0_i32_0 = arith.constant 0 : i32
    %c0_i32_1 = arith.constant 0 : i32
    return %c0_i32, %c0_i32_0 : i32, i32
  }
  func.func @transform_2(%arg0: i32) -> (i32, i32, i32) {
    %c0_i32 = arith.constant 0 : i32
    %c0_i32_0 = arith.constant 0 : i32
    %c0_i32_1 = arith.constant 0 : i32
    %c0_i32_2 = arith.constant 0 : i32
    return %c0_i32, %c0_i32_0, %c0_i32_1 : i32, i32, i32
  }
  func.func @transform_3(%arg0: i32) -> (i32, i32, i32) {
    %c0_i32 = arith.constant 0 : i32
    %c0_i32_0 = arith.constant 0 : i32
    %c0_i32_1 = arith.constant 0 : i32
    %c0_i32_2 = arith.constant 0 : i32
    return %c0_i32, %c0_i32_0, %c0_i32_1 : i32, i32, i32
  }
  func.func @transform_4(%arg0: i32) -> (i32, i32) {
    %c0_i32 = arith.constant 0 : i32
    %c0_i32_0 = arith.constant 0 : i32
    %c0_i32_1 = arith.constant 0 : i32
    return %c0_i32, %c0_i32_0 : i32, i32
  }
  func.func @transform_5(%arg0: i32) -> (i32, i32) {
    %c0_i32 = arith.constant 0 : i32
    %c0_i32_0 = arith.constant 0 : i32
    %c0_i32_1 = arith.constant 0 : i32
    return %c0_i32, %c0_i32_0 : i32, i32
  }
  func.func @transform_6(%arg0: i32) -> (i32, i32) {
    %c0_i32 = arith.constant 0 : i32
    %c0_i32_0 = arith.constant 0 : i32
    return %arg0, %c0_i32 : i32, i32
  }
}

</mosaic_0001>

<bundles_post_ra>
// kernel: vision_transformer_forward.1
= control target key start
LH: loop header
LB: loop body
LE: loop exit
PB: predicated region body
PF: predicated region fallthrough
CT: control target
= control target key end

     0   :  { %11 = vsyncpa [#allocation3], 0  ;;  %s18924_s0 = inlined_call_operand.hbm [shape: bf16[32,768], index: 0, kind: input, shape index: {}]   ;;  %s18925_s1 = inlined_call_operand.hbm [shape: bf16[768,32], index: 1, kind: input, shape index: {}]   ;;  %s18926_s2 = inlined_call_operand.hbm [shape: bf16[2,32,192], index: 2, kind: input, shape index: {}]   ;;  %s18927_s3 = inlined_call_operand.hbm [shape: bf16[2,64,32], index: 3, kind: input, shape index: {}]   ;;  %s18928_s4 = inlined_call_operand.hbm [shape: bf16[32,128], index: 4, kind: input, shape index: {}]   ;;  %s18929_s5 = inlined_call_operand.hbm [shape: f32[32,128], index: 5, kind: input, shape index: {}]   ;;  %s18930_s6 = inlined_call_operand.hbm [shape: f32[8,128], index: 6, kind: output, shape index: {}]  }
   0x1   :  { %12 = vsyncpa [#allocation6], 0 }
   0x2   :  { %13 = vsyncpa [#allocation9], 0 }
   0x3   :  { %14 = vsyncpa [#allocation12], 0 }
   0x4   :  { %15 = vsyncpa [#allocation4], 0  ;;  %s16454_s21 = smov [#allocation5]   ;;  %s16290_s25 = scalar_lea.hbm %s18925_s1, 6144 }
   0x5   :  { %s33_s22 = sshll.u32 %s16454_s21, 4  ;;  %p16291_p0 = scmp.ne.s32.totalorder %s18925_s1, %s16290_s25  ;;  %s34_s22 = int_to_ptr.vmem [resolvable:$true] %s33_s22 }
   0x6   :  { %p16294_p1 = scmp.lt.u32.totalorder %s16290_s25, %s18925_s1 }
   0x8   :  { %p16296_p2 = pnand %p16294_p1, %p16291_p0 }
   0xa   :  { %16299 = shalt.err (!%p16296_p2)
}
   0xb   :  { %s16300_s30 = scalar_lea.vmem %s34_s22, 6144  ;;  %p16305_p4 = scmp.lt.s32.totalorder %s34_s22, %s34_s22 }
   0xc   :  { %p16301_p3 = scmp.ne.s32.totalorder %s34_s22, %s16300_s30  ;;  %p16306_p5 = scmp.lt.s32.totalorder %s16300_s30, %s16300_s30 }
   0xe   :  { %p16307_p6 = por %p16306_p5, %p16305_p4 }
  0x10   :  { %p16308_p7 = pnand %p16307_p6, %p16301_p3 }
  0x12   :  { %16311 = shalt.err (!%p16308_p7)
}
  0x13   :  { %s16455_s7 = smov 64   ;;  %s16456_s8 = smov 4  }
  0x14   :  { %39 = dma.hbm_to_vmem [thread:$0]  %s18925_s1, 6144, %s34_s22, [#allocation6], %s16455_s7, %s16455_s7, %s16456_s8  }
  0x15   :  { %s16457_s11 = smov [#allocation8]   ;;  %s16458_s13 = smov [#allocation2]  }
  0x16   :  { %s57_s12 = sshll.u32 %s16457_s11, 4  ;;  %s21_s14 = sshll.u32 %s16458_s13, 4  ;;  %s58_s12 = int_to_ptr.vmem [resolvable:$true] %s57_s12  ;;  %s22_s14 = int_to_ptr.vmem [resolvable:$true] %s21_s14 }
  0x17   :  { %s16312_s17 = scalar_lea.hbm %s18927_s3, 1024 }
  0x18   :  { %p16313_p8 = scmp.ne.s32.totalorder %s18927_s3, %s16312_s17  ;;  %p16316_p9 = scmp.lt.u32.totalorder %s16312_s17, %s18927_s3 }
  0x1a   :  { %p16318_p10 = pnand %p16316_p9, %p16313_p8 }
  0x1c   :  { %16321 = shalt.err (!%p16318_p10)
}
  0x1d   :  { %s16322_s1 = scalar_lea.vmem %s58_s12, 1024  ;;  %p16327_p12 = scmp.lt.s32.totalorder %s58_s12, %s58_s12 }
  0x1e   :  { %p16323_p11 = scmp.ne.s32.totalorder %s58_s12, %s16322_s1  ;;  %p16328_p13 = scmp.lt.s32.totalorder %s16322_s1, %s16322_s1 }
  0x20   :  { %p16329_p0 = por %p16328_p13, %p16327_p12 }
  0x22   :  { %p16330_p1 = pnand %p16329_p0, %p16323_p11 }
  0x24   :  { %16333 = shalt.err (!%p16330_p1)
}
  0x25   :  { %63 = dma.hbm_to_vmem [thread:$0]  %s18927_s3, 1024, %s58_s12, [#allocation9], %s16455_s7, %s16455_s7, %s16456_s8  }
  0x26   :  { %s16334_s26 = scalar_lea.hbm %s18924_s0, 1536 }
  0x27   :  { %p16335_p2 = scmp.ne.s32.totalorder %s18924_s0, %s16334_s26  ;;  %p16338_p3 = scmp.lt.u32.totalorder %s16334_s26, %s18924_s0 }
  0x29   :  { %p16340_p4 = pnand %p16338_p3, %p16335_p2 }
  0x2b   :  { %16343 = shalt.err (!%p16340_p4)
}
  0x2c   :  { %s16344_s9 = scalar_lea.vmem %s22_s14, 1536  ;;  %p16349_p6 = scmp.lt.s32.totalorder %s22_s14, %s22_s14 }
  0x2d   :  { %p16345_p5 = scmp.ne.s32.totalorder %s22_s14, %s16344_s9  ;;  %p16350_p7 = scmp.lt.s32.totalorder %s16344_s9, %s16344_s9 }
  0x2f   :  { %p16351_p8 = por %p16350_p7, %p16349_p6 }
  0x31   :  { %p16352_p9 = pnand %p16351_p8, %p16345_p5 }
  0x33   :  { %16355 = shalt.err (!%p16352_p9)
}
  0x34   :  { %s16459_s3 = smov 384   ;;  %s16460_s10 = smov 24  }
  0x35   :  { %27 = dma.hbm_to_vmem [thread:$0]  %s18924_s0, 1536, %s22_s14, [#allocation3], %s16459_s3, %s16459_s3, %s16460_s10  }
  0x36   :  { %s16461_s13 = smov [#allocation7]   ;;  %s16356_s18 = scalar_lea.hbm %s18926_s2, 1024 }
  0x37   :  { %s45_s15 = sshll.u32 %s16461_s13, 4  ;;  %p16357_p10 = scmp.ne.s32.totalorder %s18926_s2, %s16356_s18  ;;  %s46_s15 = int_to_ptr.vmem [resolvable:$true] %s45_s15 }
  0x38   :  { %p16360_p11 = scmp.lt.u32.totalorder %s16356_s18, %s18926_s2 }
  0x3a   :  { %p16362_p12 = pnand %p16360_p11, %p16357_p10 }
  0x3c   :  { %16365 = shalt.err (!%p16362_p12)
}
  0x3d   :  { %s16366_s22 = scalar_lea.vmem %s46_s15, 1024  ;;  %p16371_p0 = scmp.lt.s32.totalorder %s46_s15, %s46_s15 }
  0x3e   :  { %p16367_p13 = scmp.ne.s32.totalorder %s46_s15, %s16366_s22  ;;  %p16372_p1 = scmp.lt.s32.totalorder %s16366_s22, %s16366_s22 }
  0x40   :  { %p16373_p2 = por %p16372_p1, %p16371_p0 }
  0x42   :  { %p16374_p3 = pnand %p16373_p2, %p16367_p13 }
  0x44   :  { %16377 = shalt.err (!%p16374_p3)
}
  0x45   :  { %s16462_s0 = smov 128   ;;  %s16463_s14 = smov 8  }
  0x46   :  { %51 = dma.hbm_to_vmem [thread:$0]  %s18926_s2, 1024, %s46_s15, [#allocation6], %s16462_s0, %s16462_s0, %s16463_s14  }
  0x47   :  { %s16464_s25 = smov [#allocation10]   ;;  %s16465_s27 = smov [#allocation11]  }
  0x48   :  { %s69_s26 = sshll.u32 %s16464_s25, 4  ;;  %s81_s28 = sshll.u32 %s16465_s27, 4  ;;  %s70_s26 = int_to_ptr.vmem [resolvable:$true] %s69_s26  ;;  %s16563_s28 = int_to_ptr.vmem [resolvable:$true] %s81_s28 }
  0x49   :  { %s16378_s9 = scalar_lea.hbm %s18928_s4, 256 }
  0x4a   :  { %p16379_p4 = scmp.ne.s32.totalorder %s18928_s4, %s16378_s9  ;;  %p16382_p5 = scmp.lt.u32.totalorder %s16378_s9, %s18928_s4 }
  0x4c   :  { %p16384_p6 = pnand %p16382_p5, %p16379_p4 }
  0x4e   :  { %16387 = shalt.err (!%p16384_p6)
}
  0x4f   :  { %s16388_s2 = scalar_lea.vmem %s70_s26, 256  ;;  %p16393_p8 = scmp.lt.s32.totalorder %s70_s26, %s70_s26 }
  0x50   :  { %p16389_p7 = scmp.ne.s32.totalorder %s70_s26, %s16388_s2  ;;  %p16394_p9 = scmp.lt.s32.totalorder %s16388_s2, %s16388_s2 }
  0x52   :  { %p16395_p10 = por %p16394_p9, %p16393_p8 }
  0x54   :  { %p16396_p11 = pnand %p16395_p10, %p16389_p7 }
  0x56   :  { %16399 = shalt.err (!%p16396_p11)
}
  0x57   :  { %75 = dma.hbm_to_vmem [thread:$0]  %s18928_s4, 256, %s70_s26, [#allocation9], %s16455_s7, %s16455_s7, %s16456_s8  }
  0x58   :  { %s16400_s18 = scalar_lea.hbm %s18929_s5, 512 }
  0x59   :  { %p16401_p12 = scmp.ne.s32.totalorder %s18929_s5, %s16400_s18  ;;  %p16404_p13 = scmp.lt.u32.totalorder %s16400_s18, %s18929_s5 }
  0x5b   :  { %p16406_p0 = pnand %p16404_p13, %p16401_p12 }
  0x5d   :  { %16409 = shalt.err (!%p16406_p0)
}
  0x5e   :  { %s16410_s22 = scalar_lea.vmem %s16563_s28, 512  ;;  %p16415_p2 = scmp.lt.s32.totalorder %s16563_s28, %s16563_s28 }
  0x5f   :  { %p16411_p1 = scmp.ne.s32.totalorder %s16563_s28, %s16410_s22  ;;  %p16416_p3 = scmp.lt.s32.totalorder %s16410_s22, %s16410_s22 }
  0x61   :  { %p16417_p4 = por %p16416_p3, %p16415_p2 }
  0x63   :  { %p16418_p5 = pnand %p16417_p4, %p16411_p1 }
  0x65   :  { %16421 = shalt.err (!%p16418_p5)
}
  0x66   :  { %87 = dma.hbm_to_vmem [thread:$0]  %s18929_s5, 512, %s16563_s28, [#allocation12], %s16462_s0, %s16462_s0, %s16463_s14  }
  0x67   :  { %16444 = dma.done.wait [#allocation3], 1536  }
  0x68   :  { %16445 = vsyncadd [#allocation3], 4294965760 }
  0x69   :  { %16446 = dma.done.wait [#allocation6], 7168  }
  0x6a   :  { %16447 = vsyncadd [#allocation6], 4294960128 }
  0x6b   :  { %16448 = dma.done.wait [#allocation9], 1280  }
  0x6c   :  { %16449 = vsyncadd [#allocation9], 4294966016 }
  0x6d   :  { %16450 = dma.done.wait [#allocation12], 512  }
  0x6e   :  { %16451 = vsyncadd [#allocation12], 4294966784  ;;  %v15831_v0 = vld [vmem:[#allocation5 + $0x40] sm:$0xff]   ;;  %v15835_v4 = vld [vmem:[#allocation5 + $0x48] sm:$0xff]   ;;  %vm737_vm0 = vcmask 1044480   ;;  %vm726_vm1 = vcmask 1043456  }
  0x6f   :  { %v15832_v1 = vld [vmem:[#allocation5 + $0xc0] sm:$0xff]   ;;  %14523 = vmatprep.subr.bf16.mxu0 %v15831_v0  ;;  %v15836_v5 = vld [vmem:[#allocation5 + $0xc8] sm:$0xff]   ;;  %v15839_v8 = vld [vmem:[#allocation5 + $0x50] sm:$0xff]   ;;  %vm766_vm2 = vcmask 261120   ;;  %vm16467_vm3 = vmmov 0   ;;  %vm1409_vm4 = vcmask 64512  }
  0x70   :  { %v15833_v2 = vld [vmem:[#allocation5] sm:$0xff]   ;;  %14551 = vmatprep.subr.bf16.mxu1 %v15832_v1  ;;  %v15837_v6 = vld [vmem:[#allocation5 + $0x8] sm:$0xff]   ;;  %v15840_v9 = vld [vmem:[#allocation5 + $0xd0] sm:$0xff]   ;;  %s16469_s5 = smov 32   ;;  %vm7247_vm6 = vcmask 523264   ;;  %vm13919_vm7 = vcmask 1045509  }
  0x71   :  { %v15834_v3 = vld [vmem:[#allocation5 + $0x80] sm:$0xff]   ;;  %14524 = vmatpush3.bf16.msra.mxu0 %v15833_v2  ;;  %v15838_v7 = vld [vmem:[#allocation5 + $0x88] sm:$0xff]   ;;  %v15841_v10 = vld [vmem:[#allocation5 + $0x10] sm:$0xff]   ;;  %vm13922_vm8 = vcmask 1046534   ;;  %vm13925_vm9 = vcmask 1047559   ;;  %vm13939_vm10 = vcmask 261124  }
  0x72   :  { %14552 = vmatpush3.bf16.msra.mxu1 %v15834_v3  ;;  %14525 = vmatprep.subr.bf16.mxu0 %v15835_v4  ;;  %v15842_v11 = vld [vmem:[#allocation5 + $0x90] sm:$0xff]   ;;  %v15843_v12 = vld [vmem:[#allocation5 + $0x58] sm:$0xff]   ;;  %v15847_v16 = vld [vmem:[#allocation5 + $0x60] sm:$0xff]   ;;  %vm13929_vm11 = vcmask 1041409   ;;  %vm13932_vm12 = vcmask 1042434   ;;  %vm13935_vm13 = vcmask 1043459  }
  0x73   :  { %14553 = vmatprep.subr.bf16.mxu1 %v15836_v5  ;;  %v15844_v13 = vld [vmem:[#allocation5 + $0xd8] sm:$0xff]   ;;  %v15848_v17 = vld [vmem:[#allocation5 + $0xe0] sm:$0xff]   ;;  %v15851_v20 = vld [vmem:[#allocation5 + $0x68] sm:$0xff]   ;;  %vm13943_vm14 = vcmask 257024   ;;  %vm14105_vm15 = vcmask 1044484   ;;  %s16470_s8 = smov [#allocation13]  }
  0x74   :  { %v15845_v14 = vld [vmem:[#allocation5 + $0x18] sm:$0xff]   ;;  %v15849_v18 = vld [vmem:[#allocation5 + $0x20] sm:$0xff]   ;;  %v15852_v21 = vld [vmem:[#allocation5 + $0xe8] sm:$0xff]   ;;  %s14176_s0 = sshll.u32 %s16470_s8, 4  ;;  %s14177_s0 = int_to_ptr.vmem [resolvable:$true] %s14176_s0 }
  0x75   :  { %14526 = vmatpush3.bf16.msra.mxu0 %v15837_v6  ;;  %v15846_v15 = vld [vmem:[#allocation5 + $0x98] sm:$0xff]   ;;  %v15850_v19 = vld [vmem:[#allocation5 + $0xa0] sm:$0xff]   ;;  %v15853_v22 = vld [vmem:[#allocation5 + $0x28] sm:$0xff]   ;;  %s16422_s14 = scalar_lea.vmem %s14177_s0, 128  ;;  %p16427_p7 = scmp.lt.s32.totalorder %s14177_s0, %s14177_s0 }
  0x76   :  { %14554 = vmatpush3.bf16.msra.mxu1 %v15838_v7  ;;  %14527 = vmatprep.subr.bf16.mxu0 %v15839_v8  ;;  %v15854_v23 = vld [vmem:[#allocation5 + $0xa8] sm:$0xff]   ;;  %v15855_v24 = vld [vmem:[#allocation5 + $0x70] sm:$0xff]   ;;  %v15859_v28 = vld [vmem:[#allocation5 + $0x78] sm:$0xff]   ;;  %p16423_p6 = scmp.ne.s32.totalorder %s14177_s0, %s16422_s14  ;;  %p16428_p8 = scmp.lt.s32.totalorder %s16422_s14, %s16422_s14 }
  0x77   :  { %14555 = vmatprep.subr.bf16.mxu1 %v15840_v9  ;;  %v15856_v25 = vld [vmem:[#allocation5 + $0xf0] sm:$0xff]   ;;  %v15860_v29 = vld [vmem:[#allocation5 + $0xf8] sm:$0xff]   ;;  %v15866_v34 = vld [vmem:[#allocation2 + $0x8] ss:$24 sps:$4 sm:$0xff]  }
  0x78   :  { %v15857_v26 = vld [vmem:[#allocation5 + $0x30] sm:$0xff]   ;;  %v15861_v30 = vld [vmem:[#allocation5 + $0x38] sm:$0xff]   ;;  %v15868_v35 = vld [vmem:[#allocation2 + $0xc] ss:$24 sps:$4 sm:$0xff]   ;;  %p16429_p9 = por %p16428_p8, %p16427_p7 }
  0x79   :  { %14528 = vmatpush3.bf16.msra.mxu0 %v15841_v10  ;;  %v15858_v27 = vld [vmem:[#allocation5 + $0xb0] sm:$0xff]   ;;  %v15862_v31 = vld [vmem:[#allocation5 + $0xb8] sm:$0xff]   ;;  %v15869_v36 = vld [vmem:[#allocation5 + $0x140] sm:$0xff]   ;;  %648 = vmatprep.mubr.bf16.mxu1 %v15868_v35 }
  0x7a   :  { %14556 = vmatpush3.bf16.msra.mxu1 %v15842_v11  ;;  %14529 = vmatprep.subr.bf16.mxu0 %v15843_v12  ;;  %v15863_v32 = vld [vmem:[#allocation2] ss:$24 sps:$4 sm:$0xff]   ;;  %v15865_v33 = vld [vmem:[#allocation2 + $0x4] ss:$24 sps:$4 sm:$0xff]   ;;  %v15871_v38 = vld [vmem:[#allocation5 + $0x148] sm:$0xff]   ;;  %p16430_p10 = pnand %p16429_p9, %p16423_p6 }
  0x7b   :  { %14557 = vmatprep.subr.bf16.mxu1 %v15844_v13  ;;  %599 = vmatprep.mubr.bf16.mxu0 %v15865_v33  ;;  %v15870_v37 = vld [vmem:[#allocation5 + $0x100] sm:$0xff]   ;;  %v15872_v39 = vld [vmem:[#allocation5 + $0x108] sm:$0xff]   ;;  %v15873_v40 = vld [vmem:[#allocation5 + $0x150] sm:$0xff]  }
  0x7c   :  { %v15874_v41 = vld [vmem:[#allocation5 + $0x110] sm:$0xff]   ;;  %v15875_v42 = vld [vmem:[#allocation5 + $0x158] sm:$0xff]   ;;  %v15877_v46 = vld [vmem:[#allocation5 + $0x160] sm:$0xff]  }
  0x7d   :  { %14530 = vmatpush3.bf16.msra.mxu0 %v15845_v14  ;;  %v15876_v43 = vld [vmem:[#allocation5 + $0x118] sm:$0xff]   ;;  %v15879_v44 = vld [vmem:[#allocation2 + $0x34] ss:$24 sps:$4 sm:$0xff]   ;;  %v15884_v47 = vld [vmem:[#allocation2 + $0x30] ss:$24 sps:$4 sm:$0xff]  }
  0x7e   :  { %14558 = vmatpush3.bf16.msra.mxu1 %v15846_v15  ;;  %14531 = vmatprep.subr.bf16.mxu0 %v15847_v16  ;;  %v15881_v45 = vld [vmem:[#allocation2 + $0x3c] ss:$24 sps:$4 sm:$0xff]   ;;  %v15885_v48 = vld [vmem:[#allocation2 + $0x38] ss:$24 sps:$4 sm:$0xff]   ;;  %v15878_v49 = vld [vmem:[#allocation5 + $0x120] sm:$0xff]  }
  0x7f   :  { %14559 = vmatprep.subr.bf16.mxu1 %v15848_v17  ;;  %v15883_v50 = vld [vmem:[#allocation5 + $0x168] sm:$0xff]   ;;  %v15887_v53 = vld [vmem:[#allocation5 + $0x170] sm:$0xff]   ;;  %v15889_v55 = vld [vmem:[#allocation5 + $0x178] sm:$0xff]  }
  0x80   :  { %v15886_v51 = vld [vmem:[#allocation5 + $0x128] sm:$0xff]   ;;  %v15888_v54 = vld [vmem:[#allocation5 + $0x130] sm:$0xff]   ;;  %v15890_v56 = vld [vmem:[#allocation5 + $0x138] sm:$0xff]  }
  0x81   :  { %14532 = vmatpush3.bf16.msra.mxu0 %v15849_v18  ;;  %v15893_v52 = vld [vmem:[#allocation2 + $0x14] ss:$24 sps:$4 sm:$0xff]   ;;  %v15891_v57 = vld [vmem:[#allocation2 + $0x10] ss:$24 sps:$4 sm:$0xff]   ;;  %v15894_v58 = vld [vmem:[#allocation2 + $0x44] ss:$24 sps:$4 sm:$0xff]  }
  0x82   :  { %14560 = vmatpush3.bf16.msra.mxu1 %v15850_v19  ;;  %14533 = vmatprep.subr.bf16.mxu0 %v15851_v20  ;;  %v15896_v59 = vld [vmem:[#allocation2 + $0x40] ss:$24 sps:$4 sm:$0xff]  }
  0x83   :  { %14561 = vmatprep.subr.bf16.mxu1 %v15852_v21 }
  0x85   :  { %14534 = vmatpush3.bf16.msra.mxu0 %v15853_v22 }
  0x86   :  { %14562 = vmatpush3.bf16.msra.mxu1 %v15854_v23  ;;  %14535 = vmatprep.subr.bf16.mxu0 %v15855_v24  ;;  %v109_v24 = vld [vmem:[#allocation11 + $0x10] sm:$0xff] }
  0x87   :  { %14563 = vmatprep.subr.bf16.mxu1 %v15856_v25  ;;  %v110_v25 = vld [vmem:[#allocation11 + $0x18] sm:$0xff] }
  0x89   :  { %14536 = vmatpush3.bf16.msra.mxu0 %v15857_v26 }
  0x8a   :  { %14564 = vmatpush3.bf16.msra.mxu1 %v15858_v27  ;;  %14537 = vmatprep.subr.bf16.mxu0 %v15859_v28  ;;  %v738_v27 = vrot.slane %v109_v24, 3  ;;  %v739_v28 = vrot.slane %v110_v25, 3 }
  0x8b   :  { %14565 = vmatprep.subr.bf16.mxu1 %v15860_v29 }
  0x8c   :  { %v740_v35 = vsel %vm737_vm0, %v738_v27, %v739_v28 }
  0x8d   :  { %14538 = vmatpush3.bf16.msra.mxu0 %v15861_v30 }
  0x8e   :  { %14566 = vmatpush3.bf16.msra.mxu1 %v15862_v31  ;;  %14579 = vmatprep.subr.bf16.mxu0 %v15869_v36 }
  0x90   :  { %600 = vmatmul.mubr.bf16.vlgmr.msra.gmra.mrb[0].mxu0 %v15863_v32 }
  0x91   :  { %649 = vmatmul.mubr.bf16.vlgmr.msra.gmra.mrb[0].mxu1 %v15866_v34  ;;  %14580 = vmatpush3.bf16.msra.mxu0 %v15870_v37 }
  0x92   :  { %14581 = vmatprep.subr.bf16.mxu0 %v15871_v38  ;;  %607 = vmatprep.mubr.bf16.mxu0 %v15879_v44 }
  0x93   :  { %656 = vmatprep.mubr.bf16.mxu1 %v15881_v45 }
  0x95   :  { %14582 = vmatpush3.bf16.msra.mxu0 %v15872_v39 }
  0x96   :  { %14583 = vmatprep.subr.bf16.mxu0 %v15873_v40 }
  0x98   :  { %608 = vmatmul.mubr.bf16.gmra.mrb[4].mxu0 %v15884_v47 }
  0x99   :  { %14584 = vmatpush3.bf16.msra.mxu0 %v15874_v41  ;;  %657 = vmatmul.mubr.bf16.gmra.mrb[4].mxu1 %v15885_v48 }
  0x9a   :  { %14585 = vmatprep.subr.bf16.mxu0 %v15875_v42  ;;  %697 = vmatprep.mubr.bf16.mxu0 %v15893_v52 }
  0x9d   :  { %14586 = vmatpush3.bf16.msra.mxu0 %v15876_v43 }
  0x9e   :  { %14587 = vmatprep.subr.bf16.mxu0 %v15877_v46 }
  0xa1   :  { %14588 = vmatpush3.bf16.msra.mxu0 %v15878_v49 }
  0xa2   :  { %14589 = vmatprep.subr.bf16.mxu0 %v15883_v50 }
  0xa5   :  { %14590 = vmatpush3.bf16.msra.mxu0 %v15886_v51 }
  0xa6   :  { %14591 = vmatprep.subr.bf16.mxu0 %v15887_v53 }
  0xa9   :  { %14592 = vmatpush3.bf16.msra.mxu0 %v15888_v54 }
  0xaa   :  { %14593 = vmatprep.subr.bf16.mxu0 %v15889_v55 }
  0xad   :  { %14594 = vmatpush3.bf16.msra.mxu0 %v15890_v56 }
  0xb0   :  { %698 = vmatmul.mubr.bf16.vlgmr.msra.gmra.mrb[8].mxu0 %v15891_v57 }
  0xb1   :  { %705 = vmatprep.mubr.bf16.mxu0 %v15894_v58 }
  0xb8   :  { %706 = vmatmul.mubr.bf16.gmra.mrb[12].mxu0 %v15896_v59 }
 0x163   :  { %v14539_v60 = vpop.f32.mrb[0].mxu0 }
 0x164   :  { %v14567_v61 = vpop.f32.mrb[0].mxu1  ;;  %v14540_v62 = vpop.f32.mrb[1].mxu0 }
 0x165   :  { %v14541_v63 = vadd.f32 %v14540_v62, %v14539_v60  ;;  %v14568_v0 = vpop.f32.mrb[1].mxu1  ;;  %v14542_v1 = vpop.f32.mrb[2].mxu0 }
 0x166   :  { %v14569_v2 = vadd.f32 %v14568_v0, %v14567_v61  ;;  %v14570_v3 = vpop.f32.mrb[2].mxu1  ;;  %v14543_v4 = vpop.f32.mrb[3].mxu0 }
 0x167   :  { %v14544_v5 = vadd.f32 %v14543_v4, %v14542_v1  ;;  %v14571_v6 = vpop.f32.mrb[3].mxu1 }
 0x168   :  { %v651_v7 = vadd.f32 %v14569_v2, %v14541_v63  ;;  %v14572_v8 = vadd.f32 %v14571_v6, %v14570_v3 }
 0x16a   :  { %v654_v9 = vadd.f32 %v14572_v8, %v14544_v5 }
 0x16b   :  { %v14545_v10 = vpop.f32.mrb[4].mxu0 }
 0x16c   :  { %v14573_v11 = vpop.f32.mrb[4].mxu1  ;;  %v14546_v12 = vpop.f32.mrb[5].mxu0 }
 0x16d   :  { %v14547_v13 = vadd.f32 %v14546_v12, %v14545_v10  ;;  %v14574_v14 = vpop.f32.mrb[5].mxu1  ;;  %v14548_v15 = vpop.f32.mrb[6].mxu0 }
 0x16e   :  { %v14575_v16 = vadd.f32 %v14574_v14, %v14573_v11  ;;  %v14576_v17 = vpop.f32.mrb[6].mxu1  ;;  %v14549_v18 = vpop.f32.mrb[7].mxu0 }
 0x16f   :  { %v14550_v19 = vadd.f32 %v14549_v18, %v14548_v15  ;;  %v14577_v20 = vpop.f32.mrb[7].mxu1 }
 0x170   :  { %v659_v21 = vadd.f32 %v14575_v16, %v14547_v13  ;;  %v14578_v22 = vadd.f32 %v14577_v20, %v14576_v17 }
 0x172   :  { %v662_v23 = vadd.f32 %v14578_v22, %v14550_v19 }
 0x183   :  { %v14595_v26 = vpop.f32.mrb[8].mxu0 }
 0x184   :  { %v14596_v29 = vpop.f32.mrb[9].mxu0 }
 0x185   :  { %v14597_v30 = vadd.f32 %v14596_v29, %v14595_v26  ;;  %v14598_v31 = vpop.f32.mrb[10].mxu0 }
 0x186   :  { %v14599_v32 = vpop.f32.mrb[11].mxu0 }
 0x187   :  { %v700_v33 = vadd.f32 %v14597_v30, %v651_v7  ;;  %v14600_v34 = vadd.f32 %v14599_v32, %v14598_v31 }
 0x189   :  { %v718_v36 = vcombine.high %v700_v33, %v700_v33  ;;  %v727_v37 = vsel %vm726_vm1, %v700_v33, 0.0  ;;  %v703_v38 = vadd.f32 %v14600_v34, %v654_v9 }
 0x18a   :  { %v16601_v39 = vadd.f32 %v740_v35, %v727_v37 }
 0x18b   :  { %v719_v40 = vcombine.high %v703_v38, %v703_v38  ;;  %v729_v41 = vsel %vm726_vm1, %v703_v38, 0.0  ;;  %v14601_v42 = vpop.f32.mrb[12].mxu0  ;;  %v728_v43 = vsel %vm726_vm1, %v718_v36, 0.0 }
 0x18c   :  { %v14602_v44 = vpop.f32.mrb[13].mxu0  ;;  %v767_v45 = vsel %vm766_vm2, %v16601_v39, 0.0  ;;  %v16607_v46 = vadd.f32 %v740_v35, %v729_v41  ;;  %v16609_v47 = vadd.f32 %v740_v35, %v728_v43 }
 0x18d   :  { %v14603_v48 = vadd.f32 %v14602_v44, %v14601_v42  ;;  %v14604_v49 = vpop.f32.mrb[14].mxu0  ;;  %768 = vadd.xlane.f32.xlu0 %v767_v45  ;;  %v730_v50 = vsel %vm726_vm1, %v719_v40, 0.0 }
 0x18e   :  { %18957 = vst [vmem:[#allocation19_spill] sm:$0xff] %v16609_v47  ;;  %v14605_v51 = vpop.f32.mrb[15].mxu0  ;;  %v773_v52 = vsel %vm766_vm2, %v16607_v46, 0.0  ;;  %v16614_v53 = vadd.f32 %v740_v35, %v730_v50  ;;  %v770_v56 = vsel %vm766_vm2, %v16609_v47, 0.0 }
 0x18f   :  { %v708_v54 = vadd.f32 %v14603_v48, %v659_v21  ;;  %v14606_v55 = vadd.f32 %v14605_v51, %v14604_v49  ;;  %774 = vadd.xlane.f32.xlu1 %v773_v52  ;;  %v754_v52 = vld [vmem:[#allocation7] sm:$0xff] }
 0x190   :  { %18958 = vst [vmem:[#allocation20_spill] sm:$0xff] %v16614_v53  ;;  %v776_v60 = vsel %vm766_vm2, %v16614_v53, 0.0 }
 0x191   :  { %v720_v57 = vcombine.high %v708_v54, %v708_v54  ;;  %v731_v58 = vsel %vm726_vm1, %v708_v54, 0.0  ;;  %v711_v59 = vadd.f32 %v14606_v55, %v662_v23  ;;  %771 = vadd.xlane.f32.xlu0 %v770_v56  ;;  %v755_v54 = vld [vmem:[#allocation7 + $0x8] sm:$0xff]  ;;  %v756_v56 = vld [vmem:[#allocation7 + $0x10] sm:$0xff] }
 0x192   :  { %v16621_v61 = vadd.f32 %v740_v35, %v731_v58  ;;  %v14248_v55 = vcombine.low %v754_v52, %v755_v54 }
 0x193   :  { %v721_v62 = vcombine.high %v711_v59, %v711_v59  ;;  %v733_v63 = vsel %vm726_vm1, %v711_v59, 0.0  ;;  %777 = vadd.xlane.f32.xlu1 %v776_v60  ;;  %v732_v0 = vsel %vm726_vm1, %v720_v57, 0.0  ;;  %v757_v57 = vld [vmem:[#allocation7 + $0x18] sm:$0xff] }
 0x194   :  { %18959 = vst [vmem:[#allocation21_spill] sm:$0xff] %v16621_v61  ;;  %v779_v1 = vsel %vm766_vm2, %v16621_v61, 0.0  ;;  %v16627_v2 = vadd.f32 %v740_v35, %v732_v0  ;;  %v16629_v3 = vadd.f32 %v740_v35, %v733_v63  ;;  %14946 = vmatprep.subr.bf16.mxu0 %v14248_v55  ;;  %15754 = vmatprep.subr.bf16.mxu1 %v14248_v55  ;;  %v750_v63 = vlaneseq }
 0x195   :  { %780 = vadd.xlane.f32.xlu0 %v779_v1  ;;  %v734_v4 = vsel %vm726_vm1, %v721_v62, 0.0  ;;  %14947 = vmatpush3.bf16.msra.mxu0 %v14248_v55  ;;  %v14249_v58 = vcombine.low %v756_v56, %v757_v57 }
 0x196   :  { %18960 = vst [vmem:[#allocation22_spill] sm:$0xff] %v16627_v2  ;;  %18961 = vst [vmem:[#allocation23_spill] sm:$0xff] %v16629_v3  ;;  %v782_v5 = vsel %vm766_vm2, %v16627_v2, 0.0  ;;  %v16634_v6 = vadd.f32 %v740_v35, %v734_v4  ;;  %v785_v7 = vsel %vm766_vm2, %v16629_v3, 0.0  ;;  %15756 = vmatpush3.bf16.msra.mxu1 %v14248_v55 }
 0x197   :  { %783 = vadd.xlane.f32.xlu1 %v782_v5  ;;  %14948 = vmatprep.subr.bf16.mxu0 %v14249_v58 }
 0x198   :  { %18962 = vst [vmem:[#allocation24_spill] sm:$0xff] %v16634_v6  ;;  %v788_v8 = vsel %vm766_vm2, %v16634_v6, 0.0  ;;  %15755 = vmatprep.subr.bf16.mxu1 %v14249_v58 }
 0x199   :  { %786 = vadd.xlane.f32.xlu0 %v785_v7  ;;  %14949 = vmatpush3.bf16.msra.mxu0 %v14249_v58 }
 0x19a   :  { %15757 = vmatpush3.bf16.msra.mxu1 %v14249_v58 }
 0x19b   :  { %789 = vadd.xlane.f32.xlu1 %v788_v8 }
 0x21a   :  { %v769_v9 = vpop.xlane.xlu0 %768 }
 0x21b   :  { %v792_v10 = vmul.f32 0.03125, %v769_v9  ;;  %v16689_v9 = vshrl.u32 %v750_v63, 7 }
 0x21c   :  { %v775_v11 = vpop.xlane.xlu1 %774 }
 0x21d   :  { %v16641_v12 = vsub.f32 %v16601_v39, %v792_v10  ;;  %v794_v13 = vmul.f32 0.03125, %v775_v11 }
 0x21e   :  { %v772_v14 = vpop.xlane.xlu0 %771 }
 0x21f   :  { %v16644_v15 = vsub.f32 %v16607_v46, %v794_v13  ;;  %v793_v16 = vmul.f32 0.03125, %v772_v14  ;;  %v808_v17 = vmul.f32 %v16641_v12, %v16641_v12 }
 0x220   :  { %v778_v18 = vpop.xlane.xlu1 %777 }
 0x221   :  { %v16649_v19 = vsub.f32 %v16609_v47, %v793_v16  ;;  %v795_v20 = vmul.f32 0.03125, %v778_v18  ;;  %v816_v21 = vsel %vm766_vm2, %v808_v17, 0.0  ;;  %v810_v22 = vmul.f32 %v16644_v15, %v16644_v15 }
 0x222   :  { %817 = vadd.xlane.f32.xlu0 %v816_v21  ;;  %v781_v23 = vpop.xlane.xlu0 %780  ;;  %v16692_v18 = vsub.s32 0, %v16689_v9 }
 0x223   :  { %v16655_v24 = vsub.f32 %v16614_v53, %v795_v20  ;;  %v796_v25 = vmul.f32 0.03125, %v781_v23  ;;  %v809_v26 = vmul.f32 %v16649_v19, %v16649_v19  ;;  %v822_v28 = vsel %vm766_vm2, %v810_v22, 0.0  ;;  %v107_v22 = vld [vmem:[#allocation11] sm:$0xff] }
 0x224   :  { %v784_v27 = vpop.xlane.xlu1 %783  ;;  %18963 = vst [vmem:[#allocation25_spill] sm:$0xff] %v16692_v18 }
 0x225   :  { %v16661_v29 = vsub.f32 %v16621_v61, %v796_v25  ;;  %v797_v30 = vmul.f32 0.03125, %v784_v27  ;;  %v819_v31 = vsel %vm766_vm2, %v809_v26, 0.0  ;;  %v811_v32 = vmul.f32 %v16655_v24, %v16655_v24 }
 0x226   :  { %823 = vadd.xlane.f32.xlu0 %v822_v28  ;;  %820 = vadd.xlane.f32.xlu1 %v819_v31  ;;  %v787_v33 = vpop.xlane.xlu0 %786  ;;  %v875_v31 = vrot.slane %v107_v22, %v16692_v18 }
 0x227   :  { %v16667_v34 = vsub.f32 %v16627_v2, %v797_v30  ;;  %v798_v35 = vmul.f32 0.03125, %v787_v33  ;;  %v812_v36 = vmul.f32 %v16661_v29, %v16661_v29  ;;  %v825_v38 = vsel %vm766_vm2, %v811_v32, 0.0 }
 0x228   :  { %v790_v37 = vpop.xlane.xlu1 %789  ;;  %v16695_v30 = vsub.s32 1, %v16689_v9 }
 0x229   :  { %v16673_v40 = vsub.f32 %v16629_v3, %v798_v35  ;;  %v799_v41 = vmul.f32 0.03125, %v790_v37  ;;  %v828_v42 = vsel %vm766_vm2, %v812_v36, 0.0  ;;  %v813_v43 = vmul.f32 %v16667_v34, %v16667_v34 }
 0x22a   :  { %826 = vadd.xlane.f32.xlu1 %v825_v38  ;;  %829 = vadd.xlane.f32.xlu0 %v828_v42  ;;  %18964 = vst [vmem:[#allocation26_spill] sm:$0xff] %v16695_v30 }
 0x22b   :  { %v16679_v44 = vsub.f32 %v16634_v6, %v799_v41  ;;  %v814_v45 = vmul.f32 %v16673_v40, %v16673_v40  ;;  %v831_v48 = vsel %vm766_vm2, %v813_v43, 0.0  ;;  %v887_v41 = vrot.slane %v107_v22, %v16695_v30 }
 0x22d   :  { %v834_v49 = vsel %vm766_vm2, %v814_v45, 0.0  ;;  %v815_v50 = vmul.f32 %v16679_v44, %v16679_v44 }
 0x22e   :  { %832 = vadd.xlane.f32.xlu1 %v831_v48  ;;  %835 = vadd.xlane.f32.xlu0 %v834_v49 }
 0x22f   :  { %v837_v51 = vsel %vm766_vm2, %v815_v50, 0.0 }
 0x232   :  { %838 = vadd.xlane.f32.xlu1 %v837_v51 }
 0x2af   :  { %v818_v59 = vpop.xlane.xlu0 %817 }
 0x2b0   :  { %v840_v60 = vmul.f32 0.03125, %v818_v59 }
 0x2b2   :  { %v848_v62 = vadd.f32 1e-06, %v840_v60 }
 0x2b3   :  { %v821_v0 = vpop.xlane.xlu1 %820  ;;  %v824_v1 = vpop.xlane.xlu0 %823 }
 0x2b4   :  { %15923 = vrsqrt.f32 %v848_v62  ;;  %v841_v4 = vmul.f32 0.03125, %v821_v0  ;;  %v842_v5 = vmul.f32 0.03125, %v824_v1 }
 0x2b6   :  { %v849_v7 = vadd.f32 1e-06, %v841_v4  ;;  %v850_v8 = vadd.f32 1e-06, %v842_v5 }
 0x2b7   :  { %v827_v10 = vpop.xlane.xlu1 %826  ;;  %v830_v11 = vpop.xlane.xlu0 %829 }
 0x2b8   :  { %15925 = vrsqrt.f32 %v849_v7  ;;  %v843_v13 = vmul.f32 0.03125, %v827_v10  ;;  %v844_v14 = vmul.f32 0.03125, %v830_v11 }
 0x2b9   :  { %15927 = vrsqrt.f32 %v850_v8 }
 0x2ba   :  { %v851_v16 = vadd.f32 1e-06, %v843_v13  ;;  %v852_v17 = vadd.f32 1e-06, %v844_v14 }
 0x2bb   :  { %v833_v20 = vpop.xlane.xlu1 %832  ;;  %v836_v21 = vpop.xlane.xlu0 %835 }
 0x2bc   :  { %15929 = vrsqrt.f32 %v851_v16  ;;  %v845_v23 = vmul.f32 0.03125, %v833_v20  ;;  %v846_v25 = vmul.f32 0.03125, %v836_v21 }
 0x2bd   :  { %15931 = vrsqrt.f32 %v852_v17 }
 0x2be   :  { %v15924_v26 = vpop.eup %15923  ;;  %v853_v27 = vadd.f32 1e-06, %v845_v23  ;;  %v854_v28 = vadd.f32 1e-06, %v846_v25 }
 0x2bf   :  { %v839_v32 = vpop.xlane.xlu1 %838  ;;  %v864_v33 = vmul.f32 %v15924_v26, %v16641_v12 }
 0x2c0   :  { %15933 = vrsqrt.f32 %v853_v27  ;;  %v847_v35 = vmul.f32 0.03125, %v839_v32 }
 0x2c1   :  { %15935 = vrsqrt.f32 %v854_v28  ;;  %v876_v43 = vmul.f32 %v875_v31, %v864_v33 }
 0x2c2   :  { %v15926_v36 = vpop.eup %15925  ;;  %v855_v37 = vadd.f32 1e-06, %v847_v35 }
 0x2c3   :  { %v15928_v38 = vpop.eup %15927  ;;  %v865_v42 = vmul.f32 %v15926_v36, %v16649_v19  ;;  %v888_v52 = vadd.f32 %v887_v41, %v876_v43 }
 0x2c4   :  { %v866_v45 = vmul.f32 %v15928_v38, %v16644_v15  ;;  %15937 = vrsqrt.f32 %v855_v37 }
 0x2c5   :  { %v877_v48 = vmul.f32 %v875_v31, %v865_v42 }
 0x2c6   :  { %v15930_v49 = vpop.eup %15929  ;;  %v878_v51 = vmul.f32 %v875_v31, %v866_v45 }
 0x2c7   :  { %v15932_v50 = vpop.eup %15931  ;;  %v867_v12 = vmul.f32 %v15930_v49, %v16655_v24  ;;  %v889_v54 = vadd.f32 %v887_v41, %v877_v48 }
 0x2c8   :  { %v868_v55 = vmul.f32 %v15932_v50, %v16661_v29  ;;  %v890_v60 = vadd.f32 %v887_v41, %v878_v51  ;;  %v18931_v50 = vmov 0.0  }
 0x2c9   :  { %v879_v56 = vmul.f32 %v875_v31, %v867_v12  ;;  %v896_v57 = vpack.c.bf16 %v889_v54, %v888_v52  ;;  %14958 = vmatprep.subr.mxu1 %v18931_v50  ;;  %14978 = vmatprep.subr.mxu0 %v18931_v50 }
 0x2ca   :  { %v15934_v58 = vpop.eup %15933  ;;  %v880_v62 = vmul.f32 %v875_v31, %v868_v55 }
 0x2cb   :  { %v15936_v59 = vpop.eup %15935  ;;  %v891_v19 = vadd.f32 %v887_v41, %v879_v56  ;;  %14950 = vmatprep.mubr.msk.bf16.mxu0 %vm766_vm2, %v896_v57  ;;  %v869_v15 = vmul.f32 %v15934_v58, %v16667_v34 }
 0x2cc   :  { %v870_v0 = vmul.f32 %v15936_v59, %v16673_v40  ;;  %v892_v29 = vadd.f32 %v887_v41, %v880_v62  ;;  %v16712_v40 = vsub.s32 2, %v16689_v9 }
 0x2cd   :  { %v897_v1 = vpack.c.bf16 %v891_v19, %v890_v60  ;;  %v881_v4 = vmul.f32 %v875_v31, %v869_v15 }
 0x2ce   :  { %v15938_v24 = vpop.eup %15937  ;;  %v882_v5 = vmul.f32 %v875_v31, %v870_v0  ;;  %18965 = vst [vmem:[#allocation27_spill] sm:$0xff] %v16712_v40  ;;  %v903_v16 = vrot.slane %v107_v22, %v16712_v40 }
 0x2cf   :  { %v871_v7 = vmul.f32 %v15938_v24, %v16679_v44  ;;  %14951 = vmatmul.mubr.msk.bf16.vlgmr.msra.gmra.mrb[16].mxu0 %vm766_vm2, %v897_v1  ;;  %v893_v8 = vadd.f32 %v887_v41, %v881_v4 }
 0x2d0   :  { %v894_v13 = vadd.f32 %v887_v41, %v882_v5  ;;  %14980 = vmatprep.mubr.msk.f32.mxu0 %vm16467_vm3, %v18931_v50 }
 0x2d1   :  { %v883_v10 = vmul.f32 %v875_v31, %v871_v7  ;;  %v898_v11 = vpack.c.bf16 %v893_v8, %v892_v29 }
 0x2d3   :  { %v895_v14 = vadd.f32 %v887_v41, %v883_v10  ;;  %14954 = vmatprep.mubr.msk.bf16.mxu1 %vm766_vm2, %v898_v11 }
 0x2d5   :  { %v899_v34 = vpack.c.bf16 %v895_v14, %v894_v13 }
 0x2d7   :  { %14955 = vmatmul.mubr.msk.bf16.vlgmr.msra.gmra.mrb[8].mxu1 %vm766_vm2, %v899_v34 }
 0x2d8   :  { %14960 = vmatprep.mubr.msk.f32.mxu1 %vm16467_vm3, %v18931_v50 }
 0x3a2   :  { %v14952_v17 = vpop.f32.mrb[16].mxu0 }
 0x3a3   :  { %v962_v44 = vpop.f32.mrb[17].mxu0  ;;  %v971_v28 = vadd.f32 %v14952_v17, %v903_v16 }
 0x3a4   :  { %v963_v20 = vadd.f32 %v962_v44, %v903_v16  ;;  %v14953_v21 = vpop.f32.mrb[18].mxu0 }
 0x3a5   :  { %v965_v23 = vpop.f32.mrb[19].mxu0  ;;  %v974_v33 = vadd.f32 %v14953_v21, %v903_v16 }
 0x3a6   :  { %993 = vxpose.xlu0.b32.start [1/8] (short) (narrow) %v963_v20, 96  ;;  %v966_v25 = vadd.f32 %v965_v23, %v903_v16 }
 0x3aa   :  { %v14956_v26 = vpop.f32.mrb[8].mxu1  ;;  %994 = vxpose.xlu0.b32.cont [2/8] (short) (narrow) %v966_v25, 96 }
 0x3ab   :  { %v978_v27 = vpop.f32.mrb[9].mxu1  ;;  %v987_v22 = vadd.f32 %v14956_v26, %v903_v16 }
 0x3ac   :  { %v14957_v31 = vpop.f32.mrb[10].mxu1  ;;  %v979_v35 = vadd.f32 %v978_v27, %v903_v16 }
 0x3ad   :  { %v981_v32 = vpop.f32.mrb[11].mxu1  ;;  %v990_v37 = vadd.f32 %v14957_v31, %v903_v16 }
 0x3ae   :  { %995 = vxpose.xlu0.b32.cont [3/8] (short) (narrow) %v971_v28, 96  ;;  %v982_v36 = vadd.f32 %v981_v32, %v903_v16 }
 0x3b2   :  { %996 = vxpose.xlu0.b32.cont [4/8] (short) (narrow) %v974_v33, 96 }
 0x3b6   :  { %997 = vxpose.xlu0.b32.cont [5/8] (short) (narrow) %v979_v35, 96 }
 0x3ba   :  { %998 = vxpose.xlu0.b32.cont [6/8] (short) (narrow) %v982_v36, 96 }
 0x3be   :  { %999 = vxpose.xlu0.b32.cont [7/8] (short) (narrow) %v987_v22, 96 }
 0x3c2   :  { %1000 = vxpose.xlu0.b32.end [8/8] (short) (narrow) %v990_v37, 96 }
 0x426   :  { %v1009_v38 = vpop.trf.xlu0 }
 0x427   :  { %1025 = vxpose.xlu1.b32.start.end [1/1] (short) (narrow) %v1009_v38, 64 }
 0x42a   :  { %v1010_v41 = vpop.trf.xlu0 }
 0x42e   :  { %v1011_v42 = vpop.trf.xlu0 }
 0x432   :  { %v1012_v43 = vpop.trf.xlu0 }
 0x436   :  { %v1013_v45 = vpop.trf.xlu0 }
 0x43a   :  { %v1014_v48 = vpop.trf.xlu0 }
 0x43b   :  { %1185 = vxpose.xlu0.b32.start.end [1/1] (short) (narrow) %v1014_v48, 64 }
 0x43e   :  { %v1015_v49 = vpop.trf.xlu0 }
 0x442   :  { %v1016_v51 = vpop.trf.xlu0 }
 0x444   :  { %1057 = vxpose.xlu1.b32.start.end [1/1] (short) (narrow) %v1010_v41, 64 }
 0x446   :  { %v16721_v12 = vpop.trf.xlu0 }
 0x44a   :  { %v1018_v52 = vpop.trf.xlu0 }
 0x44e   :  { %v16723_v57 = vpop.trf.xlu0 }
 0x452   :  { %v16725_v59 = vpop.trf.xlu0 }
 0x458   :  { %1217 = vxpose.xlu0.b32.start.end [1/1] (short) (narrow) %v1015_v49, 64 }
 0x461   :  { %1153 = vxpose.xlu1.b32.start.end [1/1] (short) (narrow) %v1013_v45, 64 }
 0x475   :  { %1249 = vxpose.xlu0.b32.start.end [1/1] (short) (narrow) %v1016_v51, 64 }
 0x47e   :  { %1089 = vxpose.xlu1.b32.start.end [1/1] (short) (narrow) %v1011_v42, 64 }
 0x492   :  { %1313 = vxpose.xlu0.b32.start.end [1/1] (short) (narrow) %v1018_v52, 64 }
 0x49b   :  { %1121 = vxpose.xlu1.b32.start.end [1/1] (short) (narrow) %v1012_v43, 64 }
 0x4a7   :  { %v1041_v54 = vpop.trf.xlu1 }
 0x4ab   :  { %v1042_v55 = vpop.trf.xlu1 }
 0x4af   :  { %v1043_v56 = vpop.trf.xlu1 }
 0x4b3   :  { %v1044_v58 = vpop.trf.xlu1 }
 0x4b7   :  { %v1045_v60 = vpop.trf.xlu1 }
 0x4bb   :  { %v1046_v19 = vpop.trf.xlu1  ;;  %v1201_v15 = vpop.trf.xlu0 }
 0x4bf   :  { %v1047_v62 = vpop.trf.xlu1  ;;  %v16727_v0 = vpop.trf.xlu0 }
 0x4c3   :  { %v16729_v1 = vpop.trf.xlu1  ;;  %v16731_v4 = vpop.trf.xlu0 }
 0x4c7   :  { %v16733_v24 = vpop.trf.xlu1  ;;  %v16735_v5 = vpop.trf.xlu0 }
 0x4cb   :  { %v16737_v7 = vpop.trf.xlu1  ;;  %v16739_v29 = vpop.trf.xlu0 }
 0x4cf   :  { %v16741_v8 = vpop.trf.xlu1  ;;  %v16743_v10 = vpop.trf.xlu0 }
 0x4d3   :  { %v16745_v11 = vpop.trf.xlu1  ;;  %v16747_v13 = vpop.trf.xlu0 }
 0x4d7   :  { %v16749_v14 = vpop.trf.xlu1  ;;  %v16751_v34 = vpop.trf.xlu0 }
 0x4db   :  { %v16753_v16 = vpop.trf.xlu1  ;;  %v16757_v44 = vpop.trf.xlu0 }
 0x4df   :  { %v16755_v17 = vpop.trf.xlu1  ;;  %v16761_v21 = vpop.trf.xlu0 }
 0x4e3   :  { %v16759_v20 = vpop.trf.xlu1  ;;  %v16769_v26 = vpop.trf.xlu0 }
 0x4e7   :  { %v1169_v23 = vpop.trf.xlu1  ;;  %v16777_v28 = vpop.trf.xlu0 }
 0x4e8   :  { %14959 = vmatpush3.xpose.msk.msra.mxu1 %vm1409_vm4, %v1169_v23 }
 0x4e9   :  { %14963 = vmatprep.subr.mxu1 %v18931_v50 }
 0x4eb   :  { %14961 = vmatmul.mubr.msk.f32.vlgmr.msra.gmra.mrb[12].mxu1 %vm1409_vm4, %v1041_v54  ;;  %v1170_v25 = vpop.trf.xlu1  ;;  %v16788_v33 = vpop.trf.xlu0 }
 0x4ec   :  { %14964 = vmatpush3.xpose.msk.msra.mxu1 %vm1409_vm4, %v1170_v25  ;;  %14965 = vmatprep.mubr.msk.f32.mxu1 %vm16467_vm3, %v18931_v50 }
 0x4ed   :  { %14968 = vmatprep.subr.mxu1 %v18931_v50 }
 0x4ef   :  { %14966 = vmatmul.mubr.msk.f32.vlgmr.msra.gmra.mrb[14].mxu1 %vm1409_vm4, %v1042_v55  ;;  %v1171_v27 = vpop.trf.xlu1  ;;  %v16796_v36 = vpop.trf.xlu0 }
 0x4f0   :  { %14969 = vmatpush3.xpose.msk.msra.mxu1 %vm1409_vm4, %v1171_v27  ;;  %14970 = vmatprep.mubr.msk.f32.mxu1 %vm16467_vm3, %v18931_v50 }
 0x4f1   :  { %14973 = vmatprep.subr.mxu1 %v18931_v50 }
 0x4f3   :  { %14971 = vmatmul.mubr.msk.f32.vlgmr.msra.gmra.mrb[16].mxu1 %vm1409_vm4, %v1043_v56  ;;  %v1172_v31 = vpop.trf.xlu1  ;;  %v16806_v38 = vpop.trf.xlu0 }
 0x4f4   :  { %14974 = vmatpush3.xpose.msk.msra.mxu1 %vm1409_vm4, %v1172_v31  ;;  %14975 = vmatprep.mubr.msk.f32.mxu1 %vm16467_vm3, %v18931_v50 }
 0x4f5   :  { %14983 = vmatprep.subr.mxu1 %v18931_v50 }
 0x4f7   :  { %14976 = vmatmul.mubr.msk.f32.vlgmr.msra.gmra.mrb[18].mxu1 %vm1409_vm4, %v1044_v58  ;;  %v1173_v32 = vpop.trf.xlu1  ;;  %v1240_v42 = vpop.trf.xlu0 }
 0x4f8   :  { %14979 = vmatpush3.xpose.msk.msra.mxu0 %vm1409_vm4, %v1173_v32  ;;  %14985 = vmatprep.mubr.msk.f32.mxu1 %vm16467_vm3, %v18931_v50 }
 0x4f9   :  { %14988 = vmatprep.subr.mxu0 %v18931_v50 }
 0x4fb   :  { %14981 = vmatmul.mubr.msk.f32.vlgmr.msra.gmra.mrb[20].mxu0 %vm1409_vm4, %v1045_v60  ;;  %v1174_v35 = vpop.trf.xlu1  ;;  %v1265_v48 = vpop.trf.xlu0 }
 0x4fc   :  { %14984 = vmatpush3.xpose.msk.msra.mxu1 %vm1409_vm4, %v1174_v35  ;;  %14990 = vmatprep.mubr.msk.f32.mxu0 %vm16467_vm3, %v18931_v50 }
 0x4fd   :  { %14993 = vmatprep.subr.mxu1 %v18931_v50 }
 0x4ff   :  { %14986 = vmatmul.mubr.msk.f32.vlgmr.msra.gmra.mrb[20].mxu1 %vm1409_vm4, %v1046_v19  ;;  %v1175_v22 = vpop.trf.xlu1  ;;  %v1266_v51 = vpop.trf.xlu0 }
 0x500   :  { %14989 = vmatpush3.xpose.msk.msra.mxu0 %vm1409_vm4, %v1175_v22  ;;  %14995 = vmatprep.mubr.msk.f32.mxu1 %vm16467_vm3, %v18931_v50 }
 0x501   :  { %14998 = vmatprep.subr.mxu0 %v18931_v50 }
 0x503   :  { %14991 = vmatmul.mubr.msk.f32.vlgmr.msra.gmra.mrb[22].mxu0 %vm1409_vm4, %v1047_v62  ;;  %v1176_v37 = vpop.trf.xlu1  ;;  %v1267_v55 = vpop.trf.xlu0 }
 0x504   :  { %14994 = vmatpush3.xpose.msk.msra.mxu1 %vm1409_vm4, %v1176_v37  ;;  %14999 = vmatpush3.xpose.msk.msra.mxu0 %vm1409_vm4, %v1201_v15 }
 0x505   :  { %15000 = vmatprep.mubr.msk.f32.mxu0 %vm16467_vm3, %v18931_v50  ;;  %15003 = vmatprep.subr.mxu1 %v18931_v50 }
 0x506   :  { %15008 = vmatprep.subr.mxu0 %v18931_v50 }
 0x507   :  { %14996 = vmatmul.mubr.msk.f32.vlgmr.msra.gmra.mrb[22].mxu1 %vm1409_vm4, %v16729_v1  ;;  %v1105_v41 = vpop.trf.xlu1  ;;  %15001 = vmatmul.mubr.msk.f32.vlgmr.msra.gmra.mrb[24].mxu0 %vm1409_vm4, %v16733_v24  ;;  %v1268_v58 = vpop.trf.xlu0 }
 0x508   :  { %15004 = vmatpush3.xpose.msk.msra.mxu1 %vm1409_vm4, %v16727_v0  ;;  %15009 = vmatpush3.xpose.msk.msra.mxu0 %vm1409_vm4, %v16731_v4 }
 0x509   :  { %15005 = vmatprep.mubr.msk.f32.mxu1 %vm16467_vm3, %v18931_v50  ;;  %15010 = vmatprep.mubr.msk.f32.mxu0 %vm16467_vm3, %v18931_v50 }
 0x50a   :  { %15013 = vmatprep.subr.mxu1 %v18931_v50  ;;  %15018 = vmatprep.subr.mxu0 %v18931_v50 }
 0x50b   :  { %v1106_v43 = vpop.trf.xlu1  ;;  %15006 = vmatmul.mubr.msk.f32.vlgmr.msra.gmra.mrb[24].mxu1 %vm1409_vm4, %v16737_v7  ;;  %15011 = vmatmul.mubr.msk.f32.vlgmr.msra.gmra.mrb[26].mxu0 %vm1409_vm4, %v16741_v8  ;;  %v1269_v15 = vpop.trf.xlu0 }
 0x50c   :  { %15014 = vmatpush3.xpose.msk.msra.mxu1 %vm1409_vm4, %v16735_v5  ;;  %15019 = vmatpush3.xpose.msk.msra.mxu0 %vm1409_vm4, %v16739_v29 }
 0x50d   :  { %15015 = vmatprep.mubr.msk.f32.mxu1 %vm16467_vm3, %v18931_v50  ;;  %15020 = vmatprep.mubr.msk.f32.mxu0 %vm16467_vm3, %v18931_v50 }
 0x50e   :  { %15023 = vmatprep.subr.mxu1 %v18931_v50  ;;  %15028 = vmatprep.subr.mxu0 %v18931_v50 }
 0x50f   :  { %v1107_v45 = vpop.trf.xlu1  ;;  %15016 = vmatmul.mubr.msk.f32.vlgmr.msra.gmra.mrb[26].mxu1 %vm1409_vm4, %v16745_v11  ;;  %15021 = vmatmul.mubr.msk.f32.vlgmr.msra.gmra.mrb[28].mxu0 %vm1409_vm4, %v16749_v14  ;;  %v1270_v0 = vpop.trf.xlu0  ;;  %v751_v11 = vand.u32 127, %v750_v63 }
 0x510   :  { %15024 = vmatpush3.xpose.msk.msra.mxu1 %vm1409_vm4, %v16743_v10  ;;  %15029 = vmatpush3.xpose.msk.msra.mxu0 %vm1409_vm4, %v16747_v13  ;;  %v16468_v13 = vmov -1e+09  }
 0x511   :  { %15025 = vmatprep.mubr.msk.f32.mxu1 %vm16467_vm3, %v18931_v50  ;;  %15030 = vmatprep.mubr.msk.f32.mxu0 %vm16467_vm3, %v18931_v50  ;;  %vm752_vm5 = vcmp.lt.s32.totalorder %v751_v11, 5 }
 0x512   :  { %15033 = vmatprep.subr.mxu1 %v18931_v50  ;;  %15038 = vmatprep.subr.mxu0 %v18931_v50  ;;  %v16957_v14 = vsel %vm752_vm5, 0.0, %v16468_v13 }
 0x513   :  { %v1108_v49 = vpop.trf.xlu1  ;;  %15026 = vmatmul.mubr.msk.f32.vlgmr.msra.gmra.mrb[28].mxu1 %vm1409_vm4, %v16753_v16  ;;  %15031 = vmatmul.mubr.msk.f32.vlgmr.msra.gmra.mrb[30].mxu0 %vm1409_vm4, %v16755_v17  ;;  %v1271_v24 = vpop.trf.xlu0  ;;  %18966 = vst [vmem:[#allocation28_spill] sm:$0xff] %v16957_v14 }
 0x514   :  { %15034 = vmatpush3.xpose.msk.msra.mxu1 %vm1409_vm4, %v16751_v34  ;;  %15039 = vmatpush3.xpose.msk.msra.mxu0 %vm1409_vm4, %v16757_v44 }
 0x515   :  { %15035 = vmatprep.mubr.msk.f32.mxu1 %vm16467_vm3, %v18931_v50  ;;  %15040 = vmatprep.mubr.msk.f32.mxu0 %vm16467_vm3, %v18931_v50 }
 0x516   :  { %15043 = vmatprep.subr.mxu1 %v18931_v50  ;;  %15048 = vmatprep.subr.mxu0 %v18931_v50 }
 0x517   :  { %v1109_v52 = vpop.trf.xlu1  ;;  %15036 = vmatmul.mubr.msk.f32.vlgmr.msra.gmra.mrb[30].mxu1 %vm1409_vm4, %v16759_v20  ;;  %15041 = vmatmul.mubr.msk.f32.vlgmr.msra.gmra.mrb[32].mxu0 %vm1409_vm4, %v1105_v41  ;;  %v1272_v7 = vpop.trf.xlu0 }
 0x518   :  { %15044 = vmatpush3.xpose.msk.msra.mxu1 %vm1409_vm4, %v16761_v21  ;;  %15049 = vmatpush3.xpose.msk.msra.mxu0 %vm1409_vm4, %v16769_v26 }
 0x519   :  { %15045 = vmatprep.mubr.msk.f32.mxu1 %vm16467_vm3, %v18931_v50  ;;  %15050 = vmatprep.mubr.msk.f32.mxu0 %vm16467_vm3, %v18931_v50 }
 0x51a   :  { %15053 = vmatprep.subr.mxu1 %v18931_v50  ;;  %15058 = vmatprep.subr.mxu0 %v18931_v50 }
 0x51b   :  { %v1110_v54 = vpop.trf.xlu1  ;;  %15046 = vmatmul.mubr.msk.f32.vlgmr.msra.gmra.mrb[32].mxu1 %vm1409_vm4, %v1106_v43  ;;  %15051 = vmatmul.mubr.msk.f32.vlgmr.msra.gmra.mrb[34].mxu0 %vm1409_vm4, %v1107_v45 }
 0x51c   :  { %15054 = vmatpush3.xpose.msk.msra.mxu1 %vm1409_vm4, %v16777_v28  ;;  %15059 = vmatpush3.xpose.msk.msra.mxu0 %vm1409_vm4, %v16788_v33 }
 0x51d   :  { %15055 = vmatprep.mubr.msk.f32.mxu1 %vm16467_vm3, %v18931_v50  ;;  %15060 = vmatprep.mubr.msk.f32.mxu0 %vm16467_vm3, %v18931_v50 }
 0x51e   :  { %15063 = vmatprep.subr.mxu1 %v18931_v50  ;;  %15068 = vmatprep.subr.mxu0 %v18931_v50 }
 0x51f   :  { %v1111_v56 = vpop.trf.xlu1  ;;  %15056 = vmatmul.mubr.msk.f32.vlgmr.msra.gmra.mrb[34].mxu1 %vm1409_vm4, %v1108_v49  ;;  %15061 = vmatmul.mubr.msk.f32.vlgmr.msra.gmra.mrb[36].mxu0 %vm1409_vm4, %v1109_v52 }
 0x520   :  { %15064 = vmatpush3.xpose.msk.msra.mxu1 %vm1409_vm4, %v16796_v36  ;;  %15069 = vmatpush3.xpose.msk.msra.mxu0 %vm1409_vm4, %v16806_v38 }
 0x521   :  { %15065 = vmatprep.mubr.msk.f32.mxu1 %vm16467_vm3, %v18931_v50  ;;  %15070 = vmatprep.mubr.msk.f32.mxu0 %vm16467_vm3, %v18931_v50 }
 0x522   :  { %15073 = vmatprep.subr.mxu1 %v18931_v50  ;;  %15078 = vmatprep.subr.mxu0 %v18931_v50 }
 0x523   :  { %v1112_v60 = vpop.trf.xlu1  ;;  %15066 = vmatmul.mubr.msk.f32.vlgmr.msra.gmra.mrb[36].mxu1 %vm1409_vm4, %v1110_v54  ;;  %15071 = vmatmul.mubr.msk.f32.vlgmr.msra.gmra.mrb[38].mxu0 %vm1409_vm4, %v1111_v56 }
 0x524   :  { %15074 = vmatpush3.xpose.msk.msra.mxu1 %vm1409_vm4, %v1240_v42  ;;  %15079 = vmatpush3.xpose.msk.msra.mxu0 %vm1409_vm4, %v1265_v48 }
 0x525   :  { %15075 = vmatprep.mubr.msk.f32.mxu1 %vm16467_vm3, %v18931_v50  ;;  %15080 = vmatprep.mubr.msk.f32.mxu0 %vm16467_vm3, %v18931_v50 }
 0x526   :  { %15083 = vmatprep.subr.mxu1 %v18931_v50  ;;  %15088 = vmatprep.subr.mxu0 %v18931_v50 }
 0x527   :  { %v1137_v19 = vpop.trf.xlu1  ;;  %15076 = vmatmul.mubr.msk.f32.vlgmr.msra.gmra.mrb[38].mxu1 %vm1409_vm4, %v1112_v60 }
 0x528   :  { %15081 = vmatmul.mubr.msk.f32.vlgmr.msra.gmra.mrb[40].mxu0 %vm1409_vm4, %v1137_v19  ;;  %15084 = vmatpush3.xpose.msk.msra.mxu1 %vm1409_vm4, %v1266_v51 }
 0x529   :  { %15085 = vmatprep.mubr.msk.f32.mxu1 %vm16467_vm3, %v18931_v50  ;;  %15089 = vmatpush3.xpose.msk.msra.mxu0 %vm1409_vm4, %v1267_v55 }
 0x52a   :  { %15090 = vmatprep.mubr.msk.f32.mxu0 %vm16467_vm3, %v18931_v50  ;;  %15093 = vmatprep.subr.mxu1 %v18931_v50 }
 0x52b   :  { %v1138_v62 = vpop.trf.xlu1  ;;  %15098 = vmatprep.subr.mxu0 %v18931_v50 }
 0x52c   :  { %15086 = vmatmul.mubr.msk.f32.vlgmr.msra.gmra.mrb[40].mxu1 %vm1409_vm4, %v1138_v62 }
 0x52d   :  { %15094 = vmatpush3.xpose.msk.msra.mxu1 %vm1409_vm4, %v1268_v58  ;;  %15095 = vmatprep.mubr.msk.f32.mxu1 %vm16467_vm3, %v18931_v50 }
 0x52e   :  { %15103 = vmatprep.subr.mxu1 %v18931_v50 }
 0x52f   :  { %v1139_v1 = vpop.trf.xlu1 }
 0x530   :  { %15091 = vmatmul.mubr.msk.f32.vlgmr.msra.gmra.mrb[42].mxu0 %vm1409_vm4, %v1139_v1 }
 0x531   :  { %15099 = vmatpush3.xpose.msk.msra.mxu0 %vm1409_vm4, %v1269_v15  ;;  %15100 = vmatprep.mubr.msk.f32.mxu0 %vm16467_vm3, %v18931_v50 }
 0x532   :  { %15108 = vmatprep.subr.mxu0 %v18931_v50 }
 0x533   :  { %v1140_v4 = vpop.trf.xlu1 }
 0x534   :  { %15096 = vmatmul.mubr.msk.f32.vlgmr.msra.gmra.mrb[42].mxu1 %vm1409_vm4, %v1140_v4 }
 0x535   :  { %15104 = vmatpush3.xpose.msk.msra.mxu1 %vm1409_vm4, %v1270_v0  ;;  %15105 = vmatprep.mubr.msk.f32.mxu1 %vm16467_vm3, %v18931_v50 }
 0x536   :  { %15113 = vmatprep.subr.mxu1 %v18931_v50 }
 0x537   :  { %v1141_v5 = vpop.trf.xlu1 }
 0x538   :  { %15101 = vmatmul.mubr.msk.f32.vlgmr.msra.gmra.mrb[44].mxu0 %vm1409_vm4, %v1141_v5 }
 0x539   :  { %15109 = vmatpush3.xpose.msk.msra.mxu0 %vm1409_vm4, %v1271_v24  ;;  %15110 = vmatprep.mubr.msk.f32.mxu0 %vm16467_vm3, %v18931_v50 }
 0x53a   :  { %15118 = vmatprep.subr.mxu0 %v18931_v50 }
 0x53b   :  { %v1142_v29 = vpop.trf.xlu1 }
 0x53c   :  { %15106 = vmatmul.mubr.msk.f32.vlgmr.msra.gmra.mrb[44].mxu1 %vm1409_vm4, %v1142_v29 }
 0x53d   :  { %15114 = vmatpush3.xpose.msk.msra.mxu1 %vm1409_vm4, %v1272_v7  ;;  %15115 = vmatprep.mubr.msk.f32.mxu1 %vm16467_vm3, %v18931_v50 }
 0x53e   :  { %15123 = vmatprep.subr.mxu1 %v18931_v50 }
 0x53f   :  { %v1143_v8 = vpop.trf.xlu1 }
 0x540   :  { %15111 = vmatmul.mubr.msk.f32.vlgmr.msra.gmra.mrb[46].mxu0 %vm1409_vm4, %v1143_v8 }
 0x541   :  { %15120 = vmatprep.mubr.msk.f32.mxu0 %vm16467_vm3, %v18931_v50 }
 0x543   :  { %v1144_v10 = vpop.trf.xlu1 }
 0x544   :  { %15116 = vmatmul.mubr.msk.f32.vlgmr.msra.gmra.mrb[46].mxu1 %vm1409_vm4, %v1144_v10 }
 0x545   :  { %15125 = vmatprep.mubr.msk.f32.mxu1 %vm16467_vm3, %v18931_v50 }
 0x5be   :  { %v1482_v34 = vpop.f32.mrb[12].mxu1 }
 0x5bf   :  { %v16960_v16 = vadd.f32 %v1482_v34, %v16957_v14  ;;  %v14962_v17 = vpop.f32.mrb[13].mxu1 }
 0x5c1   :  { %v3842_v44 = vsel %vm1409_vm4, %v16960_v16, -inf }
 0x5c2   :  { %v1558_v20 = vpop.f32.mrb[14].mxu1  ;;  %3843 = vmax.xlane.f32.xlu0 %v3842_v44 }
 0x5c3   :  { %v16965_v21 = vadd.f32 %v1558_v20, %v16957_v14  ;;  %v14967_v23 = vpop.f32.mrb[15].mxu1 }
 0x5c5   :  { %v3845_v63 = vsel %vm1409_vm4, %v16965_v21, -inf }
 0x5c6   :  { %3846 = vmax.xlane.f32.xlu1 %v3845_v63  ;;  %v1634_v25 = vpop.f32.mrb[16].mxu1 }
 0x5c7   :  { %v16970_v26 = vadd.f32 %v1634_v25, %v16957_v14  ;;  %v14972_v27 = vpop.f32.mrb[17].mxu1 }
 0x5c9   :  { %v3848_v28 = vsel %vm1409_vm4, %v16970_v26, -inf }
 0x5ca   :  { %v1710_v31 = vpop.f32.mrb[18].mxu1  ;;  %3849 = vmax.xlane.f32.xlu0 %v3848_v28 }
 0x5cb   :  { %v16975_v32 = vadd.f32 %v1710_v31, %v16957_v14  ;;  %v14977_v33 = vpop.f32.mrb[19].mxu1 }
 0x5cd   :  { %v3851_v35 = vsel %vm1409_vm4, %v16975_v32, -inf }
 0x5ce   :  { %v1786_v36 = vpop.f32.mrb[20].mxu0  ;;  %3852 = vmax.xlane.f32.xlu0 %v3851_v35 }
 0x5cf   :  { %v16980_v22 = vadd.f32 %v1786_v36, %v16957_v14  ;;  %v14982_v37 = vpop.f32.mrb[21].mxu0 }
 0x5d1   :  { %v3854_v38 = vsel %vm1409_vm4, %v16980_v22, -inf }
 0x5d2   :  { %v1862_v41 = vpop.f32.mrb[20].mxu1  ;;  %3855 = vmax.xlane.f32.xlu0 %v3854_v38 }
 0x5d3   :  { %v16985_v42 = vadd.f32 %v1862_v41, %v16957_v14  ;;  %v14987_v43 = vpop.f32.mrb[21].mxu1 }
 0x5d5   :  { %v3857_v45 = vsel %vm1409_vm4, %v16985_v42, -inf }
 0x5d6   :  { %v1938_v48 = vpop.f32.mrb[22].mxu0  ;;  %3858 = vmax.xlane.f32.xlu0 %v3857_v45 }
 0x5d7   :  { %v16990_v49 = vadd.f32 %v1938_v48, %v16957_v14  ;;  %v14992_v51 = vpop.f32.mrb[23].mxu0 }
 0x5d9   :  { %v3860_v52 = vsel %vm1409_vm4, %v16990_v49, -inf }
 0x5da   :  { %3861 = vmax.xlane.f32.xlu1 %v3860_v52  ;;  %v2014_v54 = vpop.f32.mrb[22].mxu1  ;;  %v2090_v55 = vpop.f32.mrb[24].mxu0 }
 0x5db   :  { %v16995_v56 = vadd.f32 %v2014_v54, %v16957_v14  ;;  %v16998_v58 = vadd.f32 %v2090_v55, %v16957_v14  ;;  %v14997_v60 = vpop.f32.mrb[23].mxu1  ;;  %v15002_v19 = vpop.f32.mrb[25].mxu0 }
 0x5dd   :  { %v3863_v15 = vsel %vm1409_vm4, %v16995_v56, -inf  ;;  %v3866_v62 = vsel %vm1409_vm4, %v16998_v58, -inf }
 0x5de   :  { %3864 = vmax.xlane.f32.xlu0 %v3863_v15  ;;  %3867 = vmax.xlane.f32.xlu1 %v3866_v62  ;;  %v2166_v0 = vpop.f32.mrb[24].mxu1  ;;  %v2242_v1 = vpop.f32.mrb[26].mxu0 }
 0x5df   :  { %v17005_v4 = vadd.f32 %v2166_v0, %v16957_v14  ;;  %v17008_v24 = vadd.f32 %v2242_v1, %v16957_v14  ;;  %v15007_v5 = vpop.f32.mrb[25].mxu1  ;;  %v15012_v7 = vpop.f32.mrb[27].mxu0 }
 0x5e1   :  { %v3869_v29 = vsel %vm1409_vm4, %v17005_v4, -inf  ;;  %v3872_v8 = vsel %vm1409_vm4, %v17008_v24, -inf }
 0x5e2   :  { %3870 = vmax.xlane.f32.xlu0 %v3869_v29  ;;  %3873 = vmax.xlane.f32.xlu1 %v3872_v8  ;;  %v2318_v10 = vpop.f32.mrb[26].mxu1  ;;  %v2394_v11 = vpop.f32.mrb[28].mxu0 }
 0x5e3   :  { %v17015_v13 = vadd.f32 %v2318_v10, %v16957_v14  ;;  %v17018_v34 = vadd.f32 %v2394_v11, %v16957_v14  ;;  %v15017_v17 = vpop.f32.mrb[27].mxu1  ;;  %v15022_v44 = vpop.f32.mrb[29].mxu0 }
 0x5e5   :  { %v3875_v20 = vsel %vm1409_vm4, %v17015_v13, -inf  ;;  %v3878_v23 = vsel %vm1409_vm4, %v17018_v34, -inf }
 0x5e6   :  { %3876 = vmax.xlane.f32.xlu0 %v3875_v20  ;;  %3879 = vmax.xlane.f32.xlu1 %v3878_v23  ;;  %v2470_v63 = vpop.f32.mrb[28].mxu1  ;;  %v2546_v25 = vpop.f32.mrb[30].mxu0 }
 0x5e7   :  { %v17025_v27 = vadd.f32 %v2470_v63, %v16957_v14  ;;  %v17028_v28 = vadd.f32 %v2546_v25, %v16957_v14  ;;  %v15027_v31 = vpop.f32.mrb[29].mxu1  ;;  %v15032_v33 = vpop.f32.mrb[31].mxu0 }
 0x5e9   :  { %v3881_v35 = vsel %vm1409_vm4, %v17025_v27, -inf  ;;  %v3884_v36 = vsel %vm1409_vm4, %v17028_v28, -inf }
 0x5ea   :  { %3882 = vmax.xlane.f32.xlu0 %v3881_v35  ;;  %3885 = vmax.xlane.f32.xlu1 %v3884_v36  ;;  %v2622_v37 = vpop.f32.mrb[30].mxu1  ;;  %v2698_v38 = vpop.f32.mrb[32].mxu0 }
 0x5eb   :  { %v17035_v41 = vadd.f32 %v2622_v37, %v16957_v14  ;;  %v17038_v43 = vadd.f32 %v2698_v38, %v16957_v14  ;;  %v15037_v45 = vpop.f32.mrb[31].mxu1  ;;  %v15042_v48 = vpop.f32.mrb[33].mxu0 }
 0x5ed   :  { %v3887_v51 = vsel %vm1409_vm4, %v17035_v41, -inf  ;;  %v3890_v52 = vsel %vm1409_vm4, %v17038_v43, -inf }
 0x5ee   :  { %3888 = vmax.xlane.f32.xlu0 %v3887_v51  ;;  %3891 = vmax.xlane.f32.xlu1 %v3890_v52  ;;  %v2774_v54 = vpop.f32.mrb[32].mxu1  ;;  %v2850_v55 = vpop.f32.mrb[34].mxu0 }
 0x5ef   :  { %v17045_v60 = vadd.f32 %v2774_v54, %v16957_v14  ;;  %v17048_v19 = vadd.f32 %v2850_v55, %v16957_v14  ;;  %v15047_v15 = vpop.f32.mrb[33].mxu1  ;;  %v15052_v62 = vpop.f32.mrb[35].mxu0 }
 0x5f1   :  { %v3893_v0 = vsel %vm1409_vm4, %v17045_v60, -inf  ;;  %v3896_v1 = vsel %vm1409_vm4, %v17048_v19, -inf }
 0x5f2   :  { %3894 = vmax.xlane.f32.xlu0 %v3893_v0  ;;  %3897 = vmax.xlane.f32.xlu1 %v3896_v1  ;;  %v2926_v5 = vpop.f32.mrb[34].mxu1  ;;  %v3002_v7 = vpop.f32.mrb[36].mxu0 }
 0x5f3   :  { %v17055_v29 = vadd.f32 %v2926_v5, %v16957_v14  ;;  %v17058_v8 = vadd.f32 %v3002_v7, %v16957_v14  ;;  %v15057_v10 = vpop.f32.mrb[35].mxu1  ;;  %v15062_v11 = vpop.f32.mrb[37].mxu0 }
 0x5f5   :  { %v3899_v17 = vsel %vm1409_vm4, %v17055_v29, -inf  ;;  %v3902_v44 = vsel %vm1409_vm4, %v17058_v8, -inf }
 0x5f6   :  { %3900 = vmax.xlane.f32.xlu0 %v3899_v17  ;;  %3903 = vmax.xlane.f32.xlu1 %v3902_v44  ;;  %v3078_v20 = vpop.f32.mrb[36].mxu1  ;;  %v3154_v23 = vpop.f32.mrb[38].mxu0 }
 0x5f7   :  { %v17065_v63 = vadd.f32 %v3078_v20, %v16957_v14  ;;  %v17068_v25 = vadd.f32 %v3154_v23, %v16957_v14  ;;  %v15067_v31 = vpop.f32.mrb[37].mxu1  ;;  %v15072_v33 = vpop.f32.mrb[39].mxu0 }
 0x5f9   :  { %v3905_v35 = vsel %vm1409_vm4, %v17065_v63, -inf  ;;  %v3908_v36 = vsel %vm1409_vm4, %v17068_v25, -inf }
 0x5fa   :  { %3906 = vmax.xlane.f32.xlu0 %v3905_v35  ;;  %3909 = vmax.xlane.f32.xlu1 %v3908_v36  ;;  %v3230_v37 = vpop.f32.mrb[38].mxu1 }
 0x5fb   :  { %v17075_v38 = vadd.f32 %v3230_v37, %v16957_v14  ;;  %v15077_v45 = vpop.f32.mrb[39].mxu1  ;;  %v3306_v48 = vpop.f32.mrb[40].mxu0 }
 0x5fc   :  { %v17078_v51 = vadd.f32 %v3306_v48, %v16957_v14  ;;  %v15082_v52 = vpop.f32.mrb[41].mxu0 }
 0x5fd   :  { %v3911_v54 = vsel %vm1409_vm4, %v17075_v38, -inf }
 0x5fe   :  { %3912 = vmax.xlane.f32.xlu0 %v3911_v54  ;;  %v3914_v55 = vsel %vm1409_vm4, %v17078_v51, -inf }
 0x5ff   :  { %3915 = vmax.xlane.f32.xlu1 %v3914_v55  ;;  %v3382_v15 = vpop.f32.mrb[40].mxu1 }
 0x600   :  { %v17085_v62 = vadd.f32 %v3382_v15, %v16957_v14  ;;  %v15087_v0 = vpop.f32.mrb[41].mxu1 }
 0x602   :  { %v3917_v1 = vsel %vm1409_vm4, %v17085_v62, -inf }
 0x603   :  { %3918 = vmax.xlane.f32.xlu0 %v3917_v1  ;;  %v3458_v5 = vpop.f32.mrb[42].mxu0 }
 0x604   :  { %v17090_v7 = vadd.f32 %v3458_v5, %v16957_v14  ;;  %v15092_v10 = vpop.f32.mrb[43].mxu0 }
 0x606   :  { %v3920_v11 = vsel %vm1409_vm4, %v17090_v7, -inf }
 0x607   :  { %3921 = vmax.xlane.f32.xlu1 %v3920_v11  ;;  %v3534_v17 = vpop.f32.mrb[42].mxu1 }
 0x608   :  { %v17095_v44 = vadd.f32 %v3534_v17, %v16957_v14  ;;  %v15097_v20 = vpop.f32.mrb[43].mxu1  ;;  %v17119_v17 = vpop.trf.xlu0 }
 0x60a   :  { %v3923_v23 = vsel %vm1409_vm4, %v17095_v44, -inf }
 0x60b   :  { %3924 = vmax.xlane.f32.xlu0 %v3923_v23  ;;  %v3610_v31 = vpop.f32.mrb[44].mxu0 }
 0x60c   :  { %v17100_v33 = vadd.f32 %v3610_v31, %v16957_v14  ;;  %v15102_v35 = vpop.f32.mrb[45].mxu0  ;;  %v17121_v20 = vpop.trf.xlu0 }
 0x60e   :  { %v3926_v36 = vsel %vm1409_vm4, %v17100_v33, -inf }
 0x60f   :  { %3927 = vmax.xlane.f32.xlu1 %v3926_v36  ;;  %v3686_v37 = vpop.f32.mrb[44].mxu1 }
 0x610   :  { %v17105_v45 = vadd.f32 %v3686_v37, %v16957_v14  ;;  %v15107_v48 = vpop.f32.mrb[45].mxu1  ;;  %v17123_v23 = vpop.trf.xlu0 }
 0x612   :  { %v3929_v52 = vsel %vm1409_vm4, %v17105_v45, -inf }
 0x613   :  { %3930 = vmax.xlane.f32.xlu0 %v3929_v52  ;;  %v3762_v54 = vpop.f32.mrb[46].mxu0 }
 0x614   :  { %v17110_v55 = vadd.f32 %v3762_v54, %v16957_v14  ;;  %v15112_v15 = vpop.f32.mrb[47].mxu0  ;;  %v17125_v31 = vpop.trf.xlu0 }
 0x616   :  { %v3932_v0 = vsel %vm1409_vm4, %v17110_v55, -inf }
 0x617   :  { %3933 = vmax.xlane.f32.xlu1 %v3932_v0  ;;  %v3838_v1 = vpop.f32.mrb[46].mxu1 }
 0x618   :  { %v17115_v5 = vadd.f32 %v3838_v1, %v16957_v14  ;;  %v15117_v10 = vpop.f32.mrb[47].mxu1  ;;  %v17127_v35 = vpop.trf.xlu0 }
 0x61a   :  { %v3935_v11 = vsel %vm1409_vm4, %v17115_v5, -inf }
 0x61b   :  { %3936 = vmax.xlane.f32.xlu0 %v3935_v11 }
 0x61c   :  { %v17129_v36 = vpop.trf.xlu0 }
 0x620   :  { %v17131_v37 = vpop.trf.xlu0 }
 0x624   :  { %v17134_v48 = vpop.trf.xlu0 }
 0x64a   :  { %1281 = vxpose.xlu1.b32.start.end [1/1] (short) (narrow) %v16721_v12, 64 }
 0x64f   :  { %v3844_v52 = vpop.xlane.xlu0 %3843 }
 0x653   :  { %v3847_v54 = vpop.xlane.xlu1 %3846 }
 0x654   :  { %v3939_v15 = vsub.f32 %v16965_v21, %v3847_v54 }
 0x656   :  { %v3972_v0 = vmul.f32 1.442695, %v3939_v15 }
 0x657   :  { %v3850_v1 = vpop.xlane.xlu0 %3849 }
 0x658   :  { %15939 = vpow2.f32 %v3972_v0  ;;  %v3940_v53 = vsub.f32 %v16970_v26, %v3850_v1 }
 0x65b   :  { %v3853_v10 = vpop.xlane.xlu0 %3852 }
 0x65c   :  { %v3941_v11 = vsub.f32 %v16975_v32, %v3853_v10 }
 0x65e   :  { %v3976_v50 = vmul.f32 1.442695, %v3941_v11 }
 0x65f   :  { %v3856_v14 = vpop.xlane.xlu0 %3855 }
 0x660   :  { %15941 = vpow2.f32 %v3976_v50 }
 0x662   :  { %v17138_v40 = vpop.eup %15939 }
 0x663   :  { %v3859_v30 = vpop.xlane.xlu0 %3858  ;;  %v4037_v12 = vsel %vm1409_vm4, %v17138_v40, 0.0 }
 0x664   :  { %v3943_v18 = vsub.f32 %v16985_v42, %v3859_v30  ;;  %4038 = vadd.xlane.f32.xlu0 %v4037_v12 }
 0x666   :  { %v3980_v6 = vmul.f32 1.442695, %v3943_v18 }
 0x667   :  { %v3862_v21 = vpop.xlane.xlu1 %3861 }
 0x668   :  { %15943 = vpow2.f32 %v3980_v6 }
 0x66a   :  { %v17143_v54 = vpop.eup %15941 }
 0x66b   :  { %v17145_v15 = vpop.xlane.xlu1 %3867  ;;  %v3865_v32 = vpop.xlane.xlu0 %3864  ;;  %v4043_v50 = vsel %vm1409_vm4, %v17143_v54, 0.0 }
 0x66c   :  { %v3945_v0 = vsub.f32 %v16995_v56, %v3865_v32  ;;  %4044 = vadd.xlane.f32.xlu0 %v4043_v50  ;;  %v3938_v32 = vsub.f32 %v16960_v16, %v3844_v52 }
 0x66e   :  { %v3984_v10 = vmul.f32 1.442695, %v3945_v0 }
 0x66f   :  { %v17150_v11 = vpop.xlane.xlu1 %3873  ;;  %v3871_v2 = vpop.xlane.xlu0 %3870 }
 0x670   :  { %v3947_v30 = vsub.f32 %v17005_v4, %v3871_v2  ;;  %15945 = vpow2.f32 %v3984_v10 }
 0x672   :  { %v17153_v18 = vpop.eup %15943  ;;  %v3988_v6 = vmul.f32 1.442695, %v3947_v30  ;;  %v3970_v30 = vmul.f32 1.442695, %v3938_v32 }
 0x673   :  { %v17155_v42 = vpop.xlane.xlu1 %3879  ;;  %v3877_v12 = vpop.xlane.xlu0 %3876  ;;  %v4049_v61 = vsel %vm1409_vm4, %v17153_v18, 0.0 }
 0x674   :  { %v3949_v3 = vsub.f32 %v17015_v13, %v3877_v12  ;;  %4050 = vadd.xlane.f32.xlu0 %v4049_v61  ;;  %15947 = vpow2.f32 %v3988_v6  ;;  %v3942_v6 = vsub.f32 %v16980_v22, %v3856_v14 }
 0x676   :  { %v3992_v56 = vmul.f32 1.442695, %v3949_v3 }
 0x677   :  { %v17161_v50 = vpop.xlane.xlu1 %3885  ;;  %v3883_v2 = vpop.xlane.xlu0 %3882 }
 0x678   :  { %v3951_v4 = vsub.f32 %v17025_v27, %v3883_v2  ;;  %15949 = vpow2.f32 %v3992_v56  ;;  %v3974_v27 = vmul.f32 1.442695, %v3940_v53  ;;  %v3978_v2 = vmul.f32 1.442695, %v3942_v6 }
 0x67a   :  { %v3996_v0 = vmul.f32 1.442695, %v3951_v4  ;;  %v17164_v10 = vpop.eup %15945  ;;  %v3944_v4 = vsub.f32 %v16990_v49, %v3862_v21 }
 0x67b   :  { %v17167_v47 = vpop.xlane.xlu1 %3891  ;;  %v3889_v13 = vpop.xlane.xlu0 %3888  ;;  %v4055_v3 = vsel %vm1409_vm4, %v17164_v10, 0.0 }
 0x67c   :  { %v3953_v61 = vsub.f32 %v17035_v41, %v3889_v13  ;;  %15951 = vpow2.f32 %v3996_v0  ;;  %4056 = vadd.xlane.f32.xlu0 %v4055_v3  ;;  %v3982_v13 = vmul.f32 1.442695, %v3944_v4  ;;  %v3950_v4 = vsub.f32 %v17018_v34, %v17155_v42 }
 0x67d   :  { %15953 = vpow2.f32 %v3970_v30  ;;  %v3952_v42 = vsub.f32 %v17028_v28, %v17161_v50  ;;  %v3954_v28 = vsub.f32 %v17038_v43, %v17167_v47 }
 0x67e   :  { %v4000_v16 = vmul.f32 1.442695, %v3953_v61  ;;  %v17172_v52 = vpop.eup %15947  ;;  %v3946_v61 = vsub.f32 %v16998_v58, %v17145_v15  ;;  %v3994_v34 = vmul.f32 1.442695, %v3950_v4 }
 0x67f   :  { %v17175_v12 = vpop.xlane.xlu1 %3897  ;;  %v3895_v26 = vpop.xlane.xlu0 %3894  ;;  %v4061_v41 = vsel %vm1409_vm4, %v17172_v52, 0.0  ;;  %v4002_v47 = vmul.f32 1.442695, %v3954_v28 }
 0x680   :  { %v3955_v1 = vsub.f32 %v17045_v60, %v3895_v26  ;;  %15955 = vpow2.f32 %v4000_v16  ;;  %4062 = vadd.xlane.f32.xlu0 %v4061_v41  ;;  %v3986_v58 = vmul.f32 1.442695, %v3946_v61  ;;  %v3956_v43 = vsub.f32 %v17048_v19, %v17175_v12 }
 0x681   :  { %15957 = vpow2.f32 %v3974_v27  ;;  %v3948_v27 = vsub.f32 %v17008_v24, %v17150_v11 }
 0x682   :  { %v4004_v56 = vmul.f32 1.442695, %v3955_v1  ;;  %v17180_v32 = vpop.eup %15949 }
 0x683   :  { %v17183_v53 = vpop.xlane.xlu1 %3903  ;;  %v3901_v14 = vpop.xlane.xlu0 %3900  ;;  %v4067_v60 = vsel %vm1409_vm4, %v17180_v32, 0.0  ;;  %v3990_v11 = vmul.f32 1.442695, %v3948_v27 }
 0x684   :  { %v3957_v22 = vsub.f32 %v17055_v29, %v3901_v14  ;;  %15959 = vpow2.f32 %v4004_v56  ;;  %4068 = vadd.xlane.f32.xlu0 %v4067_v60  ;;  %v3958_v19 = vsub.f32 %v17058_v8, %v17183_v53 }
 0x685   :  { %15961 = vpow2.f32 %v3978_v2 }
 0x686   :  { %v4008_v0 = vmul.f32 1.442695, %v3957_v22  ;;  %v17188_v30 = vpop.eup %15951 }
 0x687   :  { %v17192_v3 = vpop.xlane.xlu1 %3909  ;;  %v3907_v49 = vpop.xlane.xlu0 %3906  ;;  %v4073_v29 = vsel %vm1409_vm4, %v17188_v30, 0.0 }
 0x688   :  { %v3959_v21 = vsub.f32 %v17065_v63, %v3907_v49  ;;  %v17197_v16 = vpop.eup %15953  ;;  %15963 = vpow2.f32 %v4008_v0  ;;  %4074 = vadd.xlane.f32.xlu0 %v4073_v29  ;;  %v3960_v8 = vsub.f32 %v17068_v25, %v17192_v3 }
 0x689   :  { %15965 = vpow2.f32 %v3982_v13  ;;  %v4034_v56 = vsel %vm1409_vm4, %v17197_v16, 0.0 }
 0x68a   :  { %v4012_v6 = vmul.f32 1.442695, %v3959_v21  ;;  %v17201_v26 = vpop.eup %15955 }
 0x68b   :  { %v3913_v15 = vpop.xlane.xlu0 %3912  ;;  %v4079_v63 = vsel %vm1409_vm4, %v17201_v26, 0.0  ;;  %v17208_v2 = vpop.eup %15957 }
 0x68c   :  { %v3961_v1 = vsub.f32 %v17075_v38, %v3913_v15  ;;  %v3916_v41 = vpop.xlane.xlu1 %3915  ;;  %15967 = vpow2.f32 %v4012_v6  ;;  %4080 = vadd.xlane.f32.xlu0 %v4079_v63  ;;  %v4040_v13 = vsel %vm1409_vm4, %v17208_v2, 0.0  ;;  %v3998_v15 = vmul.f32 1.442695, %v3952_v42 }
 0x68d   :  { %v3962_v24 = vsub.f32 %v17078_v51, %v3916_v41  ;;  %4035 = vadd.xlane.f32.xlu1 %v4034_v56  ;;  %15969 = vpow2.f32 %v3986_v58 }
 0x68e   :  { %v4016_v14 = vmul.f32 1.442695, %v3961_v1  ;;  %v17213_v38 = vpop.eup %15959 }
 0x68f   :  { %v4018_v22 = vmul.f32 1.442695, %v3962_v24  ;;  %v4085_v60 = vsel %vm1409_vm4, %v17213_v38, 0.0  ;;  %v17219_v51 = vpop.eup %15961 }
 0x690   :  { %15971 = vpow2.f32 %v4016_v14  ;;  %v3919_v0 = vpop.xlane.xlu0 %3918  ;;  %4086 = vadd.xlane.f32.xlu0 %v4085_v60  ;;  %v4046_v6 = vsel %vm1409_vm4, %v17219_v51, 0.0 }
 0x691   :  { %v3963_v61 = vsub.f32 %v17085_v62, %v3919_v0  ;;  %4041 = vadd.xlane.f32.xlu1 %v4040_v13  ;;  %15973 = vpow2.f32 %v3990_v11 }
 0x692   :  { %v17224_v49 = vpop.eup %15963  ;;  %15975 = vpow2.f32 %v4018_v22 }
 0x693   :  { %v4020_v21 = vmul.f32 1.442695, %v3963_v61  ;;  %v4091_v27 = vsel %vm1409_vm4, %v17224_v49, 0.0  ;;  %v17230_v58 = vpop.eup %15965  ;;  %15977 = vpow2.f32 %v3994_v34  ;;  %v4006_v61 = vmul.f32 1.442695, %v3956_v43 }
 0x694   :  { %v3922_v29 = vpop.xlane.xlu1 %3921  ;;  %4092 = vadd.xlane.f32.xlu0 %v4091_v27  ;;  %v4052_v56 = vsel %vm1409_vm4, %v17230_v58, 0.0 }
 0x695   :  { %v3964_v62 = vsub.f32 %v17090_v7, %v3922_v29  ;;  %4047 = vadd.xlane.f32.xlu1 %v4046_v6  ;;  %15979 = vpow2.f32 %v4020_v21  ;;  %v4010_v6 = vmul.f32 1.442695, %v3958_v19 }
 0x696   :  { %v17235_v50 = vpop.eup %15967  ;;  %15981 = vpow2.f32 %v3998_v15 }
 0x697   :  { %v4022_v1 = vmul.f32 1.442695, %v3964_v62  ;;  %v4097_v41 = vsel %vm1409_vm4, %v17235_v50, 0.0  ;;  %v17241_v24 = vpop.eup %15969 }
 0x698   :  { %v3925_v63 = vpop.xlane.xlu0 %3924  ;;  %4098 = vadd.xlane.f32.xlu0 %v4097_v41  ;;  %v4058_v0 = vsel %vm1409_vm4, %v17241_v24, 0.0 }
 0x699   :  { %v3965_v7 = vsub.f32 %v17095_v44, %v3925_v63  ;;  %4053 = vadd.xlane.f32.xlu1 %v4052_v56  ;;  %15983 = vpow2.f32 %v4022_v1  ;;  %v4014_v63 = vmul.f32 1.442695, %v3960_v8 }
 0x69a   :  { %v17244_v11 = vpop.eup %15971  ;;  %15985 = vpow2.f32 %v4002_v47 }
 0x69b   :  { %v4024_v4 = vmul.f32 1.442695, %v3965_v7  ;;  %v4103_v14 = vsel %vm1409_vm4, %v17244_v11, 0.0  ;;  %v17250_v22 = vpop.eup %15973 }
 0x69c   :  { %v3928_v60 = vpop.xlane.xlu1 %3927  ;;  %v17254_v44 = vpop.eup %15975  ;;  %4104 = vadd.xlane.f32.xlu0 %v4103_v14  ;;  %v4064_v29 = vsel %vm1409_vm4, %v17250_v22, 0.0 }
 0x69d   :  { %v3966_v13 = vsub.f32 %v17100_v33, %v3928_v60  ;;  %4059 = vadd.xlane.f32.xlu1 %v4058_v0  ;;  %15987 = vpow2.f32 %v4024_v4  ;;  %v17259_v34 = vpop.eup %15977  ;;  %v4106_v42 = vsel %vm1409_vm4, %v17254_v44, 0.0 }
 0x69e   :  { %15989 = vpow2.f32 %v4006_v61  ;;  %v4070_v1 = vsel %vm1409_vm4, %v17259_v34, 0.0 }
 0x69f   :  { %v4026_v12 = vmul.f32 1.442695, %v3966_v13  ;;  %v17265_v27 = vpop.eup %15979 }
 0x6a0   :  { %v3931_v21 = vpop.xlane.xlu0 %3930  ;;  %4107 = vadd.xlane.f32.xlu0 %v4106_v42  ;;  %v17270_v62 = vpop.eup %15981  ;;  %v4109_v28 = vsel %vm1409_vm4, %v17265_v27, 0.0 }
 0x6a1   :  { %v3967_v33 = vsub.f32 %v17105_v45, %v3931_v21  ;;  %4065 = vadd.xlane.f32.xlu1 %v4064_v29  ;;  %15991 = vpow2.f32 %v4026_v12  ;;  %v4076_v47 = vsel %vm1409_vm4, %v17270_v62, 0.0 }
 0x6a2   :  { %15993 = vpow2.f32 %v4010_v6 }
 0x6a3   :  { %v4028_v53 = vmul.f32 1.442695, %v3967_v33  ;;  %v17276_v41 = vpop.eup %15983 }
 0x6a4   :  { %v3934_v15 = vpop.xlane.xlu1 %3933  ;;  %4110 = vadd.xlane.f32.xlu0 %v4109_v28  ;;  %v17279_v3 = vpop.eup %15985  ;;  %v4112_v56 = vsel %vm1409_vm4, %v17276_v41, 0.0 }
 0x6a5   :  { %v3968_v45 = vsub.f32 %v17110_v55, %v3934_v15  ;;  %4071 = vadd.xlane.f32.xlu1 %v4070_v1  ;;  %15995 = vpow2.f32 %v4028_v53  ;;  %v4082_v0 = vsel %vm1409_vm4, %v17279_v3, 0.0  ;;  %v18967_v1 = vmov 0.0  }
 0x6a6   :  { %15997 = vpow2.f32 %v4014_v63 }
 0x6a7   :  { %v4030_v25 = vmul.f32 1.442695, %v3968_v45  ;;  %v17285_v43 = vpop.eup %15987 }
 0x6a8   :  { %v3937_v7 = vpop.xlane.xlu0 %3936  ;;  %4113 = vadd.xlane.f32.xlu0 %v4112_v56  ;;  %v17288_v14 = vpop.eup %15989  ;;  %v4115_v60 = vsel %vm1409_vm4, %v17285_v43, 0.0 }
 0x6a9   :  { %v3969_v55 = vsub.f32 %v17115_v5, %v3937_v7  ;;  %4077 = vadd.xlane.f32.xlu1 %v4076_v47  ;;  %15999 = vpow2.f32 %v4030_v25  ;;  %v4088_v19 = vsel %vm1409_vm4, %v17288_v14, 0.0 }
 0x6ab   :  { %v4032_v4 = vmul.f32 1.442695, %v3969_v55  ;;  %v17294_v13 = vpop.eup %15991 }
 0x6ac   :  { %4116 = vadd.xlane.f32.xlu0 %v4115_v60  ;;  %v17296_v61 = vpop.eup %15993  ;;  %v4118_v5 = vsel %vm1409_vm4, %v17294_v13, 0.0 }
 0x6ad   :  { %4083 = vadd.xlane.f32.xlu1 %v4082_v0  ;;  %16001 = vpow2.f32 %v4032_v4  ;;  %v4094_v29 = vsel %vm1409_vm4, %v17296_v61, 0.0 }
 0x6af   :  { %v17302_v12 = vpop.eup %15995 }
 0x6b0   :  { %4119 = vadd.xlane.f32.xlu0 %v4118_v5  ;;  %v17304_v42 = vpop.eup %15997  ;;  %v4121_v21 = vsel %vm1409_vm4, %v17302_v12, 0.0 }
 0x6b1   :  { %4089 = vadd.xlane.f32.xlu1 %v4088_v19  ;;  %v4100_v8 = vsel %vm1409_vm4, %v17304_v42, 0.0 }
 0x6b3   :  { %v17310_v33 = vpop.eup %15999 }
 0x6b4   :  { %4122 = vadd.xlane.f32.xlu0 %v4121_v21  ;;  %v4124_v6 = vsel %vm1409_vm4, %v17310_v33, 0.0 }
 0x6b5   :  { %4095 = vadd.xlane.f32.xlu1 %v4094_v29 }
 0x6b7   :  { %v17316_v53 = vpop.eup %16001 }
 0x6b8   :  { %4125 = vadd.xlane.f32.xlu0 %v4124_v6  ;;  %v4127_v15 = vsel %vm1409_vm4, %v17316_v53, 0.0 }
 0x6b9   :  { %4101 = vadd.xlane.f32.xlu1 %v4100_v8 }
 0x6bc   :  { %4128 = vadd.xlane.f32.xlu0 %v4127_v15 }
 0x6ca   :  { %v1297_v28 = vpop.trf.xlu1 }
 0x6cb   :  { %15119 = vmatpush3.msra.mxu0 %v1297_v28 }
 0x6cc   :  { %15128 = vmatprep.subr.mxu0 %v18967_v1 }
 0x6ce   :  { %v1298_v45 = vpop.trf.xlu1 }
 0x6cf   :  { %15124 = vmatpush3.msra.mxu1 %v1298_v45 }
 0x6d0   :  { %15133 = vmatprep.subr.mxu1 %v18967_v1 }
 0x6d2   :  { %v17324_v63 = vpop.trf.xlu1 }
 0x6d6   :  { %v1300_v56 = vpop.trf.xlu1 }
 0x6da   :  { %v17326_v47 = vpop.trf.xlu1 }
 0x6e9   :  { %1377 = vxpose.xlu0.b32.start.end [1/1] (short) (narrow) %v16725_v59, 64 }
 0x6ec   :  { %1345 = vxpose.xlu1.b32.start.end [1/1] (short) (narrow) %v16723_v57, 64  ;;  %v1302_v57 = vpop.trf.xlu1 }
 0x6f0   :  { %v17335_v5 = vpop.trf.xlu1 }
 0x6f1   :  { %v4039_v25 = vpop.xlane.xlu0 %4038 }
 0x6f2   :  { %16003 = vrcp.f32 %v4039_v25 }
 0x6f4   :  { %v1304_v29 = vpop.trf.xlu1 }
 0x6f9   :  { %v4045_v7 = vpop.xlane.xlu0 %4044 }
 0x6fa   :  { %16005 = vrcp.f32 %v4045_v7 }
 0x6fc   :  { %v16004_v55 = vpop.eup %16003 }
 0x6fd   :  { %v4163_v4 = vmul.f32 %v16004_v55, %v17138_v40 }
 0x6ff   :  { %15126 = vmatmul.mubr.msk.f32.vlgmr.msra.gmra.mrb[48].mxu1 %vm1409_vm4, %v4163_v4  ;;  %v17364_v4 = vld [vmem:[#allocation7] sm:$0xff] }
 0x700   :  { %15134 = vmatpush3.msra.mxu1 %v1300_v56  ;;  %15135 = vmatprep.mubr.msk.f32.mxu1 %vm16467_vm3, %v18967_v1 }
 0x701   :  { %v4051_v59 = vpop.xlane.xlu0 %4050  ;;  %15143 = vmatprep.subr.mxu1 %v18967_v1 }
 0x702   :  { %16007 = vrcp.f32 %v4051_v59 }
 0x704   :  { %v16006_v60 = vpop.eup %16005 }
 0x705   :  { %v4165_v0 = vmul.f32 %v16006_v60, %v17143_v54 }
 0x707   :  { %15136 = vmatmul.mubr.msk.f32.vlgmr.msra.gmra.mrb[50].mxu1 %vm1409_vm4, %v4165_v0 }
 0x708   :  { %15144 = vmatpush3.msra.mxu1 %v1302_v57  ;;  %15145 = vmatprep.mubr.msk.f32.mxu1 %vm16467_vm3, %v18967_v1 }
 0x709   :  { %15153 = vmatprep.subr.mxu1 %v18967_v1  ;;  %v4057_v40 = vpop.xlane.xlu0 %4056 }
 0x70a   :  { %16009 = vrcp.f32 %v4057_v40 }
 0x70c   :  { %v16008_v19 = vpop.eup %16007 }
 0x70d   :  { %v4167_v21 = vmul.f32 %v16008_v19, %v17153_v18  ;;  %v4063_v6 = vpop.xlane.xlu0 %4062 }
 0x70e   :  { %16011 = vrcp.f32 %v4063_v6 }
 0x70f   :  { %15146 = vmatmul.mubr.msk.f32.vlgmr.msra.gmra.mrb[52].mxu1 %vm1409_vm4, %v4167_v21 }
 0x710   :  { %15154 = vmatpush3.msra.mxu1 %v1304_v29  ;;  %15155 = vmatprep.mubr.msk.f32.mxu1 %vm16467_vm3, %v18967_v1 }
 0x711   :  { %15163 = vmatprep.subr.mxu1 %v18967_v1  ;;  %v4069_v54 = vpop.xlane.xlu0 %4068 }
 0x712   :  { %16013 = vrcp.f32 %v4069_v54 }
 0x714   :  { %v16010_v8 = vpop.eup %16009 }
 0x715   :  { %v4169_v15 = vmul.f32 %v16010_v8, %v17164_v10  ;;  %v4075_v28 = vpop.xlane.xlu0 %4074 }
 0x716   :  { %16015 = vrcp.f32 %v4075_v28 }
 0x717   :  { %15156 = vmatmul.mubr.msk.f32.vlgmr.msra.gmra.mrb[54].mxu1 %vm1409_vm4, %v4169_v15 }
 0x718   :  { %v16012_v18 = vpop.eup %16011  ;;  %15164 = vmatpush3.msra.mxu1 %v17121_v20  ;;  %15165 = vmatprep.mubr.msk.f32.mxu1 %vm16467_vm3, %v18967_v1 }
 0x719   :  { %v4171_v45 = vmul.f32 %v16012_v18, %v17172_v52  ;;  %v4081_v25 = vpop.xlane.xlu0 %4080  ;;  %15173 = vmatprep.subr.mxu1 %v18967_v1 }
 0x71a   :  { %v4036_v56 = vpop.xlane.xlu1 %4035  ;;  %16017 = vrcp.f32 %v4081_v25 }
 0x71b   :  { %16019 = vrcp.f32 %v4036_v56  ;;  %15166 = vmatmul.mubr.msk.f32.vlgmr.msra.gmra.mrb[56].mxu1 %vm1409_vm4, %v4171_v45  ;;  %v17445_v56 = vld [vmem:[#allocation7 + $0x10] sm:$0xff] }
 0x71c   :  { %v16014_v10 = vpop.eup %16013  ;;  %15174 = vmatpush3.msra.mxu1 %v17125_v31  ;;  %15175 = vmatprep.mubr.msk.f32.mxu1 %vm16467_vm3, %v18967_v1 }
 0x71d   :  { %v4173_v20 = vmul.f32 %v16014_v10, %v17180_v32  ;;  %15183 = vmatprep.subr.mxu1 %v18967_v1  ;;  %v14350_v32 = vcombine.low %v17364_v4, %v17364_v4  ;;  %v17368_v59 = vpop.xlane.xlu0 %4086 }
 0x71e   :  { %v4042_v7 = vpop.xlane.xlu1 %4041 }
 0x71f   :  { %16021 = vrcp.f32 %v4042_v7  ;;  %15176 = vmatmul.mubr.msk.f32.vlgmr.msra.gmra.mrb[58].mxu1 %vm1409_vm4, %v4173_v20 }
 0x720   :  { %v16016_v52 = vpop.eup %16015  ;;  %15184 = vmatpush3.msra.mxu1 %v17129_v36  ;;  %15185 = vmatprep.mubr.msk.f32.mxu1 %vm16467_vm3, %v18967_v1 }
 0x721   :  { %v4175_v55 = vmul.f32 %v16016_v52, %v17188_v30  ;;  %15193 = vmatprep.subr.mxu1 %v18967_v1  ;;  %v17382_v40 = vpop.xlane.xlu0 %4092 }
 0x722   :  { %v4048_v31 = vpop.xlane.xlu1 %4047 }
 0x723   :  { %16023 = vrcp.f32 %v4048_v31  ;;  %15186 = vmatmul.mubr.msk.f32.vlgmr.msra.gmra.mrb[60].mxu1 %vm1409_vm4, %v4175_v55  ;;  %v17457_v31 = vld [vmem:[#allocation7 + $0x18] sm:$0xff] }
 0x724   :  { %v16018_v57 = vpop.eup %16017  ;;  %15194 = vmatpush3.msra.mxu1 %v17134_v48  ;;  %15195 = vmatprep.mubr.msk.f32.mxu1 %vm16467_vm3, %v18967_v1 }
 0x725   :  { %v16020_v36 = vpop.eup %16019  ;;  %v4177_v30 = vmul.f32 %v16018_v57, %v17201_v26  ;;  %15203 = vmatprep.subr.mxu1 %v18967_v1 }
 0x726   :  { %v4054_v60 = vpop.xlane.xlu1 %4053  ;;  %6547 = vrot.lane.b32.xlu1 %v14350_v32, %s16469_s5  ;;  %v4162_v0 = vmul.f32 %v16020_v36, %v17197_v16  ;;  %v17389_v16 = vld [vmem:[#allocation7 + $0x8] sm:$0xff]  ;;  %v14365_v32 = vcombine.low %v17457_v31, %v17457_v31 }
 0x727   :  { %16025 = vrcp.f32 %v4054_v60  ;;  %15196 = vmatmul.mubr.msk.f32.vlgmr.msra.gmra.mrb[62].mxu1 %vm1409_vm4, %v4177_v30  ;;  %v14355_v21 = vcombine.low %v17389_v16, %v17389_v16 }
 0x728   :  { %15121 = vmatmul.mubr.msk.f32.vlgmr.msra.gmra.mrb[48].mxu0 %vm1409_vm4, %v4162_v0  ;;  %15205 = vmatprep.mubr.msk.f32.mxu1 %vm16467_vm3, %v18967_v1 }
 0x729   :  { %v16022_v48 = vpop.eup %16021  ;;  %15129 = vmatpush3.msra.mxu0 %v17324_v63  ;;  %15130 = vmatprep.mubr.msk.f32.mxu0 %vm16467_vm3, %v18967_v1 }
 0x72a   :  { %v4060_v26 = vpop.xlane.xlu1 %4059  ;;  %v4164_v19 = vmul.f32 %v16022_v48, %v17208_v2  ;;  %15138 = vmatprep.subr.mxu0 %v18967_v1  ;;  %v17400_v2 = vpop.xlane.xlu0 %4098 }
 0x72b   :  { %16027 = vrcp.f32 %v4060_v26 }
 0x72c   :  { %15131 = vmatmul.mubr.msk.f32.vlgmr.msra.gmra.mrb[50].mxu0 %vm1409_vm4, %v4164_v19 }
 0x72d   :  { %v16024_v29 = vpop.eup %16023  ;;  %15139 = vmatpush3.msra.mxu0 %v17326_v47  ;;  %15140 = vmatprep.mubr.msk.f32.mxu0 %vm16467_vm3, %v18967_v1 }
 0x72e   :  { %v4066_v63 = vpop.xlane.xlu1 %4065  ;;  %v4166_v6 = vmul.f32 %v16024_v29, %v17219_v51  ;;  %15148 = vmatprep.subr.mxu0 %v18967_v1  ;;  %6630 = vrot.lane.b32.xlu0 %v14355_v21, %s16469_s5  ;;  %v17409_v15 = vpop.xlane.xlu0 %4104 }
 0x72f   :  { %16029 = vrcp.f32 %v4066_v63 }
 0x730   :  { %15141 = vmatmul.mubr.msk.f32.vlgmr.msra.gmra.mrb[52].mxu0 %vm1409_vm4, %v4166_v6 }
 0x731   :  { %v16026_v54 = vpop.eup %16025  ;;  %15149 = vmatpush3.msra.mxu0 %v17335_v5  ;;  %15150 = vmatprep.mubr.msk.f32.mxu0 %vm16467_vm3, %v18967_v1 }
 0x732   :  { %v4072_v8 = vpop.xlane.xlu1 %4071  ;;  %v4168_v47 = vmul.f32 %v16026_v54, %v17230_v58  ;;  %15158 = vmatprep.subr.mxu0 %v18967_v1 }
 0x733   :  { %16031 = vrcp.f32 %v4072_v8 }
 0x734   :  { %15151 = vmatmul.mubr.msk.f32.vlgmr.msra.gmra.mrb[54].mxu0 %vm1409_vm4, %v4168_v47 }
 0x735   :  { %v16028_v51 = vpop.eup %16027  ;;  %15159 = vmatpush3.msra.mxu0 %v17119_v17  ;;  %15160 = vmatprep.mubr.msk.f32.mxu0 %vm16467_vm3, %v18967_v1  ;;  %v17422_v17 = vpop.xlane.xlu0 %4107 }
 0x736   :  { %v4078_v28 = vpop.xlane.xlu1 %4077  ;;  %15168 = vmatprep.subr.mxu0 %v18967_v1  ;;  %v4170_v5 = vmul.f32 %v16028_v51, %v17241_v24 }
 0x737   :  { %16033 = vrcp.f32 %v4078_v28 }
 0x738   :  { %15161 = vmatmul.mubr.msk.f32.vlgmr.msra.gmra.mrb[56].mxu0 %vm1409_vm4, %v4170_v5 }
 0x739   :  { %v16030_v58 = vpop.eup %16029  ;;  %15169 = vmatpush3.msra.mxu0 %v17123_v23  ;;  %15170 = vmatprep.mubr.msk.f32.mxu0 %vm16467_vm3, %v18967_v1 }
 0x73a   :  { %v4172_v18 = vmul.f32 %v16030_v58, %v17250_v22  ;;  %15178 = vmatprep.subr.mxu0 %v18967_v1  ;;  %v17431_v22 = vpop.xlane.xlu0 %4110 }
 0x73c   :  { %15171 = vmatmul.mubr.msk.f32.vlgmr.msra.gmra.mrb[58].mxu0 %vm1409_vm4, %v4172_v18 }
 0x73d   :  { %v16032_v45 = vpop.eup %16031  ;;  %15179 = vmatpush3.msra.mxu0 %v17127_v35  ;;  %15180 = vmatprep.mubr.msk.f32.mxu0 %vm16467_vm3, %v18967_v1 }
 0x73e   :  { %v4174_v24 = vmul.f32 %v16032_v45, %v17259_v34  ;;  %15188 = vmatprep.subr.mxu0 %v18967_v1  ;;  %v17441_v35 = vpop.xlane.xlu0 %4113 }
 0x740   :  { %15181 = vmatmul.mubr.msk.f32.vlgmr.msra.gmra.mrb[60].mxu0 %vm1409_vm4, %v4174_v24 }
 0x741   :  { %v16034_v23 = vpop.eup %16033  ;;  %15189 = vmatpush3.msra.mxu0 %v17131_v37  ;;  %15190 = vmatprep.mubr.msk.f32.mxu0 %vm16467_vm3, %v18967_v1  ;;  %v14360_v37 = vcombine.low %v17445_v56, %v17445_v56 }
 0x742   :  { %v4176_v25 = vmul.f32 %v16034_v23, %v17270_v62  ;;  %15198 = vmatprep.subr.mxu0 %v18967_v1  ;;  %v17443_v34 = vpop.xlane.xlu0 %4116  ;;  %v4084_v62 = vpop.xlane.xlu1 %4083 }
 0x743   :  { %6713 = vrot.lane.b32.xlu1 %v14360_v37, %s16469_s5  ;;  %16035 = vrcp.f32 %v4084_v62 }
 0x744   :  { %15191 = vmatmul.mubr.msk.f32.vlgmr.msra.gmra.mrb[62].mxu0 %vm1409_vm4, %v4176_v25  ;;  %16037 = vrcp.f32 %v17368_v59 }
 0x745   :  { %15200 = vmatprep.mubr.msk.f32.mxu0 %vm16467_vm3, %v18967_v1 }
 0x746   :  { %v17449_v10 = vpop.xlane.xlu0 %4119  ;;  %v4090_v7 = vpop.xlane.xlu1 %4089 }
 0x747   :  { %6796 = vrot.lane.b32.xlu1 %v14365_v32, %s16469_s5  ;;  %16039 = vrcp.f32 %v4090_v7 }
 0x748   :  { %16041 = vrcp.f32 %v17382_v40 }
 0x74a   :  { %v17452_v20 = vpop.xlane.xlu0 %4122  ;;  %v4096_v55 = vpop.xlane.xlu1 %4095 }
 0x74b   :  { %16043 = vrcp.f32 %v4096_v55 }
 0x74c   :  { %16045 = vrcp.f32 %v17400_v2 }
 0x74d   :  { %v16036_v30 = vpop.eup %16035 }
 0x74e   :  { %v17454_v52 = vpop.xlane.xlu0 %4125  ;;  %v4102_v36 = vpop.xlane.xlu1 %4101  ;;  %v4178_v0 = vmul.f32 %v16036_v30, %v17279_v3 }
 0x74f   :  { %v16038_v59 = vpop.eup %16037  ;;  %16047 = vrcp.f32 %v4102_v36 }
 0x750   :  { %v4179_v19 = vmul.f32 %v16038_v59, %v17213_v38  ;;  %16049 = vrcp.f32 %v17409_v15 }
 0x751   :  { %v16040_v29 = vpop.eup %16039  ;;  %16051 = vrcp.f32 %v17422_v17 }
 0x752   :  { %v17462_v57 = vpop.xlane.xlu0 %4128  ;;  %v4180_v3 = vmul.f32 %v16040_v29, %v17288_v14  ;;  %v16042_v63 = vpop.eup %16041  ;;  %16053 = vrcp.f32 %v17431_v22 }
 0x753   :  { %v4181_v6 = vmul.f32 %v16042_v63, %v17224_v49  ;;  %16055 = vrcp.f32 %v17441_v35 }
 0x754   :  { %16057 = vrcp.f32 %v17443_v34 }
 0x755   :  { %v16044_v54 = vpop.eup %16043  ;;  %16059 = vrcp.f32 %v17449_v10 }
 0x756   :  { %v4182_v14 = vmul.f32 %v16044_v54, %v17296_v61  ;;  %v16046_v51 = vpop.eup %16045  ;;  %16061 = vrcp.f32 %v17452_v20 }
 0x757   :  { %v4183_v49 = vmul.f32 %v16046_v51, %v17235_v50  ;;  %16063 = vrcp.f32 %v17454_v52 }
 0x758   :  { %16065 = vrcp.f32 %v17462_v57 }
 0x759   :  { %v16048_v28 = vpop.eup %16047 }
 0x75a   :  { %v16050_v5 = vpop.eup %16049  ;;  %v4184_v58 = vmul.f32 %v16048_v28, %v17304_v42 }
 0x75b   :  { %v16052_v50 = vpop.eup %16051  ;;  %v4185_v45 = vmul.f32 %v16050_v5, %v17244_v11 }
 0x75c   :  { %v16054_v17 = vpop.eup %16053  ;;  %v4186_v42 = vmul.f32 %v16052_v50, %v17254_v44 }
 0x75d   :  { %v16056_v22 = vpop.eup %16055  ;;  %v4187_v11 = vmul.f32 %v16054_v17, %v17265_v27 }
 0x75e   :  { %v16058_v25 = vpop.eup %16057  ;;  %v4188_v44 = vmul.f32 %v16056_v22, %v17276_v41 }
 0x75f   :  { %v16060_v35 = vpop.eup %16059  ;;  %v4189_v41 = vmul.f32 %v16058_v25, %v17285_v43 }
 0x760   :  { %v16062_v27 = vpop.eup %16061  ;;  %v4190_v37 = vmul.f32 %v16060_v35, %v17294_v13 }
 0x761   :  { %v16064_v10 = vpop.eup %16063  ;;  %v4191_v43 = vmul.f32 %v16062_v27, %v17302_v12 }
 0x762   :  { %v4192_v62 = vmul.f32 %v16064_v10, %v17310_v33  ;;  %v16066_v20 = vpop.eup %16065 }
 0x763   :  { %v4193_v12 = vmul.f32 %v16066_v20, %v17316_v53 }
 0x769   :  { %v17464_v60 = vpop.trf.xlu0 }
 0x76c   :  { %v1361_v48 = vpop.trf.xlu1 }
 0x76d   :  { %15199 = vmatpush3.msra.mxu0 %v1361_v48  ;;  %v17473_v21 = vpop.trf.xlu0 }
 0x76e   :  { %15201 = vmatmul.mubr.msk.f32.vlgmr.msra.gmra.mrb[64].mxu0 %vm1409_vm4, %v4178_v0  ;;  %15208 = vmatprep.subr.mxu0 %v18967_v1 }
 0x76f   :  { %15210 = vmatprep.mubr.msk.f32.mxu0 %vm16467_vm3, %v18967_v1 }
 0x770   :  { %v1362_v26 = vpop.trf.xlu1 }
 0x771   :  { %15204 = vmatpush3.msra.mxu1 %v1362_v26  ;;  %v1395_v38 = vpop.trf.xlu0 }
 0x772   :  { %15206 = vmatmul.mubr.msk.f32.vlgmr.msra.gmra.mrb[64].mxu1 %vm1409_vm4, %v4179_v19  ;;  %15213 = vmatprep.subr.mxu1 %v18967_v1 }
 0x773   :  { %15215 = vmatprep.mubr.msk.f32.mxu1 %vm16467_vm3, %v18967_v1 }
 0x774   :  { %v1363_v40 = vpop.trf.xlu1 }
 0x775   :  { %15209 = vmatpush3.msra.mxu0 %v1363_v40  ;;  %v1396_v47 = vpop.trf.xlu0 }
 0x776   :  { %15211 = vmatmul.mubr.msk.f32.vlgmr.msra.gmra.mrb[66].mxu0 %vm1409_vm4, %v4180_v3  ;;  %15218 = vmatprep.subr.mxu0 %v18967_v1 }
 0x777   :  { %15220 = vmatprep.mubr.msk.f32.mxu0 %vm16467_vm3, %v18967_v1 }
 0x778   :  { %v1364_v2 = vpop.trf.xlu1 }
 0x779   :  { %15214 = vmatpush3.msra.mxu1 %v1364_v2  ;;  %v1397_v61 = vpop.trf.xlu0 }
 0x77a   :  { %15216 = vmatmul.mubr.msk.f32.vlgmr.msra.gmra.mrb[66].mxu1 %vm1409_vm4, %v4181_v6  ;;  %15223 = vmatprep.subr.mxu1 %v18967_v1 }
 0x77b   :  { %15225 = vmatprep.mubr.msk.f32.mxu1 %vm16467_vm3, %v18967_v1 }
 0x77c   :  { %v1365_v8 = vpop.trf.xlu1 }
 0x77d   :  { %15219 = vmatpush3.msra.mxu0 %v1365_v8  ;;  %v1398_v23 = vpop.trf.xlu0 }
 0x77e   :  { %15221 = vmatmul.mubr.msk.f32.vlgmr.msra.gmra.mrb[68].mxu0 %vm1409_vm4, %v4182_v14  ;;  %15228 = vmatprep.subr.mxu0 %v18967_v1 }
 0x77f   :  { %15230 = vmatprep.mubr.msk.f32.mxu0 %vm16467_vm3, %v18967_v1 }
 0x780   :  { %v1366_v15 = vpop.trf.xlu1 }
 0x781   :  { %15224 = vmatpush3.msra.mxu1 %v1366_v15  ;;  %v1399_v34 = vpop.trf.xlu0 }
 0x782   :  { %15226 = vmatmul.mubr.msk.f32.vlgmr.msra.gmra.mrb[68].mxu1 %vm1409_vm4, %v4183_v49  ;;  %15233 = vmatprep.subr.mxu1 %v18967_v1 }
 0x783   :  { %15235 = vmatprep.mubr.msk.f32.mxu1 %vm16467_vm3, %v18967_v1 }
 0x784   :  { %v1367_v18 = vpop.trf.xlu1 }
 0x785   :  { %15229 = vmatpush3.msra.mxu0 %v1367_v18  ;;  %v1400_v13 = vpop.trf.xlu0 }
 0x786   :  { %15231 = vmatmul.mubr.msk.f32.vlgmr.msra.gmra.mrb[70].mxu0 %vm1409_vm4, %v4184_v58  ;;  %15238 = vmatprep.subr.mxu0 %v18967_v1 }
 0x787   :  { %15239 = vmatpush3.msra.mxu0 %v17464_v60  ;;  %15240 = vmatprep.mubr.msk.f32.mxu0 %vm16467_vm3, %v18967_v1 }
 0x788   :  { %v1368_v24 = vpop.trf.xlu1  ;;  %15248 = vmatprep.subr.mxu0 %v18967_v1 }
 0x789   :  { %15234 = vmatpush3.msra.mxu1 %v1368_v24 }
 0x78a   :  { %15236 = vmatmul.mubr.msk.f32.vlgmr.msra.gmra.mrb[70].mxu1 %vm1409_vm4, %v4185_v45  ;;  %15241 = vmatmul.mubr.msk.f32.vlgmr.msra.gmra.mrb[72].mxu0 %vm1409_vm4, %v4186_v42 }
 0x78b   :  { %15243 = vmatprep.subr.mxu1 %v18967_v1  ;;  %15249 = vmatpush3.msra.mxu0 %v1395_v38 }
 0x78c   :  { %15244 = vmatpush3.msra.mxu1 %v17473_v21  ;;  %15245 = vmatprep.mubr.msk.f32.mxu1 %vm16467_vm3, %v18967_v1 }
 0x78d   :  { %15250 = vmatprep.mubr.msk.f32.mxu0 %vm16467_vm3, %v18967_v1  ;;  %15253 = vmatprep.subr.mxu1 %v18967_v1 }
 0x78e   :  { %15246 = vmatmul.mubr.msk.f32.vlgmr.msra.gmra.mrb[72].mxu1 %vm1409_vm4, %v4187_v11  ;;  %15251 = vmatmul.mubr.msk.f32.vlgmr.msra.gmra.mrb[74].mxu0 %vm1409_vm4, %v4188_v44 }
 0x78f   :  { %15254 = vmatpush3.msra.mxu1 %v1396_v47  ;;  %15258 = vmatprep.subr.mxu0 %v18967_v1 }
 0x790   :  { %15255 = vmatprep.mubr.msk.f32.mxu1 %vm16467_vm3, %v18967_v1  ;;  %15259 = vmatpush3.msra.mxu0 %v1397_v61 }
 0x791   :  { %15260 = vmatprep.mubr.msk.f32.mxu0 %vm16467_vm3, %v18967_v1  ;;  %15263 = vmatprep.subr.mxu1 %v18967_v1 }
 0x792   :  { %15256 = vmatmul.mubr.msk.f32.vlgmr.msra.gmra.mrb[74].mxu1 %vm1409_vm4, %v4189_v41  ;;  %15261 = vmatmul.mubr.msk.f32.vlgmr.msra.gmra.mrb[76].mxu0 %vm1409_vm4, %v4190_v37 }
 0x793   :  { %15268 = vmatprep.subr.mxu0 %v18967_v1  ;;  %15264 = vmatpush3.msra.mxu1 %v1398_v23 }
 0x794   :  { %15265 = vmatprep.mubr.msk.f32.mxu1 %vm16467_vm3, %v18967_v1  ;;  %15269 = vmatpush3.msra.mxu0 %v1399_v34 }
 0x795   :  { %15270 = vmatprep.mubr.msk.f32.mxu0 %vm16467_vm3, %v18967_v1  ;;  %15273 = vmatprep.subr.mxu1 %v18967_v1 }
 0x796   :  { %15266 = vmatmul.mubr.msk.f32.vlgmr.msra.gmra.mrb[76].mxu1 %vm1409_vm4, %v4191_v43  ;;  %15271 = vmatmul.mubr.msk.f32.vlgmr.msra.gmra.mrb[78].mxu0 %vm1409_vm4, %v4192_v62 }
 0x797   :  { %15274 = vmatpush3.msra.mxu1 %v1400_v13  ;;  %15275 = vmatprep.mubr.msk.f32.mxu1 %vm16467_vm3, %v18967_v1 }
 0x798   :  { %v6548_v33 = vpop.permute.xlu1 %6547 }
 0x799   :  { %15806 = vmatprep.subr.msk.bf16.mxu0 %vm726_vm1, %v6548_v33  ;;  %v6562_v7 = vsel %vm726_vm1, %v6548_v33, 0 }
 0x79a   :  { %15276 = vmatmul.mubr.msk.f32.vlgmr.msra.gmra.mrb[78].mxu1 %vm1409_vm4, %v4193_v12  ;;  %15279 = vmatpush3.bf16.msra.mxu0 %v6562_v7 }
 0x7a0   :  { %v6631_v52 = vpop.permute.xlu0 %6630 }
 0x7a1   :  { %15807 = vmatprep.subr.msk.bf16.mxu0 %vm726_vm1, %v6631_v52  ;;  %v6645_v8 = vsel %vm726_vm1, %v6631_v52, 0 }
 0x7b5   :  { %v6714_v47 = vpop.permute.xlu1 %6713 }
 0x7b6   :  { %v6728_v24 = vsel %vm726_vm1, %v6714_v47, 0 }
 0x7b9   :  { %v6797_v23 = vpop.permute.xlu1 %6796 }
 0x7ba   :  { %v6811_v7 = vsel %vm726_vm1, %v6797_v23, 0 }
 0x7d2   :  { %v4336_v55 = vpop.f32.mrb[48].mxu1 }
 0x7d3   :  { %v15127_v32 = vpop.f32.mrb[49].mxu1 }
 0x7da   :  { %v4482_v57 = vpop.f32.mrb[50].mxu1 }
 0x7db   :  { %v15137_v36 = vpop.f32.mrb[51].mxu1 }
 0x7e2   :  { %v4628_v30 = vpop.f32.mrb[52].mxu1 }
 0x7e3   :  { %v15147_v60 = vpop.f32.mrb[53].mxu1 }
 0x7ea   :  { %v4774_v0 = vpop.f32.mrb[54].mxu1 }
 0x7eb   :  { %v15157_v48 = vpop.f32.mrb[55].mxu1 }
 0x7ee   :  { %v4920_v53 = vpop.f32.mrb[56].mxu1 }
 0x7ef   :  { %v15167_v59 = vpop.f32.mrb[57].mxu1 }
 0x7f2   :  { %v5066_v26 = vpop.f32.mrb[58].mxu1 }
 0x7f3   :  { %v15177_v19 = vpop.f32.mrb[59].mxu1 }
 0x7f6   :  { %v5212_v21 = vpop.f32.mrb[60].mxu1 }
 0x7f7   :  { %v15187_v29 = vpop.f32.mrb[61].mxu1 }
 0x7fa   :  { %v5358_v3 = vpop.f32.mrb[62].mxu1 }
 0x7fb   :  { %v4263_v40 = vpop.f32.mrb[48].mxu0  ;;  %v15197_v63 = vpop.f32.mrb[63].mxu1 }
 0x7fc   :  { %v6530_v38 = vpack.c.bf16 %v4336_v55, %v4263_v40  ;;  %v15122_v6 = vpop.f32.mrb[49].mxu0 }
 0x7fe   :  { %15280 = vmatprep.mubr.msk.bf16.mxu0 %vm1409_vm4, %v6530_v38 }
 0x7ff   :  { %v4409_v2 = vpop.f32.mrb[50].mxu0 }
 0x800   :  { %v6531_v54 = vpack.c.bf16 %v4482_v57, %v4409_v2  ;;  %v15132_v14 = vpop.f32.mrb[51].mxu0 }
 0x802   :  { %15281 = vmatmul.mubr.msk.bf16.vlgmr.msra.gmra.mrb[80].mxu0 %vm1409_vm4, %v6531_v54 }
 0x803   :  { %v4555_v51 = vpop.f32.mrb[52].mxu0  ;;  %15289 = vmatpush3.bf16.msra.mxu0 %v6645_v8 }
 0x804   :  { %v6532_v49 = vpack.c.bf16 %v4628_v30, %v4555_v51  ;;  %v15142_v15 = vpop.f32.mrb[53].mxu0  ;;  %15808 = vmatprep.subr.msk.bf16.mxu0 %vm726_vm1, %v6714_v47 }
 0x806   :  { %15284 = vmatprep.mubr.msk.bf16.mxu0 %vm1409_vm4, %v6532_v49 }
 0x807   :  { %v4701_v28 = vpop.f32.mrb[54].mxu0 }
 0x808   :  { %v6533_v61 = vpack.c.bf16 %v4774_v0, %v4701_v28  ;;  %v15152_v5 = vpop.f32.mrb[55].mxu0 }
 0x809   :  { %v18951_v5 = vsub.s32 3, %v16689_v9 }
 0x80a   :  { %15285 = vmatmul.mubr.msk.bf16.gmra.mrb[84].mxu0 %vm1409_vm4, %v6533_v61 }
 0x80b   :  { %v4847_v58 = vpop.f32.mrb[56].mxu0 }
 0x80c   :  { %v6534_v18 = vpack.c.bf16 %v4920_v53, %v4847_v58  ;;  %v15162_v50 = vpop.f32.mrb[57].mxu0 }
 0x80e   :  { %15290 = vmatprep.mubr.msk.bf16.mxu0 %vm1409_vm4, %v6534_v18  ;;  %v17583_v18 = vld [vmem:[#allocation11] sm:$0xff] }
 0x80f   :  { %v4993_v17 = vpop.f32.mrb[58].mxu0  ;;  %v6913_v50 = vrot.slane %v17583_v18, %v18951_v5 }
 0x810   :  { %v6535_v45 = vpack.c.bf16 %v5066_v26, %v4993_v17  ;;  %v15172_v42 = vpop.f32.mrb[59].mxu0 }
 0x812   :  { %15291 = vmatmul.mubr.msk.bf16.vlgmr.msra.gmra.mrb[80].mxu0 %vm1409_vm4, %v6535_v45 }
 0x813   :  { %v5139_v22 = vpop.f32.mrb[60].mxu0  ;;  %15299 = vmatpush3.bf16.msra.mxu0 %v6728_v24 }
 0x814   :  { %v6536_v25 = vpack.c.bf16 %v5212_v21, %v5139_v22  ;;  %v15182_v11 = vpop.f32.mrb[61].mxu0  ;;  %15809 = vmatprep.subr.msk.bf16.mxu0 %vm726_vm1, %v6797_v23 }
 0x816   :  { %15294 = vmatprep.mubr.msk.bf16.mxu0 %vm1409_vm4, %v6536_v25  ;;  %v18968_v25 = vld [vmem:[#allocation19_spill] sm:$0xff] }
 0x817   :  { %v5285_v44 = vpop.f32.mrb[62].mxu0 }
 0x818   :  { %v6537_v35 = vpack.c.bf16 %v5358_v3, %v5285_v44  ;;  %v15192_v34 = vpop.f32.mrb[63].mxu0 }
 0x81a   :  { %15295 = vmatmul.mubr.msk.bf16.gmra.mrb[84].mxu0 %vm1409_vm4, %v6537_v35  ;;  %v18969_v35 = vld [vmem:[#allocation20_spill] sm:$0xff] }
 0x841   :  { %v5431_v27 = vpop.f32.mrb[64].mxu0 }
 0x842   :  { %v15202_v41 = vpop.f32.mrb[65].mxu0 }
 0x845   :  { %v5504_v37 = vpop.f32.mrb[64].mxu1 }
 0x846   :  { %v6538_v10 = vpack.c.bf16 %v5504_v37, %v5431_v27  ;;  %v15207_v43 = vpop.f32.mrb[65].mxu1 }
 0x847   :  { %v18970_v43 = vld [vmem:[#allocation23_spill] sm:$0xff] }
 0x848   :  { %15300 = vmatprep.mubr.msk.bf16.mxu0 %vm1409_vm4, %v6538_v10 }
 0x849   :  { %v5577_v62 = vpop.f32.mrb[66].mxu0 }
 0x84a   :  { %v15212_v13 = vpop.f32.mrb[67].mxu0 }
 0x84d   :  { %v5650_v20 = vpop.f32.mrb[66].mxu1 }
 0x84e   :  { %v6539_v12 = vpack.c.bf16 %v5650_v20, %v5577_v62  ;;  %v15217_v33 = vpop.f32.mrb[67].mxu1 }
 0x850   :  { %15301 = vmatmul.mubr.msk.bf16.vlgmr.msra.gmra.mrb[80].mxu0 %vm1409_vm4, %v6539_v12 }
 0x851   :  { %v5723_v52 = vpop.f32.mrb[68].mxu0  ;;  %15309 = vmatpush3.bf16.msra.mxu0 %v6811_v7  ;;  %v18971_v7 = vld [vmem:[#allocation21_spill] sm:$0xff] }
 0x852   :  { %v15222_v55 = vpop.f32.mrb[69].mxu0  ;;  %15373 = vmatprep.subr.mxu0 %v18967_v1 }
 0x855   :  { %v5796_v32 = vpop.f32.mrb[68].mxu1 }
 0x856   :  { %v6540_v57 = vpack.c.bf16 %v5796_v32, %v5723_v52  ;;  %v15227_v36 = vpop.f32.mrb[69].mxu1 }
 0x858   :  { %15304 = vmatprep.mubr.msk.bf16.mxu0 %vm1409_vm4, %v6540_v57  ;;  %v18972_v57 = vld [vmem:[#allocation22_spill] sm:$0xff] }
 0x859   :  { %v5869_v30 = vpop.f32.mrb[70].mxu0 }
 0x85a   :  { %v15232_v60 = vpop.f32.mrb[71].mxu0 }
 0x85b   :  { %v18973_v60 = vld [vmem:[#allocation24_spill] sm:$0xff] }
 0x85d   :  { %v5942_v0 = vpop.f32.mrb[70].mxu1  ;;  %v6015_v48 = vpop.f32.mrb[72].mxu0 }
 0x85e   :  { %v6541_v53 = vpack.c.bf16 %v5942_v0, %v5869_v30  ;;  %v15237_v59 = vpop.f32.mrb[71].mxu1  ;;  %v15242_v26 = vpop.f32.mrb[73].mxu0 }
 0x860   :  { %15305 = vmatmul.mubr.msk.bf16.gmra.mrb[84].mxu0 %vm1409_vm4, %v6541_v53 }
 0x861   :  { %v6088_v19 = vpop.f32.mrb[72].mxu1  ;;  %v6161_v21 = vpop.f32.mrb[74].mxu0 }
 0x862   :  { %v6542_v29 = vpack.c.bf16 %v6088_v19, %v6015_v48  ;;  %v15247_v3 = vpop.f32.mrb[73].mxu1  ;;  %v15252_v40 = vpop.f32.mrb[75].mxu0 }
 0x864   :  { %15310 = vmatprep.mubr.msk.bf16.mxu0 %vm1409_vm4, %v6542_v29 }
 0x865   :  { %v6234_v63 = vpop.f32.mrb[74].mxu1  ;;  %v6307_v38 = vpop.f32.mrb[76].mxu0 }
 0x866   :  { %v6543_v6 = vpack.c.bf16 %v6234_v63, %v6161_v21  ;;  %v15257_v2 = vpop.f32.mrb[75].mxu1  ;;  %v15262_v54 = vpop.f32.mrb[77].mxu0 }
 0x868   :  { %15311 = vmatmul.mubr.msk.bf16.vlgmr.msra.gmra.mrb[80].mxu0 %vm1409_vm4, %v6543_v6 }
 0x869   :  { %v6380_v14 = vpop.f32.mrb[76].mxu1  ;;  %v6453_v8 = vpop.f32.mrb[78].mxu0 }
 0x86a   :  { %v6544_v47 = vpack.c.bf16 %v6380_v14, %v6307_v38  ;;  %v15267_v51 = vpop.f32.mrb[77].mxu1  ;;  %v15272_v49 = vpop.f32.mrb[79].mxu0 }
 0x86c   :  { %15314 = vmatprep.mubr.msk.bf16.mxu0 %vm1409_vm4, %v6544_v47 }
 0x86d   :  { %v6526_v15 = vpop.f32.mrb[78].mxu1 }
 0x86e   :  { %v6545_v28 = vpack.c.bf16 %v6526_v15, %v6453_v8  ;;  %v15277_v61 = vpop.f32.mrb[79].mxu1 }
 0x870   :  { %15315 = vmatmul.mubr.msk.bf16.gmra.mrb[84].mxu0 %vm1409_vm4, %v6545_v28 }
 0x871   :  { %15375 = vmatprep.mubr.msk.f32.mxu0 %vm16467_vm3, %v18967_v1 }
 0x93b   :  { %v15312_v58 = vpop.f32.mrb[80].mxu0 }
 0x93c   :  { %v6847_v17 = vpop.f32.mrb[81].mxu0  ;;  %v6904_v45 = vadd.f32 %v15312_v58, %v16607_v46 }
 0x93d   :  { %v6902_v42 = vadd.f32 %v6847_v17, %v16601_v39  ;;  %v15313_v24 = vpop.f32.mrb[82].mxu0 }
 0x93e   :  { %v6850_v23 = vpop.f32.mrb[83].mxu0  ;;  %v17593_v44 = vadd.f32 %v6913_v50, %v6904_v45  ;;  %v6905_v34 = vadd.f32 %v15313_v24, %v18969_v35 }
 0x93f   :  { %v17590_v22 = vadd.f32 %v6913_v50, %v6902_v42  ;;  %v6903_v11 = vadd.f32 %v6850_v23, %v18968_v25 }
 0x940   :  { %v17602_v10 = vadd.f32 %v6913_v50, %v6905_v34  ;;  %v6928_v20 = vsel %vm766_vm2, %v17593_v44, 0.0 }
 0x941   :  { %v17596_v27 = vadd.f32 %v6913_v50, %v6903_v11  ;;  %v6922_v41 = vsel %vm766_vm2, %v17590_v22, 0.0 }
 0x942   :  { %6923 = vadd.xlane.f32.xlu1 %v6922_v41  ;;  %v6931_v55 = vsel %vm766_vm2, %v17602_v10, 0.0 }
 0x943   :  { %v15316_v37 = vpop.f32.mrb[84].mxu0  ;;  %v6925_v39 = vsel %vm766_vm2, %v17596_v27, 0.0 }
 0x944   :  { %6926 = vadd.xlane.f32.xlu0 %v6925_v39  ;;  %v6863_v46 = vpop.f32.mrb[85].mxu0  ;;  %v6908_v62 = vadd.f32 %v15316_v37, %v18970_v43 }
 0x945   :  { %v15317_v13 = vpop.f32.mrb[86].mxu0  ;;  %v6906_v52 = vadd.f32 %v6863_v46, %v18971_v7 }
 0x946   :  { %6929 = vadd.xlane.f32.xlu1 %v6928_v20  ;;  %v6866_v12 = vpop.f32.mrb[87].mxu0  ;;  %v17607_v33 = vadd.f32 %v6913_v50, %v6908_v62  ;;  %v6909_v0 = vadd.f32 %v15317_v13, %v18973_v60 }
 0x947   :  { %v17612_v32 = vadd.f32 %v6913_v50, %v6906_v52  ;;  %v6907_v36 = vadd.f32 %v6866_v12, %v18972_v57  ;;  %v14370_v57 = vcombine.high %v17364_v4, %v17389_v16  ;;  %v18950_v16 = vsub.s32 4, %v16689_v9 }
 0x948   :  { %v6940_v30 = vsel %vm766_vm2, %v17607_v33, 0.0  ;;  %v17622_v59 = vadd.f32 %v6913_v50, %v6909_v0 }
 0x949   :  { %v17618_v48 = vadd.f32 %v6913_v50, %v6907_v36  ;;  %v6934_v53 = vsel %vm766_vm2, %v17612_v32, 0.0  ;;  %15318 = vmatprep.subr.bf16.mxu1 %v14370_v57  ;;  %v14371_v36 = vcombine.high %v17445_v56, %v17457_v31  ;;  %v7029_v56 = vrot.slane %v17583_v18, %v18950_v16 }
 0x94a   :  { %6932 = vadd.xlane.f32.xlu1 %v6931_v55  ;;  %v6943_v19 = vsel %vm766_vm2, %v17622_v59, 0.0  ;;  %15319 = vmatpush3.bf16.msra.mxu1 %v14370_v57  ;;  %v18949_v31 = vsub.s32 5, %v16689_v9 }
 0x94b   :  { %v6937_v26 = vsel %vm766_vm2, %v17618_v48, 0.0  ;;  %15320 = vmatprep.subr.bf16.mxu1 %v14371_v36 }
 0x94e   :  { %6941 = vadd.xlane.f32.xlu1 %v6940_v30  ;;  %15321 = vmatpush3.bf16.msra.mxu1 %v14371_v36 }
 0x952   :  { %6935 = vadd.xlane.f32.xlu1 %v6934_v53 }
 0x956   :  { %6938 = vadd.xlane.f32.xlu1 %v6937_v26 }
 0x95a   :  { %6944 = vadd.xlane.f32.xlu1 %v6943_v19 }
 0x9cf   :  { %v6924_v21 = vpop.xlane.xlu1 %6923 }
 0x9d0   :  { %v6946_v29 = vmul.f32 0.03125, %v6924_v21 }
 0x9d1   :  { %v6927_v3 = vpop.xlane.xlu0 %6926 }
 0x9d2   :  { %v17629_v40 = vsub.f32 %v17590_v22, %v6946_v29  ;;  %v6947_v63 = vmul.f32 0.03125, %v6927_v3 }
 0x9d3   :  { %v6930_v38 = vpop.xlane.xlu1 %6929 }
 0x9d4   :  { %v17632_v6 = vsub.f32 %v17596_v27, %v6947_v63  ;;  %v6948_v2 = vmul.f32 0.03125, %v6930_v38  ;;  %v6962_v54 = vmul.f32 %v17629_v40, %v17629_v40 }
 0x9d6   :  { %v17637_v14 = vsub.f32 %v17593_v44, %v6948_v2  ;;  %v6970_v8 = vsel %vm766_vm2, %v6962_v54, 0.0  ;;  %v6963_v47 = vmul.f32 %v17632_v6, %v17632_v6 }
 0x9d7   :  { %v6933_v51 = vpop.xlane.xlu1 %6932  ;;  %6971 = vadd.xlane.f32.xlu1 %v6970_v8 }
 0x9d8   :  { %v6949_v49 = vmul.f32 0.03125, %v6933_v51  ;;  %v6973_v15 = vsel %vm766_vm2, %v6963_v47, 0.0  ;;  %v6964_v28 = vmul.f32 %v17637_v14, %v17637_v14 }
 0x9d9   :  { %6974 = vadd.xlane.f32.xlu0 %v6973_v15 }
 0x9da   :  { %v17646_v61 = vsub.f32 %v17602_v10, %v6949_v49  ;;  %v6976_v58 = vsel %vm766_vm2, %v6964_v28, 0.0  ;;  %v7041_v28 = vrot.slane %v17583_v18, %v18949_v31 }
 0x9db   :  { %v6942_v50 = vpop.xlane.xlu1 %6941  ;;  %6977 = vadd.xlane.f32.xlu1 %v6976_v58 }
 0x9dc   :  { %v6965_v17 = vmul.f32 %v17646_v61, %v17646_v61  ;;  %v6952_v45 = vmul.f32 0.03125, %v6942_v50 }
 0x9de   :  { %v6979_v42 = vsel %vm766_vm2, %v6965_v17, 0.0  ;;  %v17653_v25 = vsub.f32 %v17607_v33, %v6952_v45 }
 0x9df   :  { %6980 = vadd.xlane.f32.xlu0 %v6979_v42  ;;  %v6936_v24 = vpop.xlane.xlu1 %6935 }
 0x9e0   :  { %v6950_v23 = vmul.f32 0.03125, %v6936_v24  ;;  %v6968_v46 = vmul.f32 %v17653_v25, %v17653_v25 }
 0x9e2   :  { %v17656_v11 = vsub.f32 %v17612_v32, %v6950_v23  ;;  %v6988_v12 = vsel %vm766_vm2, %v6968_v46, 0.0 }
 0x9e3   :  { %v6939_v35 = vpop.xlane.xlu1 %6938 }
 0x9e4   :  { %v6951_v34 = vmul.f32 0.03125, %v6939_v35  ;;  %v6966_v41 = vmul.f32 %v17656_v11, %v17656_v11 }
 0x9e6   :  { %v17661_v37 = vsub.f32 %v17618_v48, %v6951_v34  ;;  %v6982_v39 = vsel %vm766_vm2, %v6966_v41, 0.0 }
 0x9e7   :  { %6983 = vadd.xlane.f32.xlu1 %v6982_v39  ;;  %v6945_v43 = vpop.xlane.xlu1 %6944 }
 0x9e8   :  { %v6953_v62 = vmul.f32 0.03125, %v6945_v43  ;;  %v6967_v13 = vmul.f32 %v17661_v37, %v17661_v37 }
 0x9ea   :  { %v17669_v20 = vsub.f32 %v17622_v59, %v6953_v62  ;;  %v6985_v7 = vsel %vm766_vm2, %v6967_v13, 0.0 }
 0x9eb   :  { %6989 = vadd.xlane.f32.xlu1 %v6988_v12  ;;  %6986 = vadd.xlane.f32.xlu0 %v6985_v7 }
 0x9ec   :  { %v6969_v52 = vmul.f32 %v17669_v20, %v17669_v20 }
 0x9ee   :  { %v6991_v55 = vsel %vm766_vm2, %v6969_v52, 0.0 }
 0x9ef   :  { %6992 = vadd.xlane.f32.xlu0 %v6991_v55 }
 0xa64   :  { %v6972_v30 = vpop.xlane.xlu1 %6971 }
 0xa65   :  { %v6994_v60 = vmul.f32 0.03125, %v6972_v30 }
 0xa66   :  { %v6975_v0 = vpop.xlane.xlu0 %6974 }
 0xa67   :  { %v7002_v53 = vadd.f32 1e-06, %v6994_v60  ;;  %v6995_v26 = vmul.f32 0.03125, %v6975_v0 }
 0xa68   :  { %v6978_v19 = vpop.xlane.xlu1 %6977 }
 0xa69   :  { %16067 = vrsqrt.f32 %v7002_v53  ;;  %v7003_v21 = vadd.f32 1e-06, %v6995_v26  ;;  %v6996_v29 = vmul.f32 0.03125, %v6978_v19 }
 0xa6b   :  { %16069 = vrsqrt.f32 %v7003_v21  ;;  %v7004_v3 = vadd.f32 1e-06, %v6996_v29 }
 0xa6c   :  { %v6981_v63 = vpop.xlane.xlu0 %6980 }
 0xa6d   :  { %16071 = vrsqrt.f32 %v7004_v3  ;;  %v6997_v4 = vmul.f32 0.03125, %v6981_v63 }
 0xa6f   :  { %v7005_v38 = vadd.f32 1e-06, %v6997_v4 }
 0xa71   :  { %16073 = vrsqrt.f32 %v7005_v38 }
 0xa73   :  { %v16068_v2 = vpop.eup %16067 }
 0xa74   :  { %v6984_v54 = vpop.xlane.xlu1 %6983  ;;  %v7018_v8 = vmul.f32 %v16068_v2, %v17629_v40 }
 0xa75   :  { %v16070_v47 = vpop.eup %16069  ;;  %v6998_v51 = vmul.f32 0.03125, %v6984_v54 }
 0xa76   :  { %v7019_v49 = vmul.f32 %v16070_v47, %v17632_v6  ;;  %v7030_v15 = vmul.f32 %v7029_v56, %v7018_v8  ;;  %v15907_v47 = vld [vmem:[#allocation8 + $0x10] sm:$0xff]  }
 0xa77   :  { %v16072_v58 = vpop.eup %16071  ;;  %v7006_v50 = vadd.f32 1e-06, %v6998_v51 }
 0xa78   :  { %v7020_v17 = vmul.f32 %v16072_v58, %v17637_v14  ;;  %v6987_v45 = vpop.xlane.xlu0 %6986  ;;  %v6990_v42 = vpop.xlane.xlu1 %6989  ;;  %v7031_v24 = vmul.f32 %v7029_v56, %v7019_v49  ;;  %v7042_v40 = vadd.f32 %v7041_v28, %v7030_v15 }
 0xa79   :  { %16075 = vrsqrt.f32 %v7006_v50  ;;  %v6999_v23 = vmul.f32 0.03125, %v6987_v45  ;;  %v7000_v35 = vmul.f32 0.03125, %v6990_v42 }
 0xa7a   :  { %v7043_v34 = vadd.f32 %v7041_v28, %v7031_v24  ;;  %v7032_v46 = vmul.f32 %v7029_v56, %v7020_v17 }
 0xa7b   :  { %v16074_v41 = vpop.eup %16073  ;;  %v7007_v39 = vadd.f32 1e-06, %v6999_v23  ;;  %v7008_v6 = vadd.f32 1e-06, %v7000_v35 }
 0xa7c   :  { %v7021_v43 = vmul.f32 %v16074_v41, %v17646_v61  ;;  %v6993_v62 = vpop.xlane.xlu0 %6992  ;;  %v7050_v13 = vpack.c.bf16 %v7043_v34, %v7042_v40  ;;  %v7044_v52 = vadd.f32 %v7041_v28, %v7032_v46 }
 0xa7d   :  { %16077 = vrsqrt.f32 %v7007_v39  ;;  %v7001_v12 = vmul.f32 0.03125, %v6993_v62 }
 0xa7e   :  { %v7033_v7 = vmul.f32 %v7029_v56, %v7021_v43  ;;  %16079 = vrsqrt.f32 %v7008_v6  ;;  %15322 = vmatprep.mubr.msk.bf16.mxu1 %vm766_vm2, %v7050_v13 }
 0xa7f   :  { %v7009_v14 = vadd.f32 1e-06, %v7001_v12 }
 0xa80   :  { %v7045_v55 = vadd.f32 %v7041_v28, %v7033_v7 }
 0xa81   :  { %16081 = vrsqrt.f32 %v7009_v14 }
 0xa82   :  { %v7051_v57 = vpack.c.bf16 %v7045_v55, %v7044_v52 }
 0xa83   :  { %v16076_v36 = vpop.eup %16075 }
 0xa84   :  { %15323 = vmatmul.mubr.msk.bf16.vlgmr.msra.gmra.mrb[80].mxu1 %vm766_vm2, %v7051_v57  ;;  %v7022_v30 = vmul.f32 %v16076_v36, %v17656_v11 }
 0xa86   :  { %v7034_v53 = vmul.f32 %v7029_v56, %v7022_v30 }
 0xa87   :  { %v16078_v60 = vpop.eup %16077 }
 0xa88   :  { %v16080_v61 = vpop.eup %16079  ;;  %v7023_v0 = vmul.f32 %v16078_v60, %v17661_v37  ;;  %v7046_v29 = vadd.f32 %v7041_v28, %v7034_v53  ;;  %v15905_v37 = vld [vmem:[#allocation8] sm:$0xff]  }
 0xa89   :  { %v7024_v26 = vmul.f32 %v16080_v61, %v17653_v25  ;;  %15330 = vmatprep.subr.bf16.mxu1 %v15905_v37  ;;  %v15906_v25 = vld [vmem:[#allocation8 + $0x8] sm:$0xff]  }
 0xa8a   :  { %v7035_v19 = vmul.f32 %v7029_v56, %v7023_v0  ;;  %15331 = vmatpush3.bf16.msra.mxu1 %v15905_v37 }
 0xa8b   :  { %v16082_v21 = vpop.eup %16081  ;;  %v7036_v4 = vmul.f32 %v7029_v56, %v7024_v26  ;;  %15332 = vmatprep.subr.bf16.mxu1 %v15906_v25 }
 0xa8c   :  { %v7047_v3 = vadd.f32 %v7041_v28, %v7035_v19  ;;  %v7025_v63 = vmul.f32 %v16082_v21, %v17669_v20  ;;  %v15908_v20 = vld [vmem:[#allocation8 + $0x18] sm:$0xff]  }
 0xa8d   :  { %v7048_v54 = vadd.f32 %v7041_v28, %v7036_v4 }
 0xa8e   :  { %v7052_v38 = vpack.c.bf16 %v7047_v3, %v7046_v29  ;;  %v7037_v2 = vmul.f32 %v7029_v56, %v7025_v63  ;;  %15333 = vmatpush3.bf16.msra.mxu1 %v15906_v25  ;;  %v18948_v56 = vsub.s32 6, %v16689_v9 }
 0xa8f   :  { %15334 = vmatprep.subr.bf16.mxu1 %v15907_v47 }
 0xa90   :  { %15326 = vmatprep.mubr.msk.bf16.mxu1 %vm766_vm2, %v7052_v38  ;;  %v7049_v11 = vadd.f32 %v7041_v28, %v7037_v2  ;;  %v7057_v51 = vrot.slane %v17583_v18, %v18948_v56 }
 0xa92   :  { %v7053_v8 = vpack.c.bf16 %v7049_v11, %v7048_v54  ;;  %15335 = vmatpush3.bf16.msra.mxu1 %v15907_v47 }
 0xa93   :  { %15336 = vmatprep.subr.bf16.mxu1 %v15908_v20 }
 0xa94   :  { %15327 = vmatmul.mubr.msk.bf16.gmra.mrb[84].mxu1 %vm766_vm2, %v7053_v8 }
 0xa96   :  { %15337 = vmatpush3.bf16.msra.mxu1 %v15908_v20 }
 0xb57   :  { %v15324_v49 = vpop.f32.mrb[80].mxu1 }
 0xb58   :  { %v17704_v15 = vadd.f32 %v15324_v49, %v7057_v51  ;;  %v7112_v28 = vpop.f32.mrb[81].mxu1 }
 0xb59   :  { %v17706_v58 = vadd.f32 %v7112_v28, %v7057_v51  ;;  %v15325_v50 = vpop.f32.mrb[82].mxu1 }
 0xb5a   :  { %v7145_v17 = vmul.f32 %v17704_v15, %v17704_v15  ;;  %v17710_v45 = vadd.f32 %v15325_v50, %v7057_v51  ;;  %v7115_v42 = vpop.f32.mrb[83].mxu1 }
 0xb5b   :  { %v7143_v24 = vmul.f32 %v17706_v58, %v17706_v58  ;;  %v17714_v23 = vadd.f32 %v7115_v42, %v7057_v51 }
 0xb5c   :  { %v7153_v35 = vmul.f32 %v7145_v17, %v17704_v15  ;;  %v7146_v40 = vmul.f32 %v17710_v45, %v17710_v45 }
 0xb5d   :  { %v7151_v34 = vmul.f32 %v7143_v24, %v17706_v58  ;;  %v7144_v41 = vmul.f32 %v17714_v23, %v17714_v23 }
 0xb5e   :  { %v7161_v39 = vmul.f32 0.044715, %v7153_v35  ;;  %v7154_v6 = vmul.f32 %v7146_v40, %v17710_v45 }
 0xb5f   :  { %v7159_v46 = vmul.f32 0.044715, %v7151_v34  ;;  %v7152_v43 = vmul.f32 %v7144_v41, %v17714_v23 }
 0xb60   :  { %v7169_v62 = vadd.f32 %v7161_v39, %v17704_v15  ;;  %v7162_v13 = vmul.f32 0.044715, %v7154_v6 }
 0xb61   :  { %v7167_v12 = vadd.f32 %v7159_v46, %v17706_v58  ;;  %v7160_v7 = vmul.f32 0.044715, %v7152_v43 }
 0xb62   :  { %v7177_v14 = vmul.f32 0.7978846, %v7169_v62  ;;  %v7170_v52 = vadd.f32 %v7162_v13, %v17710_v45 }
 0xb63   :  { %v7175_v55 = vmul.f32 0.7978846, %v7167_v12  ;;  %v7168_v57 = vadd.f32 %v7160_v7, %v17714_v23 }
 0xb64   :  { %16083 = vtanh.f32 %v7177_v14  ;;  %v7178_v36 = vmul.f32 0.7978846, %v7170_v52 }
 0xb65   :  { %16085 = vtanh.f32 %v7175_v55  ;;  %v7176_v30 = vmul.f32 0.7978846, %v7168_v57 }
 0xb66   :  { %16087 = vtanh.f32 %v7178_v36 }
 0xb67   :  { %16089 = vtanh.f32 %v7176_v30  ;;  %v15328_v60 = vpop.f32.mrb[84].mxu1 }
 0xb68   :  { %v17728_v61 = vadd.f32 %v15328_v60, %v7057_v51  ;;  %v7128_v0 = vpop.f32.mrb[85].mxu1 }
 0xb69   :  { %v17730_v53 = vadd.f32 %v7128_v0, %v7057_v51  ;;  %v15329_v26 = vpop.f32.mrb[86].mxu1 }
 0xb6a   :  { %v7149_v19 = vmul.f32 %v17728_v61, %v17728_v61  ;;  %v7140_v21 = vadd.f32 %v15329_v26, %v7057_v51  ;;  %v7131_v29 = vpop.f32.mrb[87].mxu1 }
 0xb6b   :  { %v7147_v3 = vmul.f32 %v17730_v53, %v17730_v53  ;;  %v7132_v63 = vadd.f32 %v7131_v29, %v7057_v51 }
 0xb6c   :  { %v7157_v4 = vmul.f32 %v7149_v19, %v17728_v61  ;;  %v7150_v38 = vmul.f32 %v7140_v21, %v7140_v21 }
 0xb6d   :  { %v7155_v2 = vmul.f32 %v7147_v3, %v17730_v53  ;;  %v7148_v54 = vmul.f32 %v7132_v63, %v7132_v63 }
 0xb6e   :  { %v16084_v11 = vpop.eup %16083  ;;  %v7165_v8 = vmul.f32 0.044715, %v7157_v4  ;;  %v7158_v37 = vmul.f32 %v7150_v38, %v7140_v21 }
 0xb6f   :  { %v16086_v25 = vpop.eup %16085  ;;  %v7193_v47 = vadd.f32 1.0, %v16084_v11  ;;  %v7163_v20 = vmul.f32 0.044715, %v7155_v2  ;;  %v7156_v49 = vmul.f32 %v7148_v54, %v7132_v63 }
 0xb70   :  { %v16088_v28 = vpop.eup %16087  ;;  %v7191_v50 = vadd.f32 1.0, %v16086_v25  ;;  %v7173_v17 = vadd.f32 %v7165_v8, %v17728_v61  ;;  %v7166_v42 = vmul.f32 0.044715, %v7158_v37 }
 0xb71   :  { %v16090_v24 = vpop.eup %16089  ;;  %v7201_v51 = vmul.f32 0.5, %v7193_v47  ;;  %v7194_v35 = vadd.f32 1.0, %v16088_v28  ;;  %v7171_v40 = vadd.f32 %v7163_v20, %v17730_v53  ;;  %v7164_v34 = vmul.f32 0.044715, %v7156_v49 }
 0xb72   :  { %v7199_v41 = vmul.f32 0.5, %v7191_v50  ;;  %v7192_v39 = vadd.f32 1.0, %v16090_v24  ;;  %v7181_v6 = vmul.f32 0.7978846, %v7173_v17  ;;  %v7174_v46 = vadd.f32 %v7166_v42, %v7140_v21 }
 0xb73   :  { %v7202_v43 = vmul.f32 0.5, %v7194_v35  ;;  %v7179_v62 = vmul.f32 0.7978846, %v7171_v40  ;;  %v7172_v13 = vadd.f32 %v7164_v34, %v7132_v63  ;;  %v7209_v14 = vmul.f32 %v7201_v51, %v17704_v15 }
 0xb74   :  { %v7200_v12 = vmul.f32 0.5, %v7192_v39  ;;  %16091 = vtanh.f32 %v7181_v6  ;;  %v7182_v7 = vmul.f32 0.7978846, %v7174_v46  ;;  %v7207_v57 = vmul.f32 %v7199_v41, %v17706_v58 }
 0xb75   :  { %v7210_v52 = vmul.f32 %v7202_v43, %v17710_v45  ;;  %16093 = vtanh.f32 %v7179_v62  ;;  %v7180_v55 = vmul.f32 0.7978846, %v7172_v13  ;;  %v18947_v20 = vsub.s32 7, %v16689_v9 }
 0xb76   :  { %v7208_v36 = vmul.f32 %v7200_v12, %v17714_v23  ;;  %16095 = vtanh.f32 %v7182_v7 }
 0xb77   :  { %v7216_v30 = vpack.c.bf16 %v7210_v52, %v7209_v14  ;;  %16097 = vtanh.f32 %v7180_v55  ;;  %v7222_v49 = vrot.slane %v17583_v18, %v18947_v20 }
 0xb78   :  { %v7215_v60 = vpack.c.bf16 %v7208_v36, %v7207_v57 }
 0xb7a   :  { %15338 = vmatprep.mubr.msk.bf16.mxu1 %vm7247_vm6, %v7215_v60 }
 0xb7b   :  { %15339 = vmatmul.mubr.msk.bf16.vlgmr.msra.gmra.mrb[88].mxu1 %vm7247_vm6, %v7216_v30 }
 0xb7e   :  { %v16092_v0 = vpop.eup %16091 }
 0xb7f   :  { %v16094_v26 = vpop.eup %16093  ;;  %v7197_v15 = vadd.f32 1.0, %v16092_v0 }
 0xb80   :  { %v16096_v19 = vpop.eup %16095  ;;  %v7195_v45 = vadd.f32 1.0, %v16094_v26 }
 0xb81   :  { %v16098_v29 = vpop.eup %16097  ;;  %v7205_v3 = vmul.f32 0.5, %v7197_v15  ;;  %v7198_v4 = vadd.f32 1.0, %v16096_v19 }
 0xb82   :  { %v7203_v58 = vmul.f32 0.5, %v7195_v45  ;;  %v7196_v38 = vadd.f32 1.0, %v16098_v29 }
 0xb83   :  { %v7206_v23 = vmul.f32 0.5, %v7198_v4  ;;  %v7213_v54 = vmul.f32 %v7205_v3, %v17728_v61 }
 0xb84   :  { %v7204_v2 = vmul.f32 0.5, %v7196_v38  ;;  %v7211_v8 = vmul.f32 %v7203_v58, %v17730_v53 }
 0xb85   :  { %v7214_v11 = vmul.f32 %v7206_v23, %v7140_v21 }
 0xb86   :  { %v7212_v37 = vmul.f32 %v7204_v2, %v7132_v63 }
 0xb87   :  { %v7218_v25 = vpack.c.bf16 %v7214_v11, %v7213_v54 }
 0xb88   :  { %v7217_v47 = vpack.c.bf16 %v7212_v37, %v7211_v8 }
 0xb8a   :  { %15342 = vmatprep.mubr.msk.bf16.mxu1 %vm7247_vm6, %v7217_v47 }
 0xb8b   :  { %15343 = vmatmul.mubr.msk.bf16.gmra.mrb[92].mxu1 %vm7247_vm6, %v7218_v25 }
 0xc4e   :  { %v15340_v28 = vpop.f32.mrb[88].mxu1 }
 0xc4f   :  { %v7294_v50 = vpop.f32.mrb[89].mxu1  ;;  %v7303_v17 = vadd.f32 %v15340_v28, %v7222_v49 }
 0xc50   :  { %v7295_v61 = vadd.f32 %v7294_v50, %v7222_v49  ;;  %v15341_v21 = vpop.f32.mrb[90].mxu1 }
 0xc51   :  { %v7297_v42 = vpop.f32.mrb[91].mxu1  ;;  %v7306_v63 = vadd.f32 %v15341_v21, %v7222_v49  ;;  %v17758_v51 = vadd.f32 %v7303_v17, %v17593_v44 }
 0xc52   :  { %v17755_v53 = vadd.f32 %v7295_v61, %v17590_v22  ;;  %v7298_v24 = vadd.f32 %v7297_v42, %v7222_v49 }
 0xc53   :  { %v17766_v40 = vadd.f32 %v7306_v63, %v17602_v10  ;;  %v7353_v22 = vsel %vm766_vm2, %v17758_v51, 0.0 }
 0xc54   :  { %v17761_v35 = vadd.f32 %v7298_v24, %v17596_v27  ;;  %v7347_v18 = vsel %vm766_vm2, %v17755_v53, 0.0 }
 0xc55   :  { %7348 = vadd.xlane.f32.xlu1 %v7347_v18  ;;  %v7356_v44 = vsel %vm766_vm2, %v17766_v40, 0.0 }
 0xc56   :  { %v7350_v34 = vsel %vm766_vm2, %v17761_v35, 0.0 }
 0xc57   :  { %7351 = vadd.xlane.f32.xlu0 %v7350_v34 }
 0xc59   :  { %7354 = vadd.xlane.f32.xlu1 %v7353_v22 }
 0xc5b   :  { %7357 = vadd.xlane.f32.xlu0 %v7356_v44 }
 0xc5e   :  { %v15344_v27 = vpop.f32.mrb[92].mxu1 }
 0xc5f   :  { %v7310_v41 = vpop.f32.mrb[93].mxu1  ;;  %v7319_v39 = vadd.f32 %v15344_v27, %v7222_v49 }
 0xc60   :  { %v7311_v6 = vadd.f32 %v7310_v41, %v7222_v49  ;;  %v15345_v46 = vpop.f32.mrb[94].mxu1 }
 0xc61   :  { %v7313_v43 = vpop.f32.mrb[95].mxu1  ;;  %v7322_v62 = vadd.f32 %v15345_v46, %v7222_v49  ;;  %v17778_v12 = vadd.f32 %v7319_v39, %v17607_v33  ;;  %v7335_v46 = vld [vmem:[#allocation7 + $0x28] sm:$0xff] }
 0xc62   :  { %v17775_v10 = vadd.f32 %v7311_v6, %v17612_v32  ;;  %v7314_v13 = vadd.f32 %v7313_v43, %v7222_v49  ;;  %v7334_v6 = vld [vmem:[#allocation7 + $0x20] sm:$0xff] }
 0xc63   :  { %18974 = vst [vmem:[#allocation19_spill] sm:$0xff] %v17778_v12  ;;  %v17786_v52 = vadd.f32 %v7322_v62, %v17622_v59  ;;  %v7365_v32 = vsel %vm766_vm2, %v17778_v12, 0.0  ;;  %v14384_v43 = vcombine.low %v7334_v6, %v7335_v46  ;;  %v7336_v62 = vld [vmem:[#allocation7 + $0x30] sm:$0xff] }
 0xc64   :  { %v17781_v7 = vadd.f32 %v7314_v13, %v17618_v48  ;;  %v7359_v14 = vsel %vm766_vm2, %v17775_v10, 0.0  ;;  %v7337_v13 = vld [vmem:[#allocation7 + $0x38] sm:$0xff] }
 0xc65   :  { %7360 = vadd.xlane.f32.xlu1 %v7359_v14  ;;  %v7368_v33 = vsel %vm766_vm2, %v17786_v52, 0.0  ;;  %15346 = vmatprep.subr.bf16.mxu1 %v14384_v43  ;;  %v14385_v14 = vcombine.low %v7336_v62, %v7337_v13 }
 0xc66   :  { %v7362_v55 = vsel %vm766_vm2, %v17781_v7, 0.0  ;;  %15347 = vmatpush3.bf16.msra.mxu1 %v14384_v43 }
 0xc67   :  { %7363 = vadd.xlane.f32.xlu0 %v7362_v55  ;;  %15348 = vmatprep.subr.bf16.mxu1 %v14385_v14 }
 0xc69   :  { %7366 = vadd.xlane.f32.xlu1 %v7365_v32 }
 0xc6a   :  { %15349 = vmatpush3.bf16.msra.mxu1 %v14385_v14 }
 0xc6b   :  { %7369 = vadd.xlane.f32.xlu0 %v7368_v33  ;;  %15358 = vmatprep.subr.mxu1 %v18967_v1 }
 0xce2   :  { %v7349_v48 = vpop.xlane.xlu1 %7348 }
 0xce3   :  { %v7371_v57 = vmul.f32 0.03125, %v7349_v48 }
 0xce4   :  { %v7352_v36 = vpop.xlane.xlu0 %7351 }
 0xce5   :  { %v17795_v30 = vsub.f32 %v17755_v53, %v7371_v57  ;;  %v7372_v59 = vmul.f32 0.03125, %v7352_v36 }
 0xce6   :  { %v7355_v60 = vpop.xlane.xlu1 %7354 }
 0xce7   :  { %v17798_v0 = vsub.f32 %v17761_v35, %v7372_v59  ;;  %v7373_v26 = vmul.f32 0.03125, %v7355_v60  ;;  %v7387_v15 = vmul.f32 %v17795_v30, %v17795_v30 }
 0xce8   :  { %v7358_v19 = vpop.xlane.xlu0 %7357 }
 0xce9   :  { %v17803_v45 = vsub.f32 %v17758_v51, %v7373_v26  ;;  %v7374_v29 = vmul.f32 0.03125, %v7358_v19  ;;  %v7395_v3 = vsel %vm766_vm2, %v7387_v15, 0.0  ;;  %v7388_v4 = vmul.f32 %v17798_v0, %v17798_v0 }
 0xcea   :  { %7396 = vadd.xlane.f32.xlu1 %v7395_v3  ;;  %v108_v3 = vld [vmem:[#allocation11 + $0x8] sm:$0xff] }
 0xceb   :  { %v17809_v58 = vsub.f32 %v17766_v40, %v7374_v29  ;;  %v7398_v38 = vsel %vm766_vm2, %v7388_v4, 0.0  ;;  %v7389_v23 = vmul.f32 %v17803_v45, %v17803_v45  ;;  %v18975_v4 = vld [vmem:[#allocation25_spill] sm:$0xff] }
 0xcec   :  { %7399 = vadd.xlane.f32.xlu0 %v7398_v38  ;;  %v7454_v38 = vrot.slane %v108_v3, %v18975_v4 }
 0xced   :  { %v7401_v2 = vsel %vm766_vm2, %v7389_v23, 0.0  ;;  %v7390_v54 = vmul.f32 %v17809_v58, %v17809_v58 }
 0xcee   :  { %7402 = vadd.xlane.f32.xlu1 %v7401_v2  ;;  %v18976_v2 = vld [vmem:[#allocation26_spill] sm:$0xff] }
 0xcef   :  { %v7404_v11 = vsel %vm766_vm2, %v7390_v54, 0.0  ;;  %v7466_v54 = vrot.slane %v108_v3, %v18976_v2 }
 0xcf0   :  { %7405 = vadd.xlane.f32.xlu0 %v7404_v11 }
 0xcf2   :  { %v7361_v8 = vpop.xlane.xlu1 %7360 }
 0xcf3   :  { %v7375_v37 = vmul.f32 0.03125, %v7361_v8 }
 0xcf4   :  { %v7364_v25 = vpop.xlane.xlu0 %7363 }
 0xcf5   :  { %v17819_v47 = vsub.f32 %v17775_v10, %v7375_v37  ;;  %v7376_v49 = vmul.f32 0.03125, %v7364_v25 }
 0xcf6   :  { %v7367_v28 = vpop.xlane.xlu1 %7366 }
 0xcf7   :  { %v17822_v50 = vsub.f32 %v17781_v7, %v7376_v49  ;;  %v7377_v17 = vmul.f32 0.03125, %v7367_v28  ;;  %v7391_v61 = vmul.f32 %v17819_v47, %v17819_v47 }
 0xcf8   :  { %v7370_v21 = vpop.xlane.xlu0 %7369 }
 0xcf9   :  { %v17827_v42 = vsub.f32 %v17778_v12, %v7377_v17  ;;  %v7378_v63 = vmul.f32 0.03125, %v7370_v21  ;;  %v7407_v24 = vsel %vm766_vm2, %v7391_v61, 0.0  ;;  %v7392_v18 = vmul.f32 %v17822_v50, %v17822_v50 }
 0xcfa   :  { %7408 = vadd.xlane.f32.xlu1 %v7407_v24 }
 0xcfb   :  { %v17833_v34 = vsub.f32 %v17786_v52, %v7378_v63  ;;  %v7410_v22 = vsel %vm766_vm2, %v7392_v18, 0.0  ;;  %v7393_v44 = vmul.f32 %v17827_v42, %v17827_v42 }
 0xcfc   :  { %7411 = vadd.xlane.f32.xlu0 %v7410_v22 }
 0xcfd   :  { %v7413_v27 = vsel %vm766_vm2, %v7393_v44, 0.0  ;;  %v7394_v41 = vmul.f32 %v17833_v34, %v17833_v34 }
 0xcfe   :  { %7414 = vadd.xlane.f32.xlu1 %v7413_v27 }
 0xcff   :  { %v7416_v39 = vsel %vm766_vm2, %v7394_v41, 0.0 }
 0xd00   :  { %7417 = vadd.xlane.f32.xlu0 %v7416_v39 }
 0xd77   :  { %v7397_v55 = vpop.xlane.xlu1 %7396 }
 0xd78   :  { %v7419_v32 = vmul.f32 0.03125, %v7397_v55 }
 0xd79   :  { %v7400_v33 = vpop.xlane.xlu0 %7399 }
 0xd7a   :  { %v7427_v48 = vadd.f32 1e-06, %v7419_v32  ;;  %v7420_v57 = vmul.f32 0.03125, %v7400_v33 }
 0xd7b   :  { %v7403_v36 = vpop.xlane.xlu1 %7402 }
 0xd7c   :  { %16099 = vrsqrt.f32 %v7427_v48  ;;  %v7428_v59 = vadd.f32 1e-06, %v7420_v57  ;;  %v7421_v60 = vmul.f32 0.03125, %v7403_v36 }
 0xd7d   :  { %v7406_v26 = vpop.xlane.xlu0 %7405 }
 0xd7e   :  { %16101 = vrsqrt.f32 %v7428_v59  ;;  %v7429_v15 = vadd.f32 1e-06, %v7421_v60  ;;  %v7422_v19 = vmul.f32 0.03125, %v7406_v26 }
 0xd80   :  { %16103 = vrsqrt.f32 %v7429_v15  ;;  %v7430_v29 = vadd.f32 1e-06, %v7422_v19 }
 0xd82   :  { %16105 = vrsqrt.f32 %v7430_v29 }
 0xd86   :  { %v16100_v23 = vpop.eup %16099 }
 0xd87   :  { %v7409_v11 = vpop.xlane.xlu1 %7408  ;;  %v7443_v8 = vmul.f32 %v16100_v23, %v17795_v30 }
 0xd88   :  { %v16102_v37 = vpop.eup %16101  ;;  %v7423_v25 = vmul.f32 0.03125, %v7409_v11 }
 0xd89   :  { %v7412_v49 = vpop.xlane.xlu0 %7411  ;;  %v7444_v28 = vmul.f32 %v16102_v37, %v17798_v0  ;;  %v7455_v17 = vmul.f32 %v7454_v38, %v7443_v8 }
 0xd8a   :  { %v16104_v61 = vpop.eup %16103  ;;  %v7431_v21 = vadd.f32 1e-06, %v7423_v25  ;;  %v7424_v63 = vmul.f32 0.03125, %v7412_v49 }
 0xd8b   :  { %v7445_v24 = vmul.f32 %v16104_v61, %v17803_v45  ;;  %v7415_v18 = vpop.xlane.xlu1 %7414  ;;  %v7456_v22 = vmul.f32 %v7454_v38, %v7444_v28  ;;  %v7467_v44 = vadd.f32 %v7466_v54, %v7455_v17 }
 0xd8c   :  { %v16106_v27 = vpop.eup %16105  ;;  %16107 = vrsqrt.f32 %v7431_v21  ;;  %v7432_v41 = vadd.f32 1e-06, %v7424_v63  ;;  %v7425_v39 = vmul.f32 0.03125, %v7415_v18 }
 0xd8d   :  { %v7457_v6 = vmul.f32 %v7454_v38, %v7445_v24  ;;  %v7446_v30 = vmul.f32 %v16106_v27, %v17809_v58  ;;  %v7418_v46 = vpop.xlane.xlu0 %7417  ;;  %v7468_v43 = vadd.f32 %v7466_v54, %v7456_v22 }
 0xd8e   :  { %16109 = vrsqrt.f32 %v7432_v41  ;;  %v7433_v0 = vadd.f32 1e-06, %v7425_v39  ;;  %v7426_v62 = vmul.f32 0.03125, %v7418_v46 }
 0xd8f   :  { %v7469_v13 = vadd.f32 %v7466_v54, %v7457_v6  ;;  %v7458_v14 = vmul.f32 %v7454_v38, %v7446_v30  ;;  %v7475_v55 = vpack.c.bf16 %v7468_v43, %v7467_v44 }
 0xd90   :  { %16111 = vrsqrt.f32 %v7433_v0  ;;  %v7434_v45 = vadd.f32 1e-06, %v7426_v62 }
 0xd91   :  { %v7470_v32 = vadd.f32 %v7466_v54, %v7458_v14  ;;  %15350 = vmatprep.mubr.msk.bf16.mxu1 %vm766_vm2, %v7475_v55 }
 0xd92   :  { %16113 = vrsqrt.f32 %v7434_v45 }
 0xd93   :  { %v7476_v33 = vpack.c.bf16 %v7470_v32, %v7469_v13 }
 0xd95   :  { %15351 = vmatmul.mubr.msk.bf16.vlgmr.msra.gmra.mrb[96].mxu1 %vm766_vm2, %v7476_v33 }
 0xd96   :  { %v16108_v48 = vpop.eup %16107 }
 0xd97   :  { %v7447_v58 = vmul.f32 %v16108_v48, %v17819_v47 }
 0xd98   :  { %v16110_v57 = vpop.eup %16109 }
 0xd99   :  { %v7448_v36 = vmul.f32 %v16110_v57, %v17822_v50  ;;  %v7459_v59 = vmul.f32 %v7454_v38, %v7447_v58  ;;  %v18977_v50 = vld [vmem:[#allocation27_spill] sm:$0xff] }
 0xd9a   :  { %v16112_v60 = vpop.eup %16111  ;;  %v7482_v17 = vrot.slane %v108_v3, %v18977_v50 }
 0xd9b   :  { %v7460_v26 = vmul.f32 %v7454_v38, %v7448_v36  ;;  %v7471_v15 = vadd.f32 %v7466_v54, %v7459_v59  ;;  %v7449_v19 = vmul.f32 %v16112_v60, %v17827_v42 }
 0xd9c   :  { %v16114_v29 = vpop.eup %16113 }
 0xd9d   :  { %v7472_v23 = vadd.f32 %v7466_v54, %v7460_v26  ;;  %v7450_v11 = vmul.f32 %v16114_v29, %v17833_v34  ;;  %v7461_v8 = vmul.f32 %v7454_v38, %v7449_v19 }
 0xd9f   :  { %v7477_v37 = vpack.c.bf16 %v7472_v23, %v7471_v15  ;;  %v7462_v25 = vmul.f32 %v7454_v38, %v7450_v11  ;;  %v7473_v49 = vadd.f32 %v7466_v54, %v7461_v8 }
 0xda1   :  { %15354 = vmatprep.mubr.msk.bf16.mxu1 %vm766_vm2, %v7477_v37  ;;  %v7474_v47 = vadd.f32 %v7466_v54, %v7462_v25 }
 0xda3   :  { %v7478_v28 = vpack.c.bf16 %v7474_v47, %v7473_v49 }
 0xda5   :  { %15355 = vmatmul.mubr.msk.bf16.gmra.mrb[100].mxu1 %vm766_vm2, %v7478_v28 }
 0xda6   :  { %15360 = vmatprep.mubr.msk.f32.mxu1 %vm16467_vm3, %v18967_v1 }
 0xe68   :  { %v15352_v42 = vpop.f32.mrb[96].mxu1 }
 0xe69   :  { %v7541_v61 = vpop.f32.mrb[97].mxu1  ;;  %v7550_v38 = vadd.f32 %v15352_v42, %v7482_v17 }
 0xe6a   :  { %v7542_v21 = vadd.f32 %v7541_v61, %v7482_v17  ;;  %v15353_v63 = vpop.f32.mrb[98].mxu1 }
 0xe6b   :  { %v7544_v34 = vpop.f32.mrb[99].mxu1  ;;  %v7553_v18 = vadd.f32 %v15353_v63, %v7482_v17 }
 0xe6c   :  { %7572 = vxpose.xlu1.b32.start [1/8] (short) (narrow) %v7542_v21, 96  ;;  %v7545_v24 = vadd.f32 %v7544_v34, %v7482_v17 }
 0xe70   :  { %7573 = vxpose.xlu1.b32.cont [2/8] (short) (narrow) %v7545_v24, 96 }
 0xe74   :  { %7574 = vxpose.xlu1.b32.cont [3/8] (short) (narrow) %v7550_v38, 96 }
 0xe78   :  { %7575 = vxpose.xlu1.b32.cont [4/8] (short) (narrow) %v7553_v18, 96  ;;  %v15356_v54 = vpop.f32.mrb[100].mxu1 }
 0xe79   :  { %v7557_v22 = vpop.f32.mrb[101].mxu1  ;;  %v7566_v3 = vadd.f32 %v15356_v54, %v7482_v17 }
 0xe7a   :  { %v7558_v44 = vadd.f32 %v7557_v22, %v7482_v17  ;;  %v15357_v27 = vpop.f32.mrb[102].mxu1 }
 0xe7b   :  { %v7560_v41 = vpop.f32.mrb[103].mxu1  ;;  %v7569_v6 = vadd.f32 %v15357_v27, %v7482_v17 }
 0xe7c   :  { %7576 = vxpose.xlu1.b32.cont [5/8] (short) (narrow) %v7558_v44, 96  ;;  %v7561_v39 = vadd.f32 %v7560_v41, %v7482_v17 }
 0xe80   :  { %7577 = vxpose.xlu1.b32.cont [6/8] (short) (narrow) %v7561_v39, 96 }
 0xe84   :  { %7578 = vxpose.xlu1.b32.cont [7/8] (short) (narrow) %v7566_v3, 96 }
 0xe88   :  { %7579 = vxpose.xlu1.b32.end [8/8] (short) (narrow) %v7569_v6, 96 }
 0xeec   :  { %v7588_v30 = vpop.trf.xlu1 }
 0xeed   :  { %7604 = vxpose.xlu0.b32.start.end [1/1] (short) (narrow) %v7588_v30, 64 }
 0xef0   :  { %v7589_v46 = vpop.trf.xlu1 }
 0xef1   :  { %7636 = vxpose.xlu1.b32.start.end [1/1] (short) (narrow) %v7589_v46, 64 }
 0xef4   :  { %v7590_v43 = vpop.trf.xlu1 }
 0xef8   :  { %v7591_v0 = vpop.trf.xlu1 }
 0xefc   :  { %v7592_v62 = vpop.trf.xlu1 }
 0xf00   :  { %v7593_v13 = vpop.trf.xlu1 }
 0xf04   :  { %v7594_v14 = vpop.trf.xlu1 }
 0xf08   :  { %v7595_v55 = vpop.trf.xlu1 }
 0xf0a   :  { %7732 = vxpose.xlu0.b32.start.end [1/1] (short) (narrow) %v7592_v62, 64 }
 0xf0c   :  { %v17860_v45 = vpop.trf.xlu1 }
 0xf0e   :  { %7796 = vxpose.xlu1.b32.start.end [1/1] (short) (narrow) %v7594_v14, 64 }
 0xf10   :  { %v17862_v32 = vpop.trf.xlu1 }
 0xf14   :  { %v17864_v33 = vpop.trf.xlu1 }
 0xf18   :  { %v17866_v58 = vpop.trf.xlu1 }
 0xf27   :  { %7764 = vxpose.xlu0.b32.start.end [1/1] (short) (narrow) %v7593_v13, 64 }
 0xf2b   :  { %7828 = vxpose.xlu1.b32.start.end [1/1] (short) (narrow) %v7595_v55, 64 }
 0xf44   :  { %7668 = vxpose.xlu0.b32.start.end [1/1] (short) (narrow) %v7590_v43, 64 }
 0xf61   :  { %7700 = vxpose.xlu0.b32.start.end [1/1] (short) (narrow) %v7591_v0, 64 }
 0xf6d   :  { %v7620_v48 = vpop.trf.xlu0 }
 0xf71   :  { %v7621_v57 = vpop.trf.xlu0  ;;  %v7652_v59 = vpop.trf.xlu1 }
 0xf75   :  { %v7622_v36 = vpop.trf.xlu0  ;;  %v17868_v26 = vpop.trf.xlu1 }
 0xf79   :  { %v7623_v60 = vpop.trf.xlu0  ;;  %v17870_v29 = vpop.trf.xlu1 }
 0xf7d   :  { %v7624_v15 = vpop.trf.xlu0  ;;  %v17872_v11 = vpop.trf.xlu1 }
 0xf81   :  { %v7625_v19 = vpop.trf.xlu0  ;;  %v17875_v25 = vpop.trf.xlu1 }
 0xf85   :  { %v7626_v23 = vpop.trf.xlu0  ;;  %v17883_v47 = vpop.trf.xlu1 }
 0xf89   :  { %v7627_v8 = vpop.trf.xlu0  ;;  %v17894_v42 = vpop.trf.xlu1 }
 0xf8d   :  { %v7748_v37 = vpop.trf.xlu0  ;;  %v17902_v21 = vpop.trf.xlu1 }
 0xf8e   :  { %15359 = vmatpush3.xpose.msk.msra.mxu1 %vm1409_vm4, %v7748_v37 }
 0xf8f   :  { %15363 = vmatprep.subr.mxu1 %v18967_v1 }
 0xf91   :  { %15361 = vmatmul.mubr.msk.f32.vlgmr.msra.gmra.mrb[104].mxu1 %vm1409_vm4, %v7620_v48  ;;  %v7749_v49 = vpop.trf.xlu0  ;;  %v7812_v24 = vpop.trf.xlu1 }
 0xf92   :  { %15364 = vmatpush3.xpose.msk.msra.mxu1 %vm1409_vm4, %v7749_v49  ;;  %15365 = vmatprep.mubr.msk.f32.mxu1 %vm16467_vm3, %v18967_v1 }
 0xf93   :  { %15368 = vmatprep.subr.mxu1 %v18967_v1 }
 0xf95   :  { %15366 = vmatmul.mubr.msk.f32.vlgmr.msra.gmra.mrb[106].mxu1 %vm1409_vm4, %v7621_v57  ;;  %v7750_v28 = vpop.trf.xlu0  ;;  %v7813_v18 = vpop.trf.xlu1 }
 0xf96   :  { %15369 = vmatpush3.xpose.msk.msra.mxu1 %vm1409_vm4, %v7750_v28  ;;  %15370 = vmatprep.mubr.msk.f32.mxu1 %vm16467_vm3, %v18967_v1 }
 0xf97   :  { %15378 = vmatprep.subr.mxu1 %v18967_v1 }
 0xf99   :  { %15371 = vmatmul.mubr.msk.f32.vlgmr.msra.gmra.mrb[108].mxu1 %vm1409_vm4, %v7622_v36  ;;  %v7751_v17 = vpop.trf.xlu0  ;;  %v7814_v44 = vpop.trf.xlu1 }
 0xf9a   :  { %15374 = vmatpush3.xpose.msk.msra.mxu0 %vm1409_vm4, %v7751_v17  ;;  %15380 = vmatprep.mubr.msk.f32.mxu1 %vm16467_vm3, %v18967_v1 }
 0xf9b   :  { %15383 = vmatprep.subr.mxu0 %v18967_v1 }
 0xf9d   :  { %15376 = vmatmul.mubr.msk.f32.vlgmr.msra.gmra.mrb[88].mxu0 %vm1409_vm4, %v7623_v60  ;;  %v7752_v61 = vpop.trf.xlu0  ;;  %v7815_v41 = vpop.trf.xlu1 }
 0xf9e   :  { %15379 = vmatpush3.xpose.msk.msra.mxu1 %vm1409_vm4, %v7752_v61  ;;  %15385 = vmatprep.mubr.msk.f32.mxu0 %vm16467_vm3, %v18967_v1 }
 0xf9f   :  { %15388 = vmatprep.subr.mxu1 %v18967_v1 }
 0xfa1   :  { %15381 = vmatmul.mubr.msk.f32.vlgmr.msra.gmra.mrb[110].mxu1 %vm1409_vm4, %v7624_v15  ;;  %v7753_v63 = vpop.trf.xlu0  ;;  %v7816_v6 = vpop.trf.xlu1 }
 0xfa2   :  { %15384 = vmatpush3.xpose.msk.msra.mxu0 %vm1409_vm4, %v7753_v63  ;;  %15390 = vmatprep.mubr.msk.f32.mxu1 %vm16467_vm3, %v18967_v1 }
 0xfa3   :  { %15393 = vmatprep.subr.mxu0 %v18967_v1 }
 0xfa5   :  { %15386 = vmatmul.mubr.msk.f32.vlgmr.msra.gmra.mrb[90].mxu0 %vm1409_vm4, %v7625_v19  ;;  %v7754_v34 = vpop.trf.xlu0  ;;  %v7817_v46 = vpop.trf.xlu1 }
 0xfa6   :  { %15389 = vmatpush3.xpose.msk.msra.mxu1 %vm1409_vm4, %v7754_v34  ;;  %15395 = vmatprep.mubr.msk.f32.mxu0 %vm16467_vm3, %v18967_v1 }
 0xfa7   :  { %15398 = vmatprep.subr.mxu1 %v18967_v1 }
 0xfa9   :  { %15391 = vmatmul.mubr.msk.f32.vlgmr.msra.gmra.mrb[112].mxu1 %vm1409_vm4, %v7626_v23  ;;  %v7755_v38 = vpop.trf.xlu0  ;;  %v7818_v62 = vpop.trf.xlu1 }
 0xfaa   :  { %15394 = vmatpush3.xpose.msk.msra.mxu0 %vm1409_vm4, %v7755_v38  ;;  %15400 = vmatprep.mubr.msk.f32.mxu1 %vm16467_vm3, %v18967_v1 }
 0xfab   :  { %15403 = vmatprep.subr.mxu0 %v18967_v1 }
 0xfad   :  { %15396 = vmatmul.mubr.msk.f32.vlgmr.msra.gmra.mrb[92].mxu0 %vm1409_vm4, %v7627_v8  ;;  %v7780_v54 = vpop.trf.xlu0  ;;  %v7819_v14 = vpop.trf.xlu1 }
 0xfae   :  { %15399 = vmatpush3.xpose.msk.msra.mxu1 %vm1409_vm4, %v7780_v54  ;;  %15405 = vmatprep.mubr.msk.f32.mxu0 %vm16467_vm3, %v18967_v1 }
 0xfaf   :  { %15408 = vmatprep.subr.mxu1 %v18967_v1 }
 0xfb1   :  { %v7781_v22 = vpop.trf.xlu0  ;;  %15401 = vmatmul.mubr.msk.f32.vlgmr.msra.gmra.mrb[114].mxu1 %vm1409_vm4, %v7652_v59  ;;  %v7844_v57 = vpop.trf.xlu1 }
 0xfb2   :  { %15404 = vmatpush3.xpose.msk.msra.mxu0 %vm1409_vm4, %v7781_v22  ;;  %15410 = vmatprep.mubr.msk.f32.mxu1 %vm16467_vm3, %v18967_v1 }
 0xfb3   :  { %15413 = vmatprep.subr.mxu0 %v18967_v1 }
 0xfb5   :  { %v7782_v27 = vpop.trf.xlu0  ;;  %15406 = vmatmul.mubr.msk.f32.vlgmr.msra.gmra.mrb[94].mxu0 %vm1409_vm4, %v17868_v26  ;;  %v7845_v59 = vpop.trf.xlu1 }
 0xfb6   :  { %15409 = vmatpush3.xpose.msk.msra.mxu1 %vm1409_vm4, %v7782_v27  ;;  %15415 = vmatprep.mubr.msk.f32.mxu0 %vm16467_vm3, %v18967_v1 }
 0xfb7   :  { %15418 = vmatprep.subr.mxu1 %v18967_v1 }
 0xfb9   :  { %v7783_v39 = vpop.trf.xlu0  ;;  %15411 = vmatmul.mubr.msk.f32.vlgmr.msra.gmra.mrb[116].mxu1 %vm1409_vm4, %v17870_v29  ;;  %v7846_v15 = vpop.trf.xlu1 }
 0xfba   :  { %15414 = vmatpush3.xpose.msk.msra.mxu0 %vm1409_vm4, %v7783_v39  ;;  %15420 = vmatprep.mubr.msk.f32.mxu1 %vm16467_vm3, %v18967_v1 }
 0xfbb   :  { %15423 = vmatprep.subr.mxu0 %v18967_v1 }
 0xfbd   :  { %v7784_v3 = vpop.trf.xlu0  ;;  %15416 = vmatmul.mubr.msk.f32.vlgmr.msra.gmra.mrb[96].mxu0 %vm1409_vm4, %v17872_v11  ;;  %v7847_v29 = vpop.trf.xlu1 }
 0xfbe   :  { %15419 = vmatpush3.xpose.msk.msra.mxu1 %vm1409_vm4, %v7784_v3  ;;  %15425 = vmatprep.mubr.msk.f32.mxu0 %vm16467_vm3, %v18967_v1 }
 0xfbf   :  { %15428 = vmatprep.subr.mxu1 %v18967_v1 }
 0xfc1   :  { %v7785_v30 = vpop.trf.xlu0  ;;  %15421 = vmatmul.mubr.msk.f32.vlgmr.msra.gmra.mrb[118].mxu1 %vm1409_vm4, %v17875_v25  ;;  %v7848_v8 = vpop.trf.xlu1 }
 0xfc2   :  { %15424 = vmatpush3.xpose.msk.msra.mxu0 %vm1409_vm4, %v7785_v30  ;;  %15430 = vmatprep.mubr.msk.f32.mxu1 %vm16467_vm3, %v18967_v1 }
 0xfc3   :  { %15433 = vmatprep.subr.mxu0 %v18967_v1 }
 0xfc5   :  { %v7786_v43 = vpop.trf.xlu0  ;;  %15426 = vmatmul.mubr.msk.f32.vlgmr.msra.gmra.mrb[98].mxu0 %vm1409_vm4, %v17883_v47  ;;  %v7849_v25 = vpop.trf.xlu1 }
 0xfc6   :  { %15429 = vmatpush3.xpose.msk.msra.mxu1 %vm1409_vm4, %v7786_v43  ;;  %15435 = vmatprep.mubr.msk.f32.mxu0 %vm16467_vm3, %v18967_v1 }
 0xfc7   :  { %15438 = vmatprep.subr.mxu1 %v18967_v1 }
 0xfc9   :  { %v7787_v0 = vpop.trf.xlu0  ;;  %15431 = vmatmul.mubr.msk.f32.vlgmr.msra.gmra.mrb[120].mxu1 %vm1409_vm4, %v17894_v42  ;;  %v7850_v28 = vpop.trf.xlu1 }
 0xfca   :  { %15434 = vmatpush3.xpose.msk.msra.mxu0 %vm1409_vm4, %v7787_v0  ;;  %15439 = vmatpush3.xpose.msk.msra.mxu1 %vm1409_vm4, %v7812_v24  ;;  %v18978_v24 = vld [vmem:[#allocation28_spill] sm:$0xff] }
 0xfcb   :  { %15440 = vmatprep.mubr.msk.f32.mxu1 %vm16467_vm3, %v18967_v1  ;;  %15443 = vmatprep.subr.mxu0 %v18967_v1 }
 0xfcc   :  { %15448 = vmatprep.subr.mxu1 %v18967_v1 }
 0xfcd   :  { %v7684_v13 = vpop.trf.xlu0  ;;  %15436 = vmatmul.mubr.msk.f32.vlgmr.msra.gmra.mrb[100].mxu0 %vm1409_vm4, %v17902_v21  ;;  %v7851_v42 = vpop.trf.xlu1 }
 0xfce   :  { %15441 = vmatmul.mubr.msk.f32.vlgmr.msra.gmra.mrb[122].mxu1 %vm1409_vm4, %v7684_v13  ;;  %15444 = vmatpush3.xpose.msk.msra.mxu0 %vm1409_vm4, %v7813_v18 }
 0xfcf   :  { %15445 = vmatprep.mubr.msk.f32.mxu0 %vm16467_vm3, %v18967_v1  ;;  %15449 = vmatpush3.xpose.msk.msra.mxu1 %vm1409_vm4, %v7814_v44 }
 0xfd0   :  { %15450 = vmatprep.mubr.msk.f32.mxu1 %vm16467_vm3, %v18967_v1  ;;  %15453 = vmatprep.subr.mxu0 %v18967_v1 }
 0xfd1   :  { %v7685_v55 = vpop.trf.xlu0  ;;  %15458 = vmatprep.subr.mxu1 %v18967_v1 }
 0xfd2   :  { %15446 = vmatmul.mubr.msk.f32.vlgmr.msra.gmra.mrb[102].mxu0 %vm1409_vm4, %v7685_v55 }
 0xfd3   :  { %15454 = vmatpush3.xpose.msk.msra.mxu0 %vm1409_vm4, %v7815_v41  ;;  %15455 = vmatprep.mubr.msk.f32.mxu0 %vm16467_vm3, %v18967_v1 }
 0xfd4   :  { %15463 = vmatprep.subr.mxu0 %v18967_v1 }
 0xfd5   :  { %v7686_v48 = vpop.trf.xlu0 }
 0xfd6   :  { %15451 = vmatmul.mubr.msk.f32.vlgmr.msra.gmra.mrb[124].mxu1 %vm1409_vm4, %v7686_v48 }
 0xfd7   :  { %15459 = vmatpush3.xpose.msk.msra.mxu1 %vm1409_vm4, %v7816_v6  ;;  %15460 = vmatprep.mubr.msk.f32.mxu1 %vm16467_vm3, %v18967_v1 }
 0xfd8   :  { %15468 = vmatprep.subr.mxu1 %v18967_v1 }
 0xfd9   :  { %v7687_v36 = vpop.trf.xlu0 }
 0xfda   :  { %15456 = vmatmul.mubr.msk.f32.vlgmr.msra.gmra.mrb[104].mxu0 %vm1409_vm4, %v7687_v36 }
 0xfdb   :  { %15464 = vmatpush3.xpose.msk.msra.mxu0 %vm1409_vm4, %v7817_v46  ;;  %15465 = vmatprep.mubr.msk.f32.mxu0 %vm16467_vm3, %v18967_v1 }
 0xfdc   :  { %15473 = vmatprep.subr.mxu0 %v18967_v1 }
 0xfdd   :  { %v7688_v60 = vpop.trf.xlu0 }
 0xfde   :  { %15461 = vmatmul.mubr.msk.f32.vlgmr.msra.gmra.mrb[126].mxu1 %vm1409_vm4, %v7688_v60 }
 0xfdf   :  { %15469 = vmatpush3.xpose.msk.msra.mxu1 %vm1409_vm4, %v7818_v62  ;;  %15470 = vmatprep.mubr.msk.f32.mxu1 %vm16467_vm3, %v18967_v1 }
 0xfe0   :  { %15478 = vmatprep.subr.mxu1 %v18967_v1 }
 0xfe1   :  { %v7689_v26 = vpop.trf.xlu0 }
 0xfe2   :  { %15466 = vmatmul.mubr.msk.f32.vlgmr.msra.gmra.mrb[106].mxu0 %vm1409_vm4, %v7689_v26 }
 0xfe3   :  { %15474 = vmatpush3.xpose.msk.msra.mxu0 %vm1409_vm4, %v7819_v14  ;;  %15475 = vmatprep.mubr.msk.f32.mxu0 %vm16467_vm3, %v18967_v1 }
 0xfe4   :  { %15483 = vmatprep.subr.mxu0 %v18967_v1 }
 0xfe5   :  { %v7690_v19 = vpop.trf.xlu0 }
 0xfe6   :  { %15471 = vmatmul.mubr.msk.f32.vlgmr.msra.gmra.mrb[128].mxu1 %vm1409_vm4, %v7690_v19 }
 0xfe7   :  { %15479 = vmatpush3.xpose.msk.msra.mxu1 %vm1409_vm4, %v7844_v57  ;;  %15480 = vmatprep.mubr.msk.f32.mxu1 %vm16467_vm3, %v18967_v1 }
 0xfe8   :  { %15488 = vmatprep.subr.mxu1 %v18967_v1 }
 0xfe9   :  { %v7691_v23 = vpop.trf.xlu0 }
 0xfea   :  { %15476 = vmatmul.mubr.msk.f32.vlgmr.msra.gmra.mrb[108].mxu0 %vm1409_vm4, %v7691_v23 }
 0xfeb   :  { %15484 = vmatpush3.xpose.msk.msra.mxu0 %vm1409_vm4, %v7845_v59  ;;  %15485 = vmatprep.mubr.msk.f32.mxu0 %vm16467_vm3, %v18967_v1 }
 0xfec   :  { %15493 = vmatprep.subr.mxu0 %v18967_v1 }
 0xfed   :  { %v7716_v11 = vpop.trf.xlu0 }
 0xfee   :  { %15481 = vmatmul.mubr.msk.f32.vlgmr.msra.gmra.mrb[130].mxu1 %vm1409_vm4, %v7716_v11 }
 0xfef   :  { %15489 = vmatpush3.xpose.msk.msra.mxu1 %vm1409_vm4, %v7846_v15  ;;  %15490 = vmatprep.mubr.msk.f32.mxu1 %vm16467_vm3, %v18967_v1 }
 0xff0   :  { %15498 = vmatprep.subr.mxu1 %v18967_v1 }
 0xff1   :  { %v7717_v37 = vpop.trf.xlu0 }
 0xff2   :  { %15486 = vmatmul.mubr.msk.f32.vlgmr.msra.gmra.mrb[110].mxu0 %vm1409_vm4, %v7717_v37 }
 0xff3   :  { %15494 = vmatpush3.xpose.msk.msra.mxu0 %vm1409_vm4, %v7847_v29  ;;  %15495 = vmatprep.mubr.msk.f32.mxu0 %vm16467_vm3, %v18967_v1 }
 0xff4   :  { %15503 = vmatprep.subr.mxu0 %v18967_v1 }
 0xff5   :  { %v7718_v49 = vpop.trf.xlu0 }
 0xff6   :  { %15491 = vmatmul.mubr.msk.f32.vlgmr.msra.gmra.mrb[132].mxu1 %vm1409_vm4, %v7718_v49 }
 0xff7   :  { %15499 = vmatpush3.xpose.msk.msra.mxu1 %vm1409_vm4, %v7848_v8  ;;  %15500 = vmatprep.mubr.msk.f32.mxu1 %vm16467_vm3, %v18967_v1 }
 0xff8   :  { %15508 = vmatprep.subr.mxu1 %v18967_v1 }
 0xff9   :  { %v7719_v47 = vpop.trf.xlu0 }
 0xffa   :  { %15496 = vmatmul.mubr.msk.f32.vlgmr.msra.gmra.mrb[112].mxu0 %vm1409_vm4, %v7719_v47 }
 0xffb   :  { %15504 = vmatpush3.xpose.msk.msra.mxu0 %vm1409_vm4, %v7849_v25  ;;  %15505 = vmatprep.mubr.msk.f32.mxu0 %vm16467_vm3, %v18967_v1 }
 0xffc   :  { %15513 = vmatprep.subr.mxu0 %v18967_v1 }
 0xffd   :  { %v7720_v17 = vpop.trf.xlu0 }
 0xffe   :  { %15501 = vmatmul.mubr.msk.f32.vlgmr.msra.gmra.mrb[134].mxu1 %vm1409_vm4, %v7720_v17 }
 0xfff   :  { %15509 = vmatpush3.xpose.msk.msra.mxu1 %vm1409_vm4, %v7850_v28  ;;  %15510 = vmatprep.mubr.msk.f32.mxu1 %vm16467_vm3, %v18967_v1 }
0x1000   :  { %15518 = vmatprep.subr.mxu1 %v18967_v1 }
0x1001   :  { %v7721_v61 = vpop.trf.xlu0 }
0x1002   :  { %15506 = vmatmul.mubr.msk.f32.vlgmr.msra.gmra.mrb[114].mxu0 %vm1409_vm4, %v7721_v61 }
0x1003   :  { %15514 = vmatpush3.xpose.msk.msra.mxu0 %vm1409_vm4, %v7851_v42  ;;  %15515 = vmatprep.mubr.msk.f32.mxu0 %vm16467_vm3, %v18967_v1 }
0x1004   :  { %15523 = vmatprep.subr.mxu0 %v18967_v1 }
0x1005   :  { %v7722_v21 = vpop.trf.xlu0 }
0x1006   :  { %15511 = vmatmul.mubr.msk.f32.vlgmr.msra.gmra.mrb[136].mxu1 %vm1409_vm4, %v7722_v21 }
0x1007   :  { %15520 = vmatprep.mubr.msk.f32.mxu1 %vm16467_vm3, %v18967_v1 }
0x1009   :  { %v7723_v63 = vpop.trf.xlu0 }
0x100a   :  { %15516 = vmatmul.mubr.msk.f32.vlgmr.msra.gmra.mrb[116].mxu0 %vm1409_vm4, %v7723_v63 }
0x100b   :  { %15525 = vmatprep.mubr.msk.f32.mxu0 %vm16467_vm3, %v18967_v1 }
0x1064   :  { %v8060_v34 = vpop.f32.mrb[104].mxu1 }
0x1065   :  { %v18050_v38 = vadd.f32 %v8060_v34, %v18978_v24  ;;  %v15362_v18 = vpop.f32.mrb[105].mxu1 }
0x1067   :  { %v10420_v54 = vsel %vm1409_vm4, %v18050_v38, -inf }
0x1068   :  { %v8136_v22 = vpop.f32.mrb[106].mxu1  ;;  %10421 = vmax.xlane.f32.xlu1 %v10420_v54 }
0x1069   :  { %v18055_v44 = vadd.f32 %v8136_v22, %v18978_v24  ;;  %v15367_v27 = vpop.f32.mrb[107].mxu1 }
0x106b   :  { %v10423_v41 = vsel %vm1409_vm4, %v18055_v44, -inf }
0x106c   :  { %v8212_v39 = vpop.f32.mrb[108].mxu1  ;;  %10424 = vmax.xlane.f32.xlu0 %v10423_v41 }
0x106d   :  { %v18060_v3 = vadd.f32 %v8212_v39, %v18978_v24  ;;  %v15372_v6 = vpop.f32.mrb[109].mxu1 }
0x106f   :  { %v10426_v30 = vsel %vm1409_vm4, %v18060_v3, -inf }
0x1070   :  { %v8288_v46 = vpop.f32.mrb[88].mxu0  ;;  %10427 = vmax.xlane.f32.xlu1 %v10426_v30 }
0x1071   :  { %v18065_v43 = vadd.f32 %v8288_v46, %v18978_v24  ;;  %v15377_v0 = vpop.f32.mrb[89].mxu0 }
0x1073   :  { %v10429_v62 = vsel %vm1409_vm4, %v18065_v43, -inf }
0x1074   :  { %v8364_v13 = vpop.f32.mrb[110].mxu1  ;;  %10430 = vmax.xlane.f32.xlu1 %v10429_v62 }
0x1075   :  { %v18070_v14 = vadd.f32 %v8364_v13, %v18978_v24  ;;  %v15382_v55 = vpop.f32.mrb[111].mxu1 }
0x1077   :  { %v10432_v48 = vsel %vm1409_vm4, %v18070_v14, -inf }
0x1078   :  { %v8440_v57 = vpop.f32.mrb[90].mxu0  ;;  %10433 = vmax.xlane.f32.xlu1 %v10432_v48 }
0x1079   :  { %v18075_v36 = vadd.f32 %v8440_v57, %v18978_v24  ;;  %v15387_v59 = vpop.f32.mrb[91].mxu0 }
0x107b   :  { %v10435_v60 = vsel %vm1409_vm4, %v18075_v36, -inf }
0x107c   :  { %v8516_v26 = vpop.f32.mrb[112].mxu1  ;;  %10436 = vmax.xlane.f32.xlu1 %v10435_v60 }
0x107d   :  { %v18080_v15 = vadd.f32 %v8516_v26, %v18978_v24  ;;  %v15392_v19 = vpop.f32.mrb[113].mxu1 }
0x107f   :  { %v10438_v29 = vsel %vm1409_vm4, %v18080_v15, -inf }
0x1080   :  { %v8592_v23 = vpop.f32.mrb[92].mxu0  ;;  %10439 = vmax.xlane.f32.xlu0 %v10438_v29 }
0x1081   :  { %v18085_v11 = vadd.f32 %v8592_v23, %v18978_v24  ;;  %v15397_v8 = vpop.f32.mrb[93].mxu0 }
0x1083   :  { %v10441_v37 = vsel %vm1409_vm4, %v18085_v11, -inf }
0x1084   :  { %10442 = vmax.xlane.f32.xlu1 %v10441_v37  ;;  %v8668_v25 = vpop.f32.mrb[114].mxu1 }
0x1085   :  { %v18090_v49 = vadd.f32 %v8668_v25, %v18978_v24  ;;  %v15402_v47 = vpop.f32.mrb[115].mxu1 }
0x1087   :  { %v10444_v28 = vsel %vm1409_vm4, %v18090_v49, -inf }
0x1088   :  { %10445 = vmax.xlane.f32.xlu0 %v10444_v28  ;;  %v8744_v17 = vpop.f32.mrb[94].mxu0 }
0x1089   :  { %v18095_v42 = vadd.f32 %v8744_v17, %v18978_v24  ;;  %v15407_v61 = vpop.f32.mrb[95].mxu0 }
0x108b   :  { %v10447_v21 = vsel %vm1409_vm4, %v18095_v42, -inf }
0x108c   :  { %10448 = vmax.xlane.f32.xlu1 %v10447_v21  ;;  %v8820_v63 = vpop.f32.mrb[116].mxu1 }
0x108d   :  { %v18100_v34 = vadd.f32 %v8820_v63, %v18978_v24  ;;  %v15412_v18 = vpop.f32.mrb[117].mxu1 }
0x108f   :  { %v10450_v54 = vsel %vm1409_vm4, %v18100_v34, -inf }
0x1090   :  { %10451 = vmax.xlane.f32.xlu0 %v10450_v54  ;;  %v8896_v22 = vpop.f32.mrb[96].mxu0 }
0x1091   :  { %v18105_v27 = vadd.f32 %v8896_v22, %v18978_v24  ;;  %v15417_v41 = vpop.f32.mrb[97].mxu0 }
0x1093   :  { %v10453_v39 = vsel %vm1409_vm4, %v18105_v27, -inf }
0x1094   :  { %10454 = vmax.xlane.f32.xlu1 %v10453_v39  ;;  %v8972_v6 = vpop.f32.mrb[118].mxu1 }
0x1095   :  { %v18110_v30 = vadd.f32 %v8972_v6, %v18978_v24  ;;  %v15422_v46 = vpop.f32.mrb[119].mxu1 }
0x1097   :  { %v10456_v0 = vsel %vm1409_vm4, %v18110_v30, -inf }
0x1098   :  { %10457 = vmax.xlane.f32.xlu0 %v10456_v0  ;;  %v9048_v62 = vpop.f32.mrb[98].mxu0 }
0x1099   :  { %v18115_v13 = vadd.f32 %v9048_v62, %v18978_v24  ;;  %v15427_v55 = vpop.f32.mrb[99].mxu0 }
0x109b   :  { %v10459_v48 = vsel %vm1409_vm4, %v18115_v13, -inf }
0x109c   :  { %10460 = vmax.xlane.f32.xlu1 %v10459_v48  ;;  %v9124_v57 = vpop.f32.mrb[120].mxu1 }
0x109d   :  { %v18120_v59 = vadd.f32 %v9124_v57, %v18978_v24  ;;  %v15432_v60 = vpop.f32.mrb[121].mxu1 }
0x109f   :  { %v10462_v26 = vsel %vm1409_vm4, %v18120_v59, -inf }
0x10a0   :  { %10463 = vmax.xlane.f32.xlu0 %v10462_v26  ;;  %v9200_v19 = vpop.f32.mrb[100].mxu0 }
0x10a1   :  { %v18125_v29 = vadd.f32 %v9200_v19, %v18978_v24  ;;  %v15437_v23 = vpop.f32.mrb[101].mxu0  ;;  %v9276_v8 = vpop.f32.mrb[122].mxu1 }
0x10a2   :  { %v18128_v37 = vadd.f32 %v9276_v8, %v18978_v24  ;;  %v15442_v25 = vpop.f32.mrb[123].mxu1 }
0x10a3   :  { %v10465_v47 = vsel %vm1409_vm4, %v18125_v29, -inf }
0x10a4   :  { %10466 = vmax.xlane.f32.xlu1 %v10465_v47  ;;  %v10468_v28 = vsel %vm1409_vm4, %v18128_v37, -inf }
0x10a5   :  { %10469 = vmax.xlane.f32.xlu0 %v10468_v28  ;;  %v9352_v17 = vpop.f32.mrb[102].mxu0 }
0x10a6   :  { %v18135_v61 = vadd.f32 %v9352_v17, %v18978_v24  ;;  %v15447_v21 = vpop.f32.mrb[103].mxu0 }
0x10a8   :  { %v10471_v63 = vsel %vm1409_vm4, %v18135_v61, -inf }
0x10a9   :  { %10472 = vmax.xlane.f32.xlu1 %v10471_v63  ;;  %v9428_v18 = vpop.f32.mrb[124].mxu1 }
0x10aa   :  { %v18140_v54 = vadd.f32 %v9428_v18, %v18978_v24  ;;  %v15452_v22 = vpop.f32.mrb[125].mxu1 }
0x10ac   :  { %v10474_v41 = vsel %vm1409_vm4, %v18140_v54, -inf }
0x10ad   :  { %10475 = vmax.xlane.f32.xlu0 %v10474_v41  ;;  %v9504_v39 = vpop.f32.mrb[104].mxu0 }
0x10ae   :  { %v18145_v6 = vadd.f32 %v9504_v39, %v18978_v24  ;;  %v15457_v46 = vpop.f32.mrb[105].mxu0 }
0x10b0   :  { %v10477_v0 = vsel %vm1409_vm4, %v18145_v6, -inf }
0x10b1   :  { %10478 = vmax.xlane.f32.xlu1 %v10477_v0  ;;  %v9580_v62 = vpop.f32.mrb[126].mxu1 }
0x10b2   :  { %v18150_v55 = vadd.f32 %v9580_v62, %v18978_v24  ;;  %v15462_v48 = vpop.f32.mrb[127].mxu1 }
0x10b4   :  { %v10480_v57 = vsel %vm1409_vm4, %v18150_v55, -inf }
0x10b5   :  { %10481 = vmax.xlane.f32.xlu0 %v10480_v57  ;;  %v9656_v60 = vpop.f32.mrb[106].mxu0 }
0x10b6   :  { %v18155_v26 = vadd.f32 %v9656_v60, %v18978_v24  ;;  %v15467_v19 = vpop.f32.mrb[107].mxu0 }
0x10b8   :  { %v10483_v23 = vsel %vm1409_vm4, %v18155_v26, -inf }
0x10b9   :  { %10484 = vmax.xlane.f32.xlu1 %v10483_v23  ;;  %v9732_v8 = vpop.f32.mrb[128].mxu1 }
0x10ba   :  { %v18160_v25 = vadd.f32 %v9732_v8, %v18978_v24  ;;  %v15472_v47 = vpop.f32.mrb[129].mxu1 }
0x10bc   :  { %v10486_v28 = vsel %vm1409_vm4, %v18160_v25, -inf }
0x10bd   :  { %10487 = vmax.xlane.f32.xlu0 %v10486_v28  ;;  %v9808_v17 = vpop.f32.mrb[108].mxu0 }
0x10be   :  { %v18165_v21 = vadd.f32 %v9808_v17, %v18978_v24  ;;  %v15477_v63 = vpop.f32.mrb[109].mxu0 }
0x10c0   :  { %v10489_v18 = vsel %vm1409_vm4, %v18165_v21, -inf }
0x10c1   :  { %10490 = vmax.xlane.f32.xlu1 %v10489_v18  ;;  %v9884_v22 = vpop.f32.mrb[130].mxu1 }
0x10c2   :  { %v18170_v41 = vadd.f32 %v9884_v22, %v18978_v24  ;;  %v15482_v39 = vpop.f32.mrb[131].mxu1 }
0x10c4   :  { %v10492_v46 = vsel %vm1409_vm4, %v18170_v41, -inf }
0x10c5   :  { %10493 = vmax.xlane.f32.xlu0 %v10492_v46  ;;  %v9960_v0 = vpop.f32.mrb[110].mxu0 }
0x10c6   :  { %v18175_v62 = vadd.f32 %v9960_v0, %v18978_v24  ;;  %v15487_v48 = vpop.f32.mrb[111].mxu0 }
0x10c8   :  { %v10495_v57 = vsel %vm1409_vm4, %v18175_v62, -inf }
0x10c9   :  { %10496 = vmax.xlane.f32.xlu1 %v10495_v57  ;;  %v10036_v60 = vpop.f32.mrb[132].mxu1 }
0x10ca   :  { %v18180_v19 = vadd.f32 %v10036_v60, %v18978_v24  ;;  %v15492_v23 = vpop.f32.mrb[133].mxu1 }
0x10cc   :  { %v10498_v8 = vsel %vm1409_vm4, %v18180_v19, -inf }
0x10cd   :  { %10499 = vmax.xlane.f32.xlu0 %v10498_v8  ;;  %v10112_v47 = vpop.f32.mrb[112].mxu0 }
0x10ce   :  { %v18185_v28 = vadd.f32 %v10112_v47, %v18978_v24  ;;  %v15497_v17 = vpop.f32.mrb[113].mxu0 }
0x10d0   :  { %v10501_v63 = vsel %vm1409_vm4, %v18185_v28, -inf }
0x10d1   :  { %10502 = vmax.xlane.f32.xlu1 %v10501_v63  ;;  %v10188_v18 = vpop.f32.mrb[134].mxu1 }
0x10d2   :  { %v18190_v22 = vadd.f32 %v10188_v18, %v18978_v24  ;;  %v15502_v39 = vpop.f32.mrb[135].mxu1 }
0x10d4   :  { %v10504_v46 = vsel %vm1409_vm4, %v18190_v22, -inf }
0x10d5   :  { %10505 = vmax.xlane.f32.xlu0 %v10504_v46  ;;  %v10264_v0 = vpop.f32.mrb[114].mxu0 }
0x10d6   :  { %v18195_v48 = vadd.f32 %v10264_v0, %v18978_v24  ;;  %v15507_v57 = vpop.f32.mrb[115].mxu0 }
0x10d8   :  { %v10507_v60 = vsel %vm1409_vm4, %v18195_v48, -inf }
0x10d9   :  { %10508 = vmax.xlane.f32.xlu1 %v10507_v60  ;;  %v10340_v23 = vpop.f32.mrb[136].mxu1 }
0x10da   :  { %v18200_v8 = vadd.f32 %v10340_v23, %v18978_v24  ;;  %v15512_v47 = vpop.f32.mrb[137].mxu1 }
0x10dc   :  { %v10510_v17 = vsel %vm1409_vm4, %v18200_v8, -inf }
0x10dd   :  { %10511 = vmax.xlane.f32.xlu0 %v10510_v17  ;;  %v10416_v63 = vpop.f32.mrb[116].mxu0 }
0x10de   :  { %v18205_v18 = vadd.f32 %v10416_v63, %v18978_v24  ;;  %v15517_v39 = vpop.f32.mrb[117].mxu0 }
0x10e0   :  { %v10513_v46 = vsel %vm1409_vm4, %v18205_v18, -inf }
0x10e1   :  { %10514 = vmax.xlane.f32.xlu1 %v10513_v46 }
0x10f5   :  { %v18209_v0 = vpop.xlane.xlu1 %10421 }
0x10f9   :  { %v10425_v57 = vpop.xlane.xlu0 %10424 }
0x10fa   :  { %v10517_v60 = vsub.f32 %v18055_v44, %v10425_v57 }
0x10fc   :  { %v10550_v23 = vmul.f32 1.442695, %v10517_v60 }
0x10fd   :  { %v18212_v47 = vpop.xlane.xlu1 %10427 }
0x10fe   :  { %16115 = vpow2.f32 %v10550_v23 }
0x1101   :  { %v10431_v20 = vpop.xlane.xlu1 %10430 }
0x1102   :  { %v10519_v17 = vsub.f32 %v18065_v43, %v10431_v20 }
0x1104   :  { %v10554_v56 = vmul.f32 1.442695, %v10519_v17 }
0x1105   :  { %v18215_v24 = vpop.xlane.xlu1 %10433 }
0x1106   :  { %16117 = vpow2.f32 %v10554_v56 }
0x1108   :  { %v18217_v63 = vpop.eup %16115 }
0x1109   :  { %v10437_v39 = vpop.xlane.xlu1 %10436  ;;  %v10615_v46 = vsel %vm1409_vm4, %v18217_v63, 0.0 }
0x110a   :  { %v10521_v31 = vsub.f32 %v18075_v36, %v10437_v39  ;;  %7860 = vxpose.xlu0.b32.start.end [1/1] (short) (narrow) %v17860_v45, 64  ;;  %10616 = vadd.xlane.f32.xlu1 %v10615_v46 }
0x110c   :  { %v10558_v44 = vmul.f32 1.442695, %v10521_v31 }
0x110e   :  { %16119 = vpow2.f32 %v10558_v44 }
0x1110   :  { %v18223_v57 = vpop.eup %16117 }
0x1111   :  { %v10443_v20 = vpop.xlane.xlu1 %10442  ;;  %v10621_v43 = vsel %vm1409_vm4, %v18223_v57, 0.0 }
0x1112   :  { %v10523_v56 = vsub.f32 %v18085_v11, %v10443_v20  ;;  %10622 = vadd.xlane.f32.xlu1 %v10621_v43 }
0x1114   :  { %v10562_v60 = vmul.f32 1.442695, %v10523_v56 }
0x1116   :  { %16121 = vpow2.f32 %v10562_v60 }
0x1118   :  { %v18228_v23 = vpop.eup %16119 }
0x1119   :  { %v10449_v17 = vpop.xlane.xlu1 %10448  ;;  %v10627_v45 = vsel %vm1409_vm4, %v18228_v23, 0.0 }
0x111a   :  { %v10525_v31 = vsub.f32 %v18095_v42, %v10449_v17  ;;  %10628 = vadd.xlane.f32.xlu1 %v10627_v45  ;;  %v10440_v17 = vpop.xlane.xlu0 %10439 }
0x111c   :  { %v10566_v36 = vmul.f32 1.442695, %v10525_v31 }
0x111e   :  { %16123 = vpow2.f32 %v10566_v36  ;;  %v10446_v36 = vpop.xlane.xlu0 %10445 }
0x1120   :  { %v18233_v39 = vpop.eup %16121 }
0x1121   :  { %v10455_v46 = vpop.xlane.xlu1 %10454  ;;  %v10633_v11 = vsel %vm1409_vm4, %v18233_v39, 0.0 }
0x1122   :  { %v10527_v44 = vsub.f32 %v18105_v27, %v10455_v46  ;;  %10634 = vadd.xlane.f32.xlu1 %v10633_v11  ;;  %v10452_v11 = vpop.xlane.xlu0 %10451 }
0x1124   :  { %v10570_v20 = vmul.f32 1.442695, %v10527_v44 }
0x1126   :  { %16125 = vpow2.f32 %v10570_v20 }
0x1128   :  { %v18238_v43 = vpop.eup %16123 }
0x1129   :  { %v10461_v56 = vpop.xlane.xlu1 %10460  ;;  %v10639_v42 = vsel %vm1409_vm4, %v18238_v43, 0.0 }
0x112a   :  { %v10529_v60 = vsub.f32 %v18115_v13, %v10461_v56  ;;  %10640 = vadd.xlane.f32.xlu1 %v10639_v42  ;;  %v18251_v42 = vpop.xlane.xlu0 %10457 }
0x112c   :  { %v10574_v45 = vmul.f32 1.442695, %v10529_v60 }
0x112e   :  { %16127 = vpow2.f32 %v10574_v45  ;;  %v18255_v5 = vpop.xlane.xlu0 %10463 }
0x1130   :  { %v18243_v31 = vpop.eup %16125 }
0x1131   :  { %v10467_v16 = vpop.xlane.xlu1 %10466  ;;  %v10645_v27 = vsel %vm1409_vm4, %v18243_v31, 0.0 }
0x1132   :  { %v10531_v46 = vsub.f32 %v18125_v29, %v10467_v16  ;;  %10646 = vadd.xlane.f32.xlu1 %v10645_v27  ;;  %v10516_v16 = vsub.f32 %v18050_v38, %v18209_v0 }
0x1134   :  { %v10578_v44 = vmul.f32 1.442695, %v10531_v46 }
0x1136   :  { %16129 = vpow2.f32 %v10578_v44  ;;  %v10473_v20 = vpop.xlane.xlu1 %10472  ;;  %v10518_v44 = vsub.f32 %v18060_v3, %v18212_v47 }
0x1137   :  { %v10533_v13 = vsub.f32 %v18135_v61, %v10473_v20  ;;  %v10548_v61 = vmul.f32 1.442695, %v10516_v16 }
0x1138   :  { %v18249_v56 = vpop.eup %16127  ;;  %v10552_v38 = vmul.f32 1.442695, %v10518_v44 }
0x1139   :  { %v10582_v60 = vmul.f32 1.442695, %v10533_v13  ;;  %v10651_v45 = vsel %vm1409_vm4, %v18249_v56, 0.0 }
0x113a   :  { %10652 = vadd.xlane.f32.xlu1 %v10651_v45  ;;  %v18266_v45 = vpop.xlane.xlu0 %10469 }
0x113b   :  { %16131 = vpow2.f32 %v10582_v60 }
0x113e   :  { %v10479_v29 = vpop.xlane.xlu1 %10478  ;;  %v18272_v0 = vpop.xlane.xlu0 %10475 }
0x113f   :  { %v10535_v27 = vsub.f32 %v18145_v6, %v10479_v29  ;;  %v10520_v6 = vsub.f32 %v18070_v14, %v18215_v24  ;;  %v10524_v24 = vsub.f32 %v18090_v49, %v10446_v36 }
0x1140   :  { %v18260_v46 = vpop.eup %16129 }
0x1141   :  { %v10586_v20 = vmul.f32 1.442695, %v10535_v27  ;;  %v10657_v13 = vsel %vm1409_vm4, %v18260_v46, 0.0  ;;  %v10556_v29 = vmul.f32 1.442695, %v10520_v6  ;;  %v10522_v27 = vsub.f32 %v18080_v15, %v10440_v17 }
0x1142   :  { %10658 = vadd.xlane.f32.xlu1 %v10657_v13  ;;  %v18278_v13 = vpop.xlane.xlu0 %10481  ;;  %v10564_v17 = vmul.f32 1.442695, %v10524_v24  ;;  %v10526_v6 = vsub.f32 %v18100_v34, %v10452_v11 }
0x1143   :  { %16133 = vpow2.f32 %v10586_v20  ;;  %v10560_v14 = vmul.f32 1.442695, %v10522_v27 }
0x1144   :  { %16135 = vpow2.f32 %v10548_v61 }
0x1145   :  { %v18268_v60 = vpop.eup %16131  ;;  %16137 = vpow2.f32 %v10552_v38 }
0x1146   :  { %v10485_v16 = vpop.xlane.xlu1 %10484  ;;  %v10663_v3 = vsel %vm1409_vm4, %v18268_v60, 0.0 }
0x1147   :  { %v10537_v47 = vsub.f32 %v18155_v26, %v10485_v16  ;;  %10664 = vadd.xlane.f32.xlu1 %v10663_v3 }
0x1149   :  { %v10590_v20 = vmul.f32 1.442695, %v10537_v47 }
0x114a   :  { %v18283_v44 = vpop.xlane.xlu0 %10487 }
0x114b   :  { %16139 = vpow2.f32 %v10590_v20 }
0x114c   :  { %16141 = vpow2.f32 %v10556_v29 }
0x114d   :  { %v18280_v61 = vpop.eup %16133  ;;  %16143 = vpow2.f32 %v10560_v14 }
0x114e   :  { %v10491_v50 = vpop.xlane.xlu1 %10490  ;;  %v10669_v26 = vsel %vm1409_vm4, %v18280_v61, 0.0  ;;  %v18287_v38 = vpop.eup %16135 }
0x114f   :  { %v10539_v15 = vsub.f32 %v18165_v21, %v10491_v50  ;;  %10670 = vadd.xlane.f32.xlu1 %v10669_v26  ;;  %v10612_v49 = vsel %vm1409_vm4, %v18287_v38, 0.0  ;;  %v18293_v36 = vpop.eup %16137  ;;  %v10568_v50 = vmul.f32 1.442695, %v10526_v6  ;;  %v10528_v21 = vsub.f32 %v18110_v30, %v18251_v42 }
0x1150   :  { %v10618_v11 = vsel %vm1409_vm4, %v18293_v36, 0.0  ;;  %v10530_v30 = vsub.f32 %v18120_v59, %v18255_v5 }
0x1151   :  { %v10594_v16 = vmul.f32 1.442695, %v10539_v15  ;;  %v10572_v24 = vmul.f32 1.442695, %v10528_v21 }
0x1152   :  { %v10494_v3 = vpop.xlane.xlu0 %10493 }
0x1153   :  { %16145 = vpow2.f32 %v10594_v16  ;;  %v10540_v47 = vsub.f32 %v18170_v41, %v10494_v3  ;;  %10613 = vadd.xlane.f32.xlu0 %v10612_v49  ;;  %v10532_v3 = vsub.f32 %v18128_v37, %v18266_v45  ;;  %v10534_v37 = vsub.f32 %v18140_v54, %v18272_v0 }
0x1154   :  { %16147 = vpow2.f32 %v10564_v17  ;;  %v10536_v54 = vsub.f32 %v18150_v55, %v18278_v13  ;;  %v10538_v55 = vsub.f32 %v18160_v25, %v18283_v44 }
0x1155   :  { %v18296_v29 = vpop.eup %16139  ;;  %v10596_v27 = vmul.f32 1.442695, %v10540_v47 }
0x1156   :  { %v10497_v34 = vpop.xlane.xlu1 %10496  ;;  %v10675_v20 = vsel %vm1409_vm4, %v18296_v29, 0.0  ;;  %v18304_v14 = vpop.eup %16141 }
0x1157   :  { %16149 = vpow2.f32 %v10596_v27  ;;  %v10541_v41 = vsub.f32 %v18175_v62, %v10497_v34  ;;  %10619 = vadd.xlane.f32.xlu0 %v10618_v11  ;;  %10676 = vadd.xlane.f32.xlu1 %v10675_v20  ;;  %v10624_v15 = vsel %vm1409_vm4, %v18304_v14, 0.0  ;;  %v18311_v17 = vpop.eup %16143  ;;  %v10576_v62 = vmul.f32 1.442695, %v10530_v30 }
0x1158   :  { %16151 = vpow2.f32 %v10568_v50  ;;  %v10630_v59 = vsel %vm1409_vm4, %v18311_v17, 0.0  ;;  %v10580_v27 = vmul.f32 1.442695, %v10532_v3  ;;  %v10584_v30 = vmul.f32 1.442695, %v10534_v37 }
0x1159   :  { %v10598_v42 = vmul.f32 1.442695, %v10541_v41  ;;  %v10588_v3 = vmul.f32 1.442695, %v10536_v54 }
0x115a   :  { %v10500_v26 = vpop.xlane.xlu0 %10499 }
0x115b   :  { %16153 = vpow2.f32 %v10598_v42  ;;  %v10542_v6 = vsub.f32 %v18180_v19, %v10500_v26  ;;  %10625 = vadd.xlane.f32.xlu0 %v10624_v15 }
0x115c   :  { %16155 = vpow2.f32 %v10572_v24 }
0x115d   :  { %v18314_v16 = vpop.eup %16145  ;;  %v10600_v49 = vmul.f32 1.442695, %v10542_v6 }
0x115e   :  { %v10503_v5 = vpop.xlane.xlu1 %10502  ;;  %v10681_v47 = vsel %vm1409_vm4, %v18314_v16, 0.0  ;;  %v18322_v50 = vpop.eup %16147 }
0x115f   :  { %16157 = vpow2.f32 %v10600_v49  ;;  %v10543_v19 = vsub.f32 %v18185_v28, %v10503_v5  ;;  %10631 = vadd.xlane.f32.xlu0 %v10630_v59  ;;  %10682 = vadd.xlane.f32.xlu1 %v10681_v47  ;;  %v10636_v11 = vsel %vm1409_vm4, %v18322_v50, 0.0 }
0x1160   :  { %16159 = vpow2.f32 %v10576_v62 }
0x1161   :  { %v18325_v21 = vpop.eup %16149  ;;  %v10602_v45 = vmul.f32 1.442695, %v10543_v19 }
0x1162   :  { %v10506_v34 = vpop.xlane.xlu0 %10505  ;;  %v10684_v20 = vsel %vm1409_vm4, %v18325_v21, 0.0  ;;  %v18333_v41 = vpop.eup %16151 }
0x1163   :  { %16161 = vpow2.f32 %v10602_v45  ;;  %v10544_v28 = vsub.f32 %v18190_v22, %v10506_v34  ;;  %10637 = vadd.xlane.f32.xlu0 %v10636_v11  ;;  %10685 = vadd.xlane.f32.xlu1 %v10684_v20  ;;  %v10642_v26 = vsel %vm1409_vm4, %v18333_v41, 0.0 }
0x1164   :  { %16163 = vpow2.f32 %v10580_v27  ;;  %v10592_v27 = vmul.f32 1.442695, %v10538_v55 }
0x1165   :  { %v18336_v24 = vpop.eup %16153  ;;  %v10604_v0 = vmul.f32 1.442695, %v10544_v28 }
0x1166   :  { %v10509_v42 = vpop.xlane.xlu1 %10508  ;;  %v10687_v15 = vsel %vm1409_vm4, %v18336_v24, 0.0  ;;  %v18344_v6 = vpop.eup %16155 }
0x1167   :  { %16165 = vpow2.f32 %v10604_v0  ;;  %v10545_v22 = vsub.f32 %v18195_v48, %v10509_v42  ;;  %10643 = vadd.xlane.f32.xlu0 %v10642_v26  ;;  %10688 = vadd.xlane.f32.xlu1 %v10687_v15  ;;  %v10648_v5 = vsel %vm1409_vm4, %v18344_v6, 0.0 }
0x1168   :  { %16167 = vpow2.f32 %v10584_v30 }
0x1169   :  { %v18347_v62 = vpop.eup %16157  ;;  %v10606_v13 = vmul.f32 1.442695, %v10545_v22 }
0x116a   :  { %v10512_v49 = vpop.xlane.xlu0 %10511  ;;  %v10690_v59 = vsel %vm1409_vm4, %v18347_v62, 0.0  ;;  %v18355_v47 = vpop.eup %16159 }
0x116b   :  { %16169 = vpow2.f32 %v10606_v13  ;;  %v10546_v48 = vsub.f32 %v18200_v8, %v10512_v49  ;;  %10649 = vadd.xlane.f32.xlu0 %v10648_v5  ;;  %10691 = vadd.xlane.f32.xlu1 %v10690_v59  ;;  %v10654_v37 = vsel %vm1409_vm4, %v18355_v47, 0.0 }
0x116c   :  { %16171 = vpow2.f32 %v10588_v3 }
0x116d   :  { %v18358_v19 = vpop.eup %16161  ;;  %v10608_v25 = vmul.f32 1.442695, %v10546_v48 }
0x116e   :  { %v10515_v44 = vpop.xlane.xlu1 %10514  ;;  %v10693_v45 = vsel %vm1409_vm4, %v18358_v19, 0.0  ;;  %v18364_v34 = vpop.eup %16163 }
0x116f   :  { %16173 = vpow2.f32 %v10608_v25  ;;  %v10547_v11 = vsub.f32 %v18205_v18, %v10515_v44  ;;  %10655 = vadd.xlane.f32.xlu0 %v10654_v37  ;;  %10694 = vadd.xlane.f32.xlu1 %v10693_v45  ;;  %v10660_v28 = vsel %vm1409_vm4, %v18364_v34, 0.0 }
0x1170   :  { %16175 = vpow2.f32 %v10592_v27 }
0x1171   :  { %v18367_v8 = vpop.eup %16165  ;;  %v10610_v20 = vmul.f32 1.442695, %v10547_v11 }
0x1172   :  { %v10696_v30 = vsel %vm1409_vm4, %v18367_v8, 0.0  ;;  %v18373_v54 = vpop.eup %16167 }
0x1173   :  { %16177 = vpow2.f32 %v10610_v20  ;;  %10661 = vadd.xlane.f32.xlu0 %v10660_v28  ;;  %10697 = vadd.xlane.f32.xlu1 %v10696_v30  ;;  %v10666_v18 = vsel %vm1409_vm4, %v18373_v54, 0.0 }
0x1175   :  { %v18375_v0 = vpop.eup %16169 }
0x1176   :  { %v10699_v42 = vsel %vm1409_vm4, %v18375_v0, 0.0  ;;  %v18381_v26 = vpop.eup %16171 }
0x1177   :  { %10667 = vadd.xlane.f32.xlu0 %v10666_v18  ;;  %10700 = vadd.xlane.f32.xlu1 %v10699_v42  ;;  %v10672_v22 = vsel %vm1409_vm4, %v18381_v26, 0.0 }
0x1179   :  { %v18383_v15 = vpop.eup %16173 }
0x117a   :  { %v10702_v3 = vsel %vm1409_vm4, %v18383_v15, 0.0  ;;  %v18389_v55 = vpop.eup %16175 }
0x117b   :  { %10673 = vadd.xlane.f32.xlu0 %v10672_v22  ;;  %10703 = vadd.xlane.f32.xlu1 %v10702_v3  ;;  %v10678_v49 = vsel %vm1409_vm4, %v18389_v55, 0.0 }
0x117d   :  { %v18391_v13 = vpop.eup %16177 }
0x117e   :  { %v10705_v5 = vsel %vm1409_vm4, %v18391_v13, 0.0 }
0x117f   :  { %10679 = vadd.xlane.f32.xlu0 %v10678_v49  ;;  %10706 = vadd.xlane.f32.xlu1 %v10705_v5 }
0x118a   :  { %v7876_v59 = vpop.trf.xlu0 }
0x118b   :  { %15519 = vmatpush3.msra.mxu1 %v7876_v59 }
0x118c   :  { %15528 = vmatprep.subr.mxu1 %v18967_v1 }
0x118e   :  { %v7877_v48 = vpop.trf.xlu0 }
0x118f   :  { %15524 = vmatpush3.msra.mxu0 %v7877_v48 }
0x1190   :  { %15533 = vmatprep.subr.mxu0 %v18967_v1 }
0x1192   :  { %v7878_v27 = vpop.trf.xlu0 }
0x1196   :  { %v7879_v44 = vpop.trf.xlu0 }
0x1197   :  { %v10617_v25 = vpop.xlane.xlu1 %10616 }
0x1198   :  { %16179 = vrcp.f32 %v10617_v25 }
0x119a   :  { %v7880_v45 = vpop.trf.xlu0 }
0x119e   :  { %v7881_v30 = vpop.trf.xlu0 }
0x119f   :  { %v10623_v37 = vpop.xlane.xlu1 %10622 }
0x11a0   :  { %16181 = vrcp.f32 %v10623_v37  ;;  %v18427_v37 = vld [vmem:[#allocation7 + $0x20] sm:$0xff] }
0x11a1   :  { %18979 = vst [vmem:[#allocation20_spill] sm:$0xff] %v18427_v37 }
0x11a2   :  { %v16180_v11 = vpop.eup %16179  ;;  %v7882_v22 = vpop.trf.xlu0 }
0x11a3   :  { %v10741_v20 = vmul.f32 %v16180_v11, %v18217_v63 }
0x11a5   :  { %15526 = vmatmul.mubr.msk.f32.vlgmr.msra.gmra.mrb[118].mxu0 %vm1409_vm4, %v10741_v20 }
0x11a6   :  { %15534 = vmatpush3.msra.mxu0 %v7879_v44  ;;  %15535 = vmatprep.mubr.msk.f32.mxu0 %vm16467_vm3, %v18967_v1  ;;  %v7883_v5 = vpop.trf.xlu0 }
0x11a7   :  { %v10629_v28 = vpop.xlane.xlu1 %10628  ;;  %15543 = vmatprep.subr.mxu0 %v18967_v1 }
0x11a8   :  { %16183 = vrcp.f32 %v10629_v28 }
0x11aa   :  { %v16182_v18 = vpop.eup %16181 }
0x11ab   :  { %v10743_v42 = vmul.f32 %v16182_v18, %v18223_v57 }
0x11ac   :  { %7924 = vxpose.xlu0.b32.start.end [1/1] (short) (narrow) %v17864_v33, 64 }
0x11ad   :  { %15536 = vmatmul.mubr.msk.f32.vlgmr.msra.gmra.mrb[120].mxu0 %vm1409_vm4, %v10743_v42 }
0x11ae   :  { %15544 = vmatpush3.msra.mxu0 %v7881_v30  ;;  %15545 = vmatprep.mubr.msk.f32.mxu0 %vm16467_vm3, %v18967_v1 }
0x11af   :  { %v10635_v63 = vpop.xlane.xlu1 %10634  ;;  %15553 = vmatprep.subr.mxu0 %v18967_v1 }
0x11b0   :  { %16185 = vrcp.f32 %v10635_v63 }
0x11b2   :  { %v16184_v3 = vpop.eup %16183  ;;  %7892 = vxpose.xlu1.b32.start.end [1/1] (short) (narrow) %v17862_v32, 64 }
0x11b3   :  { %v10745_v49 = vmul.f32 %v16184_v3, %v18228_v23 }
0x11b5   :  { %15546 = vmatmul.mubr.msk.f32.vlgmr.msra.gmra.mrb[122].mxu0 %vm1409_vm4, %v10745_v49 }
0x11b6   :  { %15554 = vmatpush3.msra.mxu0 %v7883_v5  ;;  %15555 = vmatprep.mubr.msk.f32.mxu0 %vm16467_vm3, %v18967_v1 }
0x11b7   :  { %15563 = vmatprep.subr.mxu0 %v18967_v1  ;;  %v18421_v32 = vpop.xlane.xlu1 %10640 }
0x11ba   :  { %v16186_v33 = vpop.eup %16185 }
0x11bb   :  { %v10747_v57 = vmul.f32 %v16186_v33, %v18233_v39  ;;  %v14486_v39 = vcombine.low %v18427_v37, %v18427_v37 }
0x11bd   :  { %15556 = vmatmul.mubr.msk.f32.vlgmr.msra.gmra.mrb[124].mxu0 %vm1409_vm4, %v10747_v57 }
0x11be   :  { %15565 = vmatprep.mubr.msk.f32.mxu0 %vm16467_vm3, %v18967_v1 }
0x11bf   :  { %v18423_v59 = vpop.xlane.xlu1 %10646 }
0x11c7   :  { %v18425_v25 = vpop.xlane.xlu1 %10652 }
0x11c9   :  { %7956 = vxpose.xlu0.b32.start.end [1/1] (short) (narrow) %v17866_v58, 64 }
0x11cf   :  { %v18431_v20 = vpop.xlane.xlu1 %10658 }
0x11d4   :  { %v18440_v42 = vpop.xlane.xlu1 %10664 }
0x11e0   :  { %v10614_v23 = vpop.xlane.xlu0 %10613 }
0x11e1   :  { %16187 = vrcp.f32 %v10614_v23 }
0x11e4   :  { %v10620_v48 = vpop.xlane.xlu0 %10619 }
0x11e5   :  { %16189 = vrcp.f32 %v10620_v48  ;;  %v18467_v48 = vld [vmem:[#allocation7 + $0x28] sm:$0xff] }
0x11e6   :  { %18980 = vst [vmem:[#allocation23_spill] sm:$0xff] %v18467_v48 }
0x11e8   :  { %v10626_v44 = vpop.xlane.xlu0 %10625 }
0x11e9   :  { %16191 = vrcp.f32 %v10626_v44  ;;  %v14491_v44 = vcombine.low %v18467_v48, %v18467_v48 }
0x11eb   :  { %v16188_v11 = vpop.eup %16187 }
0x11ec   :  { %v10740_v58 = vmul.f32 %v16188_v11, %v18287_v38  ;;  %v10632_v28 = vpop.xlane.xlu0 %10631  ;;  %13125 = vrot.lane.b32.xlu1 %v14486_v39, %s16469_s5  ;;  %v18471_v39 = vld [vmem:[#allocation7 + $0x30] sm:$0xff] }
0x11ed   :  { %16193 = vrcp.f32 %v10632_v28  ;;  %18981 = vst [vmem:[#allocation21_spill] sm:$0xff] %v18471_v39  ;;  %v14496_v11 = vcombine.low %v18471_v39, %v18471_v39 }
0x11ee   :  { %15521 = vmatmul.mubr.msk.f32.vlgmr.msra.gmra.mrb[138].mxu1 %vm1409_vm4, %v10740_v58  ;;  %v18477_v58 = vld [vmem:[#allocation7 + $0x38] sm:$0xff] }
0x11ef   :  { %v16190_v30 = vpop.eup %16189  ;;  %15529 = vmatpush3.msra.mxu1 %v7878_v27  ;;  %15530 = vmatprep.mubr.msk.f32.mxu1 %vm16467_vm3, %v18967_v1  ;;  %v18447_v27 = vpop.xlane.xlu1 %10670  ;;  %18982 = vst [vmem:[#allocation22_spill] sm:$0xff] %v18477_v58  ;;  %v14501_v28 = vcombine.low %v18477_v58, %v18477_v58 }
0x11f0   :  { %v10742_v18 = vmul.f32 %v16190_v30, %v18293_v36  ;;  %15538 = vmatprep.subr.mxu1 %v18967_v1  ;;  %v10638_v49 = vpop.xlane.xlu0 %10637  ;;  %13291 = vrot.lane.b32.xlu1 %v14496_v11, %s16469_s5 }
0x11f1   :  { %16195 = vrcp.f32 %v10638_v49 }
0x11f2   :  { %15531 = vmatmul.mubr.msk.f32.vlgmr.msra.gmra.mrb[140].mxu1 %vm1409_vm4, %v10742_v18  ;;  %16197 = vrcp.f32 %v18421_v32 }
0x11f3   :  { %v16192_v38 = vpop.eup %16191  ;;  %15539 = vmatpush3.msra.mxu1 %v7880_v45  ;;  %15540 = vmatprep.mubr.msk.f32.mxu1 %vm16467_vm3, %v18967_v1  ;;  %v18454_v45 = vpop.xlane.xlu1 %10676 }
0x11f4   :  { %v10744_v63 = vmul.f32 %v16192_v38, %v18304_v14  ;;  %15548 = vmatprep.subr.mxu1 %v18967_v1  ;;  %13374 = vrot.lane.b32.xlu1 %v14501_v28, %s16469_s5 }
0x11f6   :  { %15541 = vmatmul.mubr.msk.f32.vlgmr.msra.gmra.mrb[142].mxu1 %vm1409_vm4, %v10744_v63 }
0x11f7   :  { %v16194_v36 = vpop.eup %16193  ;;  %15549 = vmatpush3.msra.mxu1 %v7882_v22  ;;  %15550 = vmatprep.mubr.msk.f32.mxu1 %vm16467_vm3, %v18967_v1  ;;  %v18459_v14 = vpop.xlane.xlu1 %10682 }
0x11f8   :  { %v10746_v3 = vmul.f32 %v16194_v36, %v18311_v17  ;;  %15558 = vmatprep.subr.mxu1 %v18967_v1  ;;  %v10644_v22 = vpop.xlane.xlu0 %10643 }
0x11f9   :  { %16199 = vrcp.f32 %v10644_v22 }
0x11fa   :  { %15551 = vmatmul.mubr.msk.f32.vlgmr.msra.gmra.mrb[144].mxu1 %vm1409_vm4, %v10746_v3  ;;  %16201 = vrcp.f32 %v18423_v59 }
0x11fb   :  { %15560 = vmatprep.mubr.msk.f32.mxu1 %vm16467_vm3, %v18967_v1  ;;  %v18461_v5 = vpop.xlane.xlu1 %10685  ;;  %v16196_v28 = vpop.eup %16195 }
0x11fc   :  { %v10650_v57 = vpop.xlane.xlu0 %10649  ;;  %v10748_v58 = vmul.f32 %v16196_v28, %v18322_v50  ;;  %v16198_v49 = vpop.eup %16197 }
0x11fd   :  { %16203 = vrcp.f32 %v10650_v57  ;;  %v10749_v32 = vmul.f32 %v16198_v49, %v18238_v43 }
0x11fe   :  { %16205 = vrcp.f32 %v18425_v25 }
0x11ff   :  { %v18463_v33 = vpop.xlane.xlu1 %10688 }
0x1200   :  { %v10656_v17 = vpop.xlane.xlu0 %10655 }
0x1201   :  { %16207 = vrcp.f32 %v10656_v17 }
0x1202   :  { %16209 = vrcp.f32 %v18431_v20 }
0x1203   :  { %v18465_v23 = vpop.xlane.xlu1 %10691  ;;  %v16200_v12 = vpop.eup %16199 }
0x1204   :  { %v10662_v18 = vpop.xlane.xlu0 %10661  ;;  %v10750_v59 = vmul.f32 %v16200_v12, %v18333_v41  ;;  %v16202_v57 = vpop.eup %16201 }
0x1205   :  { %v10751_v25 = vmul.f32 %v16202_v57, %v18243_v31  ;;  %16211 = vrcp.f32 %v10662_v18 }
0x1206   :  { %16213 = vrcp.f32 %v18440_v42 }
0x1207   :  { %v18481_v30 = vpop.xlane.xlu1 %10694  ;;  %v16204_v28 = vpop.eup %16203 }
0x1208   :  { %v10668_v63 = vpop.xlane.xlu0 %10667  ;;  %v10752_v41 = vmul.f32 %v16204_v28, %v18344_v6  ;;  %v16206_v49 = vpop.eup %16205 }
0x1209   :  { %v10753_v20 = vmul.f32 %v16206_v49, %v18249_v56  ;;  %16215 = vrcp.f32 %v10668_v63 }
0x120a   :  { %16217 = vrcp.f32 %v18447_v27 }
0x120b   :  { %v18484_v38 = vpop.xlane.xlu1 %10697 }
0x120c   :  { %v18488_v3 = vpop.xlane.xlu0 %10673 }
0x120d   :  { %16219 = vrcp.f32 %v18488_v3 }
0x120e   :  { %13208 = vrot.lane.b32.xlu0 %v14491_v44, %s16469_s5  ;;  %16221 = vrcp.f32 %v18454_v45 }
0x120f   :  { %v18486_v36 = vpop.xlane.xlu1 %10700 }
0x1210   :  { %v18492_v11 = vpop.xlane.xlu0 %10679 }
0x1211   :  { %16223 = vrcp.f32 %v18492_v11 }
0x1212   :  { %16225 = vrcp.f32 %v18459_v14 }
0x1213   :  { %v18490_v44 = vpop.xlane.xlu1 %10703  ;;  %16227 = vrcp.f32 %v18461_v5 }
0x1214   :  { %16229 = vrcp.f32 %v18463_v33 }
0x1215   :  { %16231 = vrcp.f32 %v18465_v23 }
0x1216   :  { %16233 = vrcp.f32 %v18481_v30 }
0x1217   :  { %v18497_v4 = vpop.xlane.xlu1 %10706  ;;  %16235 = vrcp.f32 %v18484_v38 }
0x1218   :  { %16237 = vrcp.f32 %v18486_v36 }
0x122c   :  { %v18495_v2 = vpop.trf.xlu0 }
0x1230   :  { %v18499_v39 = vpop.trf.xlu0 }
0x1232   :  { %v7908_v37 = vpop.trf.xlu1 }
0x1233   :  { %15559 = vmatpush3.msra.mxu1 %v7908_v37 }
0x1234   :  { %15561 = vmatmul.mubr.msk.f32.vlgmr.msra.gmra.mrb[146].mxu1 %vm1409_vm4, %v10748_v58  ;;  %v18504_v48 = vpop.trf.xlu0  ;;  %15568 = vmatprep.subr.mxu1 %v18967_v1 }
0x1235   :  { %15570 = vmatprep.mubr.msk.f32.mxu1 %vm16467_vm3, %v18967_v1 }
0x1236   :  { %v7909_v22 = vpop.trf.xlu1 }
0x1237   :  { %15564 = vmatpush3.msra.mxu0 %v7909_v22 }
0x1238   :  { %15566 = vmatmul.mubr.msk.f32.vlgmr.msra.gmra.mrb[126].mxu0 %vm1409_vm4, %v10749_v32  ;;  %v18511_v50 = vpop.trf.xlu0  ;;  %15573 = vmatprep.subr.mxu0 %v18967_v1  ;;  %v16208_v32 = vpop.eup %16207  ;;  %16239 = vrcp.f32 %v18490_v44 }
0x1239   :  { %15575 = vmatprep.mubr.msk.f32.mxu0 %vm16467_vm3, %v18967_v1  ;;  %v16210_v42 = vpop.eup %16209  ;;  %v10754_v22 = vmul.f32 %v16208_v32, %v18355_v47  ;;  %16241 = vrcp.f32 %v18497_v4 }
0x123a   :  { %v7910_v37 = vpop.trf.xlu1  ;;  %v16212_v63 = vpop.eup %16211  ;;  %v10755_v47 = vmul.f32 %v16210_v42, %v18260_v46 }
0x123b   :  { %15569 = vmatpush3.msra.mxu1 %v7910_v37  ;;  %v10756_v27 = vmul.f32 %v16212_v63, %v18364_v34  ;;  %v16214_v37 = vpop.eup %16213 }
0x123c   :  { %15571 = vmatmul.mubr.msk.f32.vlgmr.msra.gmra.mrb[148].mxu1 %vm1409_vm4, %v10750_v59  ;;  %v18519_v43 = vpop.trf.xlu0  ;;  %15578 = vmatprep.subr.mxu1 %v18967_v1  ;;  %v16216_v57 = vpop.eup %16215  ;;  %v10757_v46 = vmul.f32 %v16214_v37, %v18268_v60 }
0x123d   :  { %15580 = vmatprep.mubr.msk.f32.mxu1 %vm16467_vm3, %v18967_v1  ;;  %v16218_v34 = vpop.eup %16217  ;;  %v10758_v45 = vmul.f32 %v16216_v57, %v18373_v54 }
0x123e   :  { %v7911_v58 = vpop.trf.xlu1  ;;  %v16220_v14 = vpop.eup %16219  ;;  %v10759_v5 = vmul.f32 %v16218_v34, %v18280_v61 }
0x123f   :  { %15574 = vmatpush3.msra.mxu0 %v7911_v58  ;;  %v16222_v54 = vpop.eup %16221 }
0x1240   :  { %15576 = vmatmul.mubr.msk.f32.vlgmr.msra.gmra.mrb[128].mxu0 %vm1409_vm4, %v10751_v25  ;;  %v18527_v12 = vpop.trf.xlu0  ;;  %15583 = vmatprep.subr.mxu0 %v18967_v1  ;;  %v16224_v33 = vpop.eup %16223  ;;  %v10761_v23 = vmul.f32 %v16222_v54, %v18296_v29 }
0x1241   :  { %15585 = vmatprep.mubr.msk.f32.mxu0 %vm16467_vm3, %v18967_v1 }
0x1242   :  { %v7912_v17 = vpop.trf.xlu1 }
0x1243   :  { %15579 = vmatpush3.msra.mxu1 %v7912_v17 }
0x1244   :  { %15581 = vmatmul.mubr.msk.f32.vlgmr.msra.gmra.mrb[150].mxu1 %vm1409_vm4, %v10752_v41  ;;  %v18534_v31 = vpop.trf.xlu0  ;;  %15588 = vmatprep.subr.mxu1 %v18967_v1 }
0x1245   :  { %15590 = vmatprep.mubr.msk.f32.mxu1 %vm16467_vm3, %v18967_v1 }
0x1246   :  { %v7913_v18 = vpop.trf.xlu1 }
0x1247   :  { %15584 = vmatpush3.msra.mxu0 %v7913_v18 }
0x1248   :  { %15586 = vmatmul.mubr.msk.f32.vlgmr.msra.gmra.mrb[130].mxu0 %vm1409_vm4, %v10753_v20  ;;  %v18542_v6 = vpop.trf.xlu0  ;;  %15593 = vmatprep.subr.mxu0 %v18967_v1 }
0x1249   :  { %15595 = vmatprep.mubr.msk.f32.mxu0 %vm16467_vm3, %v18967_v1 }
0x124a   :  { %v7914_v56 = vpop.trf.xlu1 }
0x124b   :  { %15589 = vmatpush3.msra.mxu1 %v7914_v56 }
0x124c   :  { %15591 = vmatmul.mubr.msk.f32.vlgmr.msra.gmra.mrb[152].mxu1 %vm1409_vm4, %v10754_v22  ;;  %15598 = vmatprep.subr.mxu1 %v18967_v1  ;;  %v18552_v59 = vpop.trf.xlu0 }
0x124d   :  { %15599 = vmatpush3.msra.mxu1 %v18495_v2  ;;  %15600 = vmatprep.mubr.msk.f32.mxu1 %vm16467_vm3, %v18967_v1 }
0x124e   :  { %v7915_v3 = vpop.trf.xlu1  ;;  %15608 = vmatprep.subr.mxu1 %v18967_v1 }
0x124f   :  { %15594 = vmatpush3.msra.mxu0 %v7915_v3 }
0x1250   :  { %15596 = vmatmul.mubr.msk.f32.vlgmr.msra.gmra.mrb[132].mxu0 %vm1409_vm4, %v10755_v47  ;;  %15601 = vmatmul.mubr.msk.f32.vlgmr.msra.gmra.mrb[154].mxu1 %vm1409_vm4, %v10756_v27  ;;  %v18564_v2 = vpop.trf.xlu0 }
0x1251   :  { %15603 = vmatprep.subr.mxu0 %v18967_v1  ;;  %15609 = vmatpush3.msra.mxu1 %v18504_v48  ;;  %v10760_v48 = vmul.f32 %v16220_v14, %v18381_v26  ;;  %v16226_v26 = vpop.eup %16225 }
0x1252   :  { %15604 = vmatpush3.msra.mxu0 %v18499_v39  ;;  %15605 = vmatprep.mubr.msk.f32.mxu0 %vm16467_vm3, %v18967_v1  ;;  %v10762_v39 = vmul.f32 %v16224_v33, %v18389_v55  ;;  %v16228_v30 = vpop.eup %16227  ;;  %v10763_v38 = vmul.f32 %v16226_v26, %v18314_v16 }
0x1253   :  { %15610 = vmatprep.mubr.msk.f32.mxu1 %vm16467_vm3, %v18967_v1  ;;  %15613 = vmatprep.subr.mxu0 %v18967_v1  ;;  %v16230_v55 = vpop.eup %16229  ;;  %v10764_v11 = vmul.f32 %v16228_v30, %v18325_v21 }
0x1254   :  { %15618 = vmatprep.subr.mxu1 %v18967_v1  ;;  %15606 = vmatmul.mubr.msk.f32.vlgmr.msra.gmra.mrb[134].mxu0 %vm1409_vm4, %v10757_v46  ;;  %v7974_v60 = vpop.trf.xlu0  ;;  %v16232_v36 = vpop.eup %16231  ;;  %v10765_v44 = vmul.f32 %v16230_v55, %v18336_v24 }
0x1255   :  { %15611 = vmatmul.mubr.msk.f32.vlgmr.msra.gmra.mrb[156].mxu1 %vm1409_vm4, %v10758_v45  ;;  %15614 = vmatpush3.msra.mxu0 %v18511_v50  ;;  %v16234_v21 = vpop.eup %16233  ;;  %v10766_v50 = vmul.f32 %v16232_v36, %v18347_v62 }
0x1256   :  { %15619 = vmatpush3.msra.mxu1 %v18519_v43  ;;  %15615 = vmatprep.mubr.msk.f32.mxu0 %vm16467_vm3, %v18967_v1  ;;  %v16236_v43 = vpop.eup %16235  ;;  %v10767_v24 = vmul.f32 %v16234_v21, %v18358_v19 }
0x1257   :  { %15620 = vmatprep.mubr.msk.f32.mxu1 %vm16467_vm3, %v18967_v1  ;;  %15623 = vmatprep.subr.mxu0 %v18967_v1  ;;  %v16238_v62 = vpop.eup %16237  ;;  %v10768_v25 = vmul.f32 %v16236_v43, %v18367_v8 }
0x1258   :  { %15628 = vmatprep.subr.mxu1 %v18967_v1  ;;  %15616 = vmatmul.mubr.msk.f32.vlgmr.msra.gmra.mrb[136].mxu0 %vm1409_vm4, %v10759_v5  ;;  %v7975_v61 = vpop.trf.xlu0  ;;  %v16240_v58 = vpop.eup %16239  ;;  %v10769_v19 = vmul.f32 %v16238_v62, %v18375_v0 }
0x1259   :  { %15621 = vmatmul.mubr.msk.f32.vlgmr.msra.gmra.mrb[158].mxu1 %vm1409_vm4, %v10760_v48  ;;  %15624 = vmatpush3.msra.mxu0 %v18527_v12  ;;  %v16242_v12 = vpop.eup %16241  ;;  %v10770_v41 = vmul.f32 %v16240_v58, %v18383_v15 }
0x125a   :  { %15629 = vmatpush3.msra.mxu1 %v18534_v31  ;;  %15625 = vmatprep.mubr.msk.f32.mxu0 %vm16467_vm3, %v18967_v1  ;;  %v10771_v0 = vmul.f32 %v16242_v12, %v18391_v13 }
0x125b   :  { %15630 = vmatprep.mubr.msk.f32.mxu1 %vm16467_vm3, %v18967_v1  ;;  %15633 = vmatprep.subr.mxu0 %v18967_v1 }
0x125c   :  { %15638 = vmatprep.subr.mxu1 %v18967_v1  ;;  %15626 = vmatmul.mubr.msk.f32.vlgmr.msra.gmra.mrb[138].mxu0 %vm1409_vm4, %v10761_v23  ;;  %v7976_v29 = vpop.trf.xlu0 }
0x125d   :  { %15631 = vmatmul.mubr.msk.f32.vlgmr.msra.gmra.mrb[160].mxu1 %vm1409_vm4, %v10762_v39  ;;  %15634 = vmatpush3.msra.mxu0 %v18542_v6 }
0x125e   :  { %15639 = vmatpush3.msra.mxu1 %v18552_v59  ;;  %15635 = vmatprep.mubr.msk.f32.mxu0 %vm16467_vm3, %v18967_v1  ;;  %v13126_v28 = vpop.permute.xlu1 %13125 }
0x125f   :  { %15640 = vmatprep.mubr.msk.f32.mxu1 %vm16467_vm3, %v18967_v1  ;;  %15643 = vmatprep.subr.mxu0 %v18967_v1  ;;  %v13140_v17 = vsel %vm726_vm1, %v13126_v28, 0 }
0x1260   :  { %15648 = vmatprep.subr.mxu1 %v18967_v1  ;;  %15636 = vmatmul.mubr.msk.f32.vlgmr.msra.gmra.mrb[140].mxu0 %vm1409_vm4, %v10763_v38  ;;  %v7977_v16 = vpop.trf.xlu0 }
0x1261   :  { %15641 = vmatmul.mubr.msk.f32.vlgmr.msra.gmra.mrb[162].mxu1 %vm1409_vm4, %v10764_v11  ;;  %15644 = vmatpush3.msra.mxu0 %v18564_v2 }
0x1262   :  { %15649 = vmatpush3.msra.mxu1 %v7974_v60  ;;  %15645 = vmatprep.mubr.msk.f32.mxu0 %vm16467_vm3, %v18967_v1  ;;  %v13292_v37 = vpop.permute.xlu1 %13291 }
0x1263   :  { %15650 = vmatprep.mubr.msk.f32.mxu1 %vm16467_vm3, %v18967_v1  ;;  %15653 = vmatprep.subr.mxu0 %v18967_v1 }
0x1264   :  { %15646 = vmatmul.mubr.msk.f32.vlgmr.msra.gmra.mrb[142].mxu0 %vm1409_vm4, %v10765_v44  ;;  %15658 = vmatprep.subr.mxu1 %v18967_v1  ;;  %v7978_v4 = vpop.trf.xlu0 }
0x1265   :  { %15651 = vmatmul.mubr.msk.f32.vlgmr.msra.gmra.mrb[164].mxu1 %vm1409_vm4, %v10766_v50  ;;  %15654 = vmatpush3.msra.mxu0 %v7975_v61 }
0x1266   :  { %15655 = vmatprep.mubr.msk.f32.mxu0 %vm16467_vm3, %v18967_v1  ;;  %15659 = vmatpush3.msra.mxu1 %v7976_v29  ;;  %v13306_v29 = vsel %vm726_vm1, %v13292_v37, 0  ;;  %v13375_v38 = vpop.permute.xlu1 %13374 }
0x1267   :  { %15660 = vmatprep.mubr.msk.f32.mxu1 %vm16467_vm3, %v18967_v1  ;;  %15663 = vmatprep.subr.mxu0 %v18967_v1 }
0x1268   :  { %15656 = vmatmul.mubr.msk.f32.vlgmr.msra.gmra.mrb[144].mxu0 %vm1409_vm4, %v10767_v24  ;;  %15668 = vmatprep.subr.mxu1 %v18967_v1  ;;  %v7979_v8 = vpop.trf.xlu0 }
0x1269   :  { %15661 = vmatmul.mubr.msk.f32.vlgmr.msra.gmra.mrb[166].mxu1 %vm1409_vm4, %v10768_v25  ;;  %15664 = vmatpush3.msra.mxu0 %v7977_v16 }
0x126a   :  { %15665 = vmatprep.mubr.msk.f32.mxu0 %vm16467_vm3, %v18967_v1  ;;  %15669 = vmatpush3.msra.mxu1 %v7978_v4 }
0x126b   :  { %15670 = vmatprep.mubr.msk.f32.mxu1 %vm16467_vm3, %v18967_v1  ;;  %15673 = vmatprep.subr.mxu0 %v18967_v1 }
0x126c   :  { %15666 = vmatmul.mubr.msk.f32.vlgmr.msra.gmra.mrb[146].mxu0 %vm1409_vm4, %v10769_v19  ;;  %15810 = vmatprep.subr.msk.bf16.mxu1 %vm726_vm1, %v13126_v28 }
0x126d   :  { %15671 = vmatmul.mubr.msk.f32.vlgmr.msra.gmra.mrb[168].mxu1 %vm1409_vm4, %v10770_v41  ;;  %15674 = vmatpush3.msra.mxu0 %v7979_v8 }
0x126e   :  { %15675 = vmatprep.mubr.msk.f32.mxu0 %vm16467_vm3, %v18967_v1  ;;  %15679 = vmatpush3.bf16.msra.mxu1 %v13140_v17 }
0x1270   :  { %15676 = vmatmul.mubr.msk.f32.vlgmr.msra.gmra.mrb[148].mxu0 %vm1409_vm4, %v10771_v0 }
0x1278   :  { %v10914_v15 = vpop.f32.mrb[118].mxu0 }
0x1279   :  { %v15527_v49 = vpop.f32.mrb[119].mxu0 }
0x127a   :  { %v13389_v49 = vsel %vm726_vm1, %v13375_v38, 0 }
0x1280   :  { %v11060_v31 = vpop.f32.mrb[120].mxu0  ;;  %v13209_v6 = vpop.permute.xlu0 %13208 }
0x1281   :  { %v15537_v20 = vpop.f32.mrb[121].mxu0  ;;  %15811 = vmatprep.subr.msk.bf16.mxu1 %vm726_vm1, %v13209_v6  ;;  %v13223_v3 = vsel %vm726_vm1, %v13209_v6, 0 }
0x1288   :  { %v11206_v18 = vpop.f32.mrb[122].mxu0 }
0x1289   :  { %v15547_v32 = vpop.f32.mrb[123].mxu0 }
0x1290   :  { %v11352_v42 = vpop.f32.mrb[124].mxu0 }
0x1291   :  { %v15557_v22 = vpop.f32.mrb[125].mxu0 }
0x12c1   :  { %v10841_v56 = vpop.f32.mrb[138].mxu1 }
0x12c2   :  { %v13108_v63 = vpack.c.bf16 %v10914_v15, %v10841_v56  ;;  %v15522_v13 = vpop.f32.mrb[139].mxu1 }
0x12c4   :  { %15680 = vmatprep.mubr.msk.bf16.mxu1 %vm1409_vm4, %v13108_v63 }
0x12c5   :  { %v10987_v59 = vpop.f32.mrb[140].mxu1 }
0x12c6   :  { %v13109_v47 = vpack.c.bf16 %v11060_v31, %v10987_v59  ;;  %v15532_v27 = vpop.f32.mrb[141].mxu1 }
0x12c8   :  { %15681 = vmatmul.mubr.msk.bf16.vlgmr.msra.gmra.mrb[172].mxu1 %vm1409_vm4, %v13109_v47 }
0x12c9   :  { %v11133_v57 = vpop.f32.mrb[142].mxu1  ;;  %15689 = vmatpush3.bf16.msra.mxu1 %v13223_v3 }
0x12ca   :  { %v13110_v2 = vpack.c.bf16 %v11206_v18, %v11133_v57  ;;  %v15542_v46 = vpop.f32.mrb[143].mxu1  ;;  %15812 = vmatprep.subr.msk.bf16.mxu1 %vm726_vm1, %v13292_v37 }
0x12cc   :  { %15684 = vmatprep.mubr.msk.bf16.mxu1 %vm1409_vm4, %v13110_v2 }
0x12cd   :  { %v11279_v34 = vpop.f32.mrb[144].mxu1 }
0x12ce   :  { %v13111_v45 = vpack.c.bf16 %v11352_v42, %v11279_v34  ;;  %v15552_v14 = vpop.f32.mrb[145].mxu1 }
0x12d0   :  { %15685 = vmatmul.mubr.msk.bf16.gmra.mrb[176].mxu1 %vm1409_vm4, %v13111_v45 }
0x1307   :  { %v11425_v60 = vpop.f32.mrb[146].mxu1 }
0x1308   :  { %v15562_v5 = vpop.f32.mrb[147].mxu1 }
0x130b   :  { %v11498_v54 = vpop.f32.mrb[126].mxu0 }
0x130c   :  { %v13112_v48 = vpack.c.bf16 %v11498_v54, %v11425_v60  ;;  %v15567_v33 = vpop.f32.mrb[127].mxu0 }
0x130e   :  { %15690 = vmatprep.mubr.msk.bf16.mxu1 %vm1409_vm4, %v13112_v48 }
0x130f   :  { %v11571_v61 = vpop.f32.mrb[148].mxu1 }
0x1310   :  { %v15572_v23 = vpop.f32.mrb[149].mxu1 }
0x1313   :  { %v11644_v26 = vpop.f32.mrb[128].mxu0 }
0x1314   :  { %v13113_v39 = vpack.c.bf16 %v11644_v26, %v11571_v61  ;;  %v15577_v30 = vpop.f32.mrb[129].mxu0 }
0x1315   :  { %v18682_v30 = vld [vmem:[#allocation11 + $0x8] sm:$0xff] }
0x1316   :  { %15691 = vmatmul.mubr.msk.bf16.vlgmr.msra.gmra.mrb[172].mxu1 %vm1409_vm4, %v13113_v39 }
0x1317   :  { %v11717_v55 = vpop.f32.mrb[150].mxu1  ;;  %15699 = vmatpush3.bf16.msra.mxu1 %v13306_v29  ;;  %v18983_v29 = vsub.s32 3, %v16689_v9 }
0x1318   :  { %v15582_v11 = vpop.f32.mrb[151].mxu1  ;;  %15813 = vmatprep.subr.msk.bf16.mxu1 %vm726_vm1, %v13375_v38 }
0x1319   :  { %v13491_v38 = vrot.slane %v18682_v30, %v18983_v29 }
0x131b   :  { %v11790_v36 = vpop.f32.mrb[130].mxu0 }
0x131c   :  { %v13114_v16 = vpack.c.bf16 %v11790_v36, %v11717_v55  ;;  %v15587_v44 = vpop.f32.mrb[131].mxu0 }
0x131e   :  { %15694 = vmatprep.mubr.msk.bf16.mxu1 %vm1409_vm4, %v13114_v16 }
0x131f   :  { %v11863_v21 = vpop.f32.mrb[152].mxu1 }
0x1320   :  { %v15592_v50 = vpop.f32.mrb[153].mxu1 }
0x1323   :  { %v11936_v43 = vpop.f32.mrb[132].mxu0  ;;  %v12009_v4 = vpop.f32.mrb[154].mxu1 }
0x1324   :  { %v13115_v24 = vpack.c.bf16 %v11936_v43, %v11863_v21  ;;  %v15597_v62 = vpop.f32.mrb[133].mxu0  ;;  %v15602_v25 = vpop.f32.mrb[155].mxu1 }
0x1326   :  { %15695 = vmatmul.mubr.msk.bf16.gmra.mrb[176].mxu1 %vm1409_vm4, %v13115_v24 }
0x1327   :  { %v12082_v58 = vpop.f32.mrb[134].mxu0 }
0x1328   :  { %v13116_v28 = vpack.c.bf16 %v12082_v58, %v12009_v4  ;;  %v12155_v19 = vpop.f32.mrb[156].mxu1  ;;  %v15607_v8 = vpop.f32.mrb[135].mxu0 }
0x1329   :  { %v15612_v12 = vpop.f32.mrb[157].mxu1 }
0x132a   :  { %15700 = vmatprep.mubr.msk.bf16.mxu1 %vm1409_vm4, %v13116_v28 }
0x132b   :  { %v12228_v41 = vpop.f32.mrb[136].mxu0 }
0x132c   :  { %v13117_v17 = vpack.c.bf16 %v12228_v41, %v12155_v19  ;;  %v12301_v0 = vpop.f32.mrb[158].mxu1  ;;  %v15617_v15 = vpop.f32.mrb[137].mxu0 }
0x132d   :  { %v15622_v31 = vpop.f32.mrb[159].mxu1  ;;  %v18984_v15 = vld [vmem:[#allocation19_spill] sm:$0xff] }
0x132e   :  { %15701 = vmatmul.mubr.msk.bf16.vlgmr.msra.gmra.mrb[172].mxu1 %vm1409_vm4, %v13117_v17 }
0x132f   :  { %v12374_v20 = vpop.f32.mrb[138].mxu0  ;;  %15709 = vmatpush3.bf16.msra.mxu1 %v13389_v49 }
0x1330   :  { %v13118_v18 = vpack.c.bf16 %v12374_v20, %v12301_v0  ;;  %v12447_v32 = vpop.f32.mrb[160].mxu1  ;;  %v15627_v6 = vpop.f32.mrb[139].mxu0 }
0x1331   :  { %v15632_v42 = vpop.f32.mrb[161].mxu1 }
0x1332   :  { %15704 = vmatprep.mubr.msk.bf16.mxu1 %vm1409_vm4, %v13118_v18 }
0x1333   :  { %v12520_v22 = vpop.f32.mrb[140].mxu0 }
0x1334   :  { %v13119_v56 = vpack.c.bf16 %v12520_v22, %v12447_v32  ;;  %v12593_v63 = vpop.f32.mrb[162].mxu1  ;;  %v15637_v13 = vpop.f32.mrb[141].mxu0 }
0x1335   :  { %v15642_v59 = vpop.f32.mrb[163].mxu1 }
0x1336   :  { %15705 = vmatmul.mubr.msk.bf16.gmra.mrb[176].mxu1 %vm1409_vm4, %v13119_v56 }
0x1337   :  { %v12666_v47 = vpop.f32.mrb[142].mxu0 }
0x1338   :  { %v13120_v27 = vpack.c.bf16 %v12666_v47, %v12593_v63  ;;  %v12739_v3 = vpop.f32.mrb[164].mxu1  ;;  %v15647_v37 = vpop.f32.mrb[143].mxu0 }
0x1339   :  { %v15652_v57 = vpop.f32.mrb[165].mxu1 }
0x133a   :  { %15710 = vmatprep.mubr.msk.bf16.mxu1 %vm1409_vm4, %v13120_v27 }
0x133b   :  { %v12812_v2 = vpop.f32.mrb[144].mxu0 }
0x133c   :  { %v13121_v46 = vpack.c.bf16 %v12812_v2, %v12739_v3  ;;  %v12885_v34 = vpop.f32.mrb[166].mxu1  ;;  %v15657_v45 = vpop.f32.mrb[145].mxu0 }
0x133d   :  { %v15662_v14 = vpop.f32.mrb[167].mxu1 }
0x133e   :  { %15711 = vmatmul.mubr.msk.bf16.vlgmr.msra.gmra.mrb[172].mxu1 %vm1409_vm4, %v13121_v46 }
0x133f   :  { %v12958_v60 = vpop.f32.mrb[146].mxu0 }
0x1340   :  { %v13122_v5 = vpack.c.bf16 %v12958_v60, %v12885_v34  ;;  %v13031_v54 = vpop.f32.mrb[168].mxu1  ;;  %v15667_v48 = vpop.f32.mrb[147].mxu0 }
0x1341   :  { %v15672_v33 = vpop.f32.mrb[169].mxu1 }
0x1342   :  { %15714 = vmatprep.mubr.msk.bf16.mxu1 %vm1409_vm4, %v13122_v5 }
0x1343   :  { %v13104_v61 = vpop.f32.mrb[148].mxu0 }
0x1344   :  { %v13123_v23 = vpack.c.bf16 %v13104_v61, %v13031_v54  ;;  %v15677_v26 = vpop.f32.mrb[149].mxu0 }
0x1346   :  { %15715 = vmatmul.mubr.msk.bf16.gmra.mrb[176].mxu1 %vm1409_vm4, %v13123_v23 }
0x1411   :  { %v15712_v39 = vpop.f32.mrb[172].mxu1 }
0x1412   :  { %v13425_v55 = vpop.f32.mrb[173].mxu1  ;;  %v13482_v11 = vadd.f32 %v15712_v39, %v17758_v51 }
0x1413   :  { %v13480_v36 = vadd.f32 %v13425_v55, %v17755_v53  ;;  %v15713_v16 = vpop.f32.mrb[174].mxu1 }
0x1414   :  { %v13428_v44 = vpop.f32.mrb[175].mxu1  ;;  %v18692_v43 = vadd.f32 %v13491_v38, %v13482_v11  ;;  %v13483_v4 = vadd.f32 %v15713_v16, %v17766_v40 }
0x1415   :  { %v18689_v21 = vadd.f32 %v13491_v38, %v13480_v36  ;;  %v13481_v50 = vadd.f32 %v13428_v44, %v17761_v35 }
0x1416   :  { %v18701_v58 = vadd.f32 %v13491_v38, %v13483_v4  ;;  %v13506_v40 = vsel %vm766_vm2, %v18692_v43, 0.0 }
0x1417   :  { %v18695_v24 = vadd.f32 %v13491_v38, %v13481_v50  ;;  %v13500_v62 = vsel %vm766_vm2, %v18689_v21, 0.0 }
0x1418   :  { %13501 = vadd.xlane.f32.xlu1 %v13500_v62  ;;  %v13509_v0 = vsel %vm766_vm2, %v18701_v58, 0.0 }
0x1419   :  { %v15716_v25 = vpop.f32.mrb[176].mxu1  ;;  %v13503_v53 = vsel %vm766_vm2, %v18695_v24, 0.0 }
0x141a   :  { %13504 = vadd.xlane.f32.xlu0 %v13503_v53  ;;  %v13441_v51 = vpop.f32.mrb[177].mxu1  ;;  %v13486_v49 = vadd.f32 %v15716_v25, %v18984_v15 }
0x141b   :  { %v13484_v35 = vadd.f32 %v13441_v51, %v17775_v10  ;;  %v15717_v28 = vpop.f32.mrb[178].mxu1 }
0x141c   :  { %v13487_v19 = vadd.f32 %v15717_v28, %v17786_v52  ;;  %13507 = vadd.xlane.f32.xlu1 %v13506_v40  ;;  %v13444_v8 = vpop.f32.mrb[179].mxu1  ;;  %v18721_v20 = vadd.f32 %v13491_v38, %v13486_v49  ;;  %v18986_v28 = vld [vmem:[#allocation20_spill] sm:$0xff] }
0x141d   :  { %v18709_v41 = vadd.f32 %v13491_v38, %v13484_v35  ;;  %v13485_v17 = vadd.f32 %v13444_v8, %v17781_v7  ;;  %v18985_v35 = vld [vmem:[#allocation23_spill] sm:$0xff]  ;;  %v18988_v8 = vld [vmem:[#allocation21_spill] sm:$0xff] }
0x141e   :  { %v18707_v12 = vadd.f32 %v13491_v38, %v13487_v19  ;;  %v13518_v18 = vsel %vm766_vm2, %v18721_v20, 0.0  ;;  %v14506_v40 = vcombine.high %v18986_v28, %v18985_v35  ;;  %v18987_v19 = vld [vmem:[#allocation22_spill] sm:$0xff] }
0x141f   :  { %v18717_v31 = vadd.f32 %v13491_v38, %v13485_v17  ;;  %v13512_v52 = vsel %vm766_vm2, %v18709_v41, 0.0  ;;  %v14507_v17 = vcombine.high %v18988_v8, %v18987_v19 }
0x1420   :  { %13510 = vadd.xlane.f32.xlu1 %v13509_v0  ;;  %v13521_v10 = vsel %vm766_vm2, %v18707_v12, 0.0  ;;  %15718 = vmatprep.subr.bf16.mxu0 %v14506_v40 }
0x1421   :  { %13522 = vadd.xlane.f32.xlu0 %v13521_v10  ;;  %v13515_v7 = vsel %vm766_vm2, %v18717_v31, 0.0  ;;  %15719 = vmatpush3.bf16.msra.mxu0 %v14506_v40 }
0x1422   :  { %15720 = vmatprep.subr.bf16.mxu0 %v14507_v17 }
0x1424   :  { %13513 = vadd.xlane.f32.xlu1 %v13512_v52 }
0x1425   :  { %15721 = vmatpush3.bf16.msra.mxu0 %v14507_v17 }
0x1428   :  { %13516 = vadd.xlane.f32.xlu1 %v13515_v7 }
0x142c   :  { %13519 = vadd.xlane.f32.xlu1 %v13518_v18 }
0x14a5   :  { %v13502_v32 = vpop.xlane.xlu1 %13501 }
0x14a6   :  { %v13524_v6 = vmul.f32 0.03125, %v13502_v32 }
0x14a7   :  { %v13505_v42 = vpop.xlane.xlu0 %13504 }
0x14a8   :  { %v18728_v22 = vsub.f32 %v18689_v21, %v13524_v6  ;;  %v13525_v56 = vmul.f32 0.03125, %v13505_v42 }
0x14a9   :  { %v13508_v63 = vpop.xlane.xlu1 %13507 }
0x14aa   :  { %v18731_v13 = vsub.f32 %v18695_v24, %v13525_v56  ;;  %v13526_v59 = vmul.f32 0.03125, %v13508_v63  ;;  %v13540_v47 = vmul.f32 %v18728_v22, %v18728_v22 }
0x14ac   :  { %v18736_v27 = vsub.f32 %v18692_v43, %v13526_v59  ;;  %v13548_v3 = vsel %vm766_vm2, %v13540_v47, 0.0  ;;  %v13541_v37 = vmul.f32 %v18731_v13, %v18731_v13 }
0x14ad   :  { %v13511_v57 = vpop.xlane.xlu1 %13510  ;;  %13549 = vadd.xlane.f32.xlu1 %v13548_v3  ;;  %v18989_v3 = vsub.s32 4, %v16689_v9 }
0x14ae   :  { %v13527_v2 = vmul.f32 0.03125, %v13511_v57  ;;  %v13551_v46 = vsel %vm766_vm2, %v13541_v37, 0.0  ;;  %v13542_v34 = vmul.f32 %v18736_v27, %v18736_v27  ;;  %v13523_v60 = vpop.xlane.xlu0 %13522 }
0x14af   :  { %13552 = vadd.xlane.f32.xlu0 %v13551_v46  ;;  %v13531_v33 = vmul.f32 0.03125, %v13523_v60  ;;  %v13607_v37 = vrot.slane %v18682_v30, %v18989_v3  ;;  %v15918_v3 = vld [vmem:[#allocation8 + $0x28] sm:$0xff]  }
0x14b0   :  { %v18745_v45 = vsub.f32 %v18701_v58, %v13527_v2  ;;  %v13554_v14 = vsel %vm766_vm2, %v13542_v34, 0.0 }
0x14b1   :  { %v13514_v5 = vpop.xlane.xlu1 %13513  ;;  %13555 = vadd.xlane.f32.xlu1 %v13554_v14  ;;  %v18757_v38 = vsub.f32 %v18707_v12, %v13531_v33 }
0x14b2   :  { %v13528_v54 = vmul.f32 0.03125, %v13514_v5  ;;  %v13543_v48 = vmul.f32 %v18745_v45, %v18745_v45 }
0x14b3   :  { %v13547_v62 = vmul.f32 %v18757_v38, %v18757_v38 }
0x14b4   :  { %v18751_v61 = vsub.f32 %v18709_v41, %v13528_v54  ;;  %v13557_v23 = vsel %vm766_vm2, %v13543_v48, 0.0  ;;  %v18990_v48 = vsub.s32 5, %v16689_v9 }
0x14b5   :  { %13558 = vadd.xlane.f32.xlu0 %v13557_v23  ;;  %v13517_v26 = vpop.xlane.xlu1 %13516  ;;  %v13569_v53 = vsel %vm766_vm2, %v13547_v62, 0.0 }
0x14b6   :  { %v13529_v39 = vmul.f32 0.03125, %v13517_v26  ;;  %v13544_v29 = vmul.f32 %v18751_v61, %v18751_v61  ;;  %v13619_v33 = vrot.slane %v18682_v30, %v18990_v48 }
0x14b8   :  { %v18760_v55 = vsub.f32 %v18717_v31, %v13529_v39  ;;  %v13560_v11 = vsel %vm766_vm2, %v13544_v29, 0.0 }
0x14b9   :  { %13561 = vadd.xlane.f32.xlu1 %v13560_v11  ;;  %v13520_v36 = vpop.xlane.xlu1 %13519 }
0x14ba   :  { %v13530_v16 = vmul.f32 0.03125, %v13520_v36  ;;  %v13545_v44 = vmul.f32 %v18760_v55, %v18760_v55 }
0x14bc   :  { %v18766_v50 = vsub.f32 %v18721_v20, %v13530_v16  ;;  %v13563_v4 = vsel %vm766_vm2, %v13545_v44, 0.0 }
0x14bd   :  { %13564 = vadd.xlane.f32.xlu0 %v13563_v4 }
0x14be   :  { %v13546_v25 = vmul.f32 %v18766_v50, %v18766_v50 }
0x14c0   :  { %v13566_v51 = vsel %vm766_vm2, %v13546_v25, 0.0 }
0x14c1   :  { %13570 = vadd.xlane.f32.xlu0 %v13569_v53  ;;  %13567 = vadd.xlane.f32.xlu1 %v13566_v51 }
0x153a   :  { %v13550_v0 = vpop.xlane.xlu1 %13549 }
0x153b   :  { %v13572_v10 = vmul.f32 0.03125, %v13550_v0 }
0x153c   :  { %v13553_v15 = vpop.xlane.xlu0 %13552 }
0x153d   :  { %v13580_v49 = vadd.f32 1e-06, %v13572_v10  ;;  %v13573_v52 = vmul.f32 0.03125, %v13553_v15 }
0x153e   :  { %v13556_v7 = vpop.xlane.xlu1 %13555 }
0x153f   :  { %16243 = vrsqrt.f32 %v13580_v49  ;;  %v13581_v18 = vadd.f32 1e-06, %v13573_v52  ;;  %v13574_v32 = vmul.f32 0.03125, %v13556_v7 }
0x1541   :  { %16245 = vrsqrt.f32 %v13581_v18  ;;  %v13582_v6 = vadd.f32 1e-06, %v13574_v32 }
0x1542   :  { %v13559_v42 = vpop.xlane.xlu0 %13558 }
0x1543   :  { %16247 = vrsqrt.f32 %v13582_v6  ;;  %v13575_v56 = vmul.f32 0.03125, %v13559_v42 }
0x1545   :  { %v13583_v63 = vadd.f32 1e-06, %v13575_v56 }
0x1546   :  { %v13562_v59 = vpop.xlane.xlu1 %13561 }
0x1547   :  { %16249 = vrsqrt.f32 %v13583_v63  ;;  %v13576_v47 = vmul.f32 0.03125, %v13562_v59 }
0x1549   :  { %v16244_v57 = vpop.eup %16243  ;;  %v13584_v2 = vadd.f32 1e-06, %v13576_v47  ;;  %v15917_v47 = vld [vmem:[#allocation8 + $0x20] sm:$0xff]  }
0x154a   :  { %v13596_v46 = vmul.f32 %v16244_v57, %v18728_v22  ;;  %v13565_v34 = vpop.xlane.xlu0 %13564  ;;  %15730 = vmatprep.subr.bf16.mxu0 %v15917_v47 }
0x154b   :  { %v16246_v14 = vpop.eup %16245  ;;  %16251 = vrsqrt.f32 %v13584_v2  ;;  %v13577_v60 = vmul.f32 0.03125, %v13565_v34 }
0x154c   :  { %v13597_v5 = vmul.f32 %v16246_v14, %v18731_v13  ;;  %v13608_v54 = vmul.f32 %v13607_v37, %v13596_v46 }
0x154d   :  { %v16248_v23 = vpop.eup %16247  ;;  %v13585_v26 = vadd.f32 1e-06, %v13577_v60 }
0x154e   :  { %v13598_v39 = vmul.f32 %v16248_v23, %v18736_v27  ;;  %v13571_v29 = vpop.xlane.xlu0 %13570  ;;  %v13568_v11 = vpop.xlane.xlu1 %13567  ;;  %v13609_v36 = vmul.f32 %v13607_v37, %v13597_v5  ;;  %v13620_v44 = vadd.f32 %v13619_v33, %v13608_v54 }
0x154f   :  { %16253 = vrsqrt.f32 %v13585_v26  ;;  %v13579_v22 = vmul.f32 0.03125, %v13571_v29  ;;  %v13578_v16 = vmul.f32 0.03125, %v13568_v11 }
0x1550   :  { %v13621_v4 = vadd.f32 %v13619_v33, %v13609_v36  ;;  %v13610_v53 = vmul.f32 %v13607_v37, %v13598_v39 }
0x1551   :  { %v16250_v62 = vpop.eup %16249  ;;  %v13587_v25 = vadd.f32 1e-06, %v13579_v22  ;;  %v13586_v13 = vadd.f32 1e-06, %v13578_v16 }
0x1552   :  { %v13599_v51 = vmul.f32 %v16250_v62, %v18745_v45  ;;  %v13628_v35 = vpack.c.bf16 %v13621_v4, %v13620_v44  ;;  %v13622_v19 = vadd.f32 %v13619_v33, %v13610_v53 }
0x1553   :  { %16255 = vrsqrt.f32 %v13587_v25 }
0x1554   :  { %v13611_v28 = vmul.f32 %v13607_v37, %v13599_v51  ;;  %16257 = vrsqrt.f32 %v13586_v13  ;;  %15722 = vmatprep.mubr.msk.bf16.mxu0 %vm766_vm2, %v13628_v35 }
0x1555   :  { %v16252_v27 = vpop.eup %16251 }
0x1556   :  { %v13600_v40 = vmul.f32 %v16252_v27, %v18751_v61  ;;  %v13623_v8 = vadd.f32 %v13619_v33, %v13611_v28 }
0x1558   :  { %v13629_v17 = vpack.c.bf16 %v13623_v8, %v13622_v19  ;;  %v13612_v15 = vmul.f32 %v13607_v37, %v13600_v40 }
0x1559   :  { %v16254_v0 = vpop.eup %16253 }
0x155a   :  { %v13601_v10 = vmul.f32 %v16254_v0, %v18760_v55  ;;  %15723 = vmatmul.mubr.msk.bf16.vlgmr.msra.gmra.mrb[152].mxu0 %vm766_vm2, %v13629_v17  ;;  %v13624_v18 = vadd.f32 %v13619_v33, %v13612_v15 }
0x155b   :  { %15731 = vmatpush3.bf16.msra.mxu0 %v15917_v47 }
0x155c   :  { %v13613_v49 = vmul.f32 %v13607_v37, %v13601_v10  ;;  %15732 = vmatprep.subr.bf16.mxu0 %v15918_v3 }
0x155d   :  { %v16256_v45 = vpop.eup %16255 }
0x155e   :  { %v16258_v52 = vpop.eup %16257  ;;  %v13603_v7 = vmul.f32 %v16256_v45, %v18757_v38  ;;  %v13625_v32 = vadd.f32 %v13619_v33, %v13613_v49  ;;  %v15919_v38 = vld [vmem:[#allocation8 + $0x30] sm:$0xff]  }
0x155f   :  { %v13602_v6 = vmul.f32 %v16258_v52, %v18766_v50  ;;  %15733 = vmatpush3.bf16.msra.mxu0 %v15918_v3  ;;  %v15920_v50 = vld [vmem:[#allocation8 + $0x38] sm:$0xff]  }
0x1560   :  { %v13630_v42 = vpack.c.bf16 %v13625_v32, %v13624_v18  ;;  %v13615_v61 = vmul.f32 %v13607_v37, %v13603_v7  ;;  %15734 = vmatprep.subr.bf16.mxu0 %v15919_v38 }
0x1561   :  { %v13614_v56 = vmul.f32 %v13607_v37, %v13602_v6  ;;  %v18991_v37 = vsub.s32 6, %v16689_v9 }
0x1562   :  { %15726 = vmatprep.mubr.msk.bf16.mxu0 %vm766_vm2, %v13630_v42  ;;  %v13627_v63 = vadd.f32 %v13619_v33, %v13615_v61 }
0x1563   :  { %v13626_v59 = vadd.f32 %v13619_v33, %v13614_v56  ;;  %15735 = vmatpush3.bf16.msra.mxu0 %v15919_v38  ;;  %v13635_v57 = vrot.slane %v18682_v30, %v18991_v37 }
0x1564   :  { %15736 = vmatprep.subr.bf16.mxu0 %v15920_v50 }
0x1565   :  { %v13631_v55 = vpack.c.bf16 %v13627_v63, %v13626_v59 }
0x1567   :  { %15727 = vmatmul.mubr.msk.bf16.gmra.mrb[156].mxu0 %vm766_vm2, %v13631_v55 }
0x1568   :  { %15737 = vmatpush3.bf16.msra.mxu0 %v15920_v50 }
0x1569   :  { %15746 = vmatprep.subr.bf16.mxu0 %v18967_v1 }
0x162d   :  { %v15724_v2 = vpop.f32.mrb[152].mxu0 }
0x162e   :  { %v18801_v46 = vadd.f32 %v15724_v2, %v13635_v57  ;;  %v13690_v34 = vpop.f32.mrb[153].mxu0 }
0x162f   :  { %v18803_v14 = vadd.f32 %v13690_v34, %v13635_v57  ;;  %v15725_v60 = vpop.f32.mrb[154].mxu0 }
0x1630   :  { %v13723_v5 = vmul.f32 %v18801_v46, %v18801_v46  ;;  %v18807_v54 = vadd.f32 %v15725_v60, %v13635_v57  ;;  %v13693_v48 = vpop.f32.mrb[155].mxu0 }
0x1631   :  { %v13721_v33 = vmul.f32 %v18803_v14, %v18803_v14  ;;  %v18811_v23 = vadd.f32 %v13693_v48, %v13635_v57 }
0x1632   :  { %v13731_v26 = vmul.f32 %v13723_v5, %v18801_v46  ;;  %v13724_v39 = vmul.f32 %v18807_v54, %v18807_v54 }
0x1633   :  { %v13729_v29 = vmul.f32 %v13721_v33, %v18803_v14  ;;  %v13722_v11 = vmul.f32 %v18811_v23, %v18811_v23 }
0x1634   :  { %v13739_v36 = vmul.f32 0.044715, %v13731_v26  ;;  %v13732_v22 = vmul.f32 %v13724_v39, %v18807_v54 }
0x1635   :  { %v13737_v16 = vmul.f32 0.044715, %v13729_v29  ;;  %v13730_v44 = vmul.f32 %v13722_v11, %v18811_v23 }
0x1636   :  { %v13747_v4 = vadd.f32 %v13739_v36, %v18801_v46  ;;  %v13740_v62 = vmul.f32 0.044715, %v13732_v22 }
0x1637   :  { %v13745_v25 = vadd.f32 %v13737_v16, %v18803_v14  ;;  %v13738_v13 = vmul.f32 0.044715, %v13730_v44 }
0x1638   :  { %v13755_v53 = vmul.f32 0.7978846, %v13747_v4  ;;  %v13748_v51 = vadd.f32 %v13740_v62, %v18807_v54 }
0x1639   :  { %v13753_v35 = vmul.f32 0.7978846, %v13745_v25  ;;  %v13746_v28 = vadd.f32 %v13738_v13, %v18811_v23 }
0x163a   :  { %16259 = vtanh.f32 %v13755_v53  ;;  %v13756_v27 = vmul.f32 0.7978846, %v13748_v51  ;;  %v15728_v40 = vpop.f32.mrb[156].mxu0 }
0x163b   :  { %16261 = vtanh.f32 %v13753_v35  ;;  %v13754_v19 = vmul.f32 0.7978846, %v13746_v28  ;;  %v18825_v8 = vadd.f32 %v15728_v40, %v13635_v57  ;;  %v13706_v17 = vpop.f32.mrb[157].mxu0 }
0x163c   :  { %16263 = vtanh.f32 %v13756_v27  ;;  %v18827_v0 = vadd.f32 %v13706_v17, %v13635_v57  ;;  %v15729_v10 = vpop.f32.mrb[158].mxu0 }
0x163d   :  { %16265 = vtanh.f32 %v13754_v19  ;;  %v13727_v15 = vmul.f32 %v18825_v8, %v18825_v8  ;;  %v13718_v49 = vadd.f32 %v15729_v10, %v13635_v57  ;;  %v13709_v45 = vpop.f32.mrb[159].mxu0 }
0x163e   :  { %v13725_v52 = vmul.f32 %v18827_v0, %v18827_v0  ;;  %v13710_v7 = vadd.f32 %v13709_v45, %v13635_v57 }
0x163f   :  { %v13735_v18 = vmul.f32 %v13727_v15, %v18825_v8  ;;  %v13728_v32 = vmul.f32 %v13718_v49, %v13718_v49 }
0x1640   :  { %v13733_v6 = vmul.f32 %v13725_v52, %v18827_v0  ;;  %v13726_v42 = vmul.f32 %v13710_v7, %v13710_v7 }
0x1641   :  { %v13743_v61 = vmul.f32 0.044715, %v13735_v18  ;;  %v13736_v56 = vmul.f32 %v13728_v32, %v13718_v49 }
0x1642   :  { %v13741_v63 = vmul.f32 0.044715, %v13733_v6  ;;  %v13734_v59 = vmul.f32 %v13726_v42, %v13710_v7 }
0x1643   :  { %v13751_v55 = vadd.f32 %v13743_v61, %v18825_v8  ;;  %v13744_v47 = vmul.f32 0.044715, %v13736_v56  ;;  %v18992_v56 = vsub.s32 7, %v16689_v9 }
0x1644   :  { %v16260_v3 = vpop.eup %16259  ;;  %v13749_v38 = vadd.f32 %v13741_v63, %v18827_v0  ;;  %v13742_v50 = vmul.f32 0.044715, %v13734_v59 }
0x1645   :  { %v16262_v37 = vpop.eup %16261  ;;  %v13771_v2 = vadd.f32 1.0, %v16260_v3  ;;  %v13759_v57 = vmul.f32 0.7978846, %v13751_v55  ;;  %v13752_v34 = vadd.f32 %v13744_v47, %v13718_v49  ;;  %v13800_v63 = vrot.slane %v18682_v30, %v18992_v56 }
0x1646   :  { %v16264_v60 = vpop.eup %16263  ;;  %v13769_v5 = vadd.f32 1.0, %v16262_v37  ;;  %v13757_v48 = vmul.f32 0.7978846, %v13749_v38  ;;  %v13750_v33 = vadd.f32 %v13742_v50, %v13710_v7 }
0x1647   :  { %v16266_v26 = vpop.eup %16265  ;;  %v13779_v39 = vmul.f32 0.5, %v13771_v2  ;;  %v13772_v29 = vadd.f32 1.0, %v16264_v60  ;;  %16267 = vtanh.f32 %v13759_v57  ;;  %v13760_v11 = vmul.f32 0.7978846, %v13752_v34 }
0x1648   :  { %v13777_v36 = vmul.f32 0.5, %v13769_v5  ;;  %v13770_v22 = vadd.f32 1.0, %v16266_v26  ;;  %16269 = vtanh.f32 %v13757_v48  ;;  %v13758_v16 = vmul.f32 0.7978846, %v13750_v33 }
0x1649   :  { %v13780_v44 = vmul.f32 0.5, %v13772_v29  ;;  %16271 = vtanh.f32 %v13760_v11  ;;  %v13787_v62 = vmul.f32 %v13779_v39, %v18801_v46 }
0x164a   :  { %v13778_v4 = vmul.f32 0.5, %v13770_v22  ;;  %16273 = vtanh.f32 %v13758_v16  ;;  %v13785_v13 = vmul.f32 %v13777_v36, %v18803_v14 }
0x164b   :  { %v13788_v25 = vmul.f32 %v13780_v44, %v18807_v54 }
0x164c   :  { %v13786_v53 = vmul.f32 %v13778_v4, %v18811_v23 }
0x164d   :  { %v13794_v51 = vpack.c.bf16 %v13788_v25, %v13787_v62 }
0x164e   :  { %v13793_v35 = vpack.c.bf16 %v13786_v53, %v13785_v13 }
0x1650   :  { %15738 = vmatprep.mubr.msk.bf16.mxu0 %vm7247_vm6, %v13793_v35 }
0x1651   :  { %v16268_v28 = vpop.eup %16267  ;;  %15739 = vmatmul.mubr.msk.bf16.vlgmr.msra.gmra.mrb[160].mxu0 %vm7247_vm6, %v13794_v51 }
0x1652   :  { %v16270_v27 = vpop.eup %16269  ;;  %v13775_v40 = vadd.f32 1.0, %v16268_v28 }
0x1653   :  { %v16272_v19 = vpop.eup %16271  ;;  %v13773_v17 = vadd.f32 1.0, %v16270_v27 }
0x1654   :  { %v16274_v10 = vpop.eup %16273  ;;  %v13783_v15 = vmul.f32 0.5, %v13775_v40  ;;  %v13776_v46 = vadd.f32 1.0, %v16272_v19 }
0x1655   :  { %v13781_v45 = vmul.f32 0.5, %v13773_v17  ;;  %v13774_v54 = vadd.f32 1.0, %v16274_v10 }
0x1656   :  { %v13784_v52 = vmul.f32 0.5, %v13776_v46  ;;  %v13791_v23 = vmul.f32 %v13783_v15, %v18825_v8 }
0x1657   :  { %v13782_v14 = vmul.f32 0.5, %v13774_v54  ;;  %v13789_v32 = vmul.f32 %v13781_v45, %v18827_v0 }
0x1658   :  { %v13792_v18 = vmul.f32 %v13784_v52, %v13718_v49 }
0x1659   :  { %v13790_v6 = vmul.f32 %v13782_v14, %v13710_v7 }
0x165a   :  { %v13796_v42 = vpack.c.bf16 %v13792_v18, %v13791_v23 }
0x165b   :  { %v13795_v61 = vpack.c.bf16 %v13790_v6, %v13789_v32 }
0x165d   :  { %15742 = vmatprep.mubr.msk.bf16.mxu0 %vm7247_vm6, %v13795_v61 }
0x165e   :  { %15743 = vmatmul.mubr.msk.bf16.gmra.mrb[164].mxu0 %vm7247_vm6, %v13796_v42 }
0x165f   :  { %15750 = vmatprep.mubr.msk.bf16.mxu0 %vm16467_vm3, %v18967_v1 }
0x1724   :  { %v15740_v59 = vpop.f32.mrb[160].mxu0 }
0x1725   :  { %v13880_v55 = vadd.f32 %v15740_v59, %v13800_v63  ;;  %v13871_v8 = vpop.f32.mrb[161].mxu0 }
0x1726   :  { %v15741_v49 = vpop.f32.mrb[162].mxu0  ;;  %v13872_v7 = vadd.f32 %v13871_v8, %v13800_v63 }
0x1727   :  { %v13883_v47 = vadd.f32 %v15741_v49, %v13800_v63  ;;  %v13874_v0 = vpop.f32.mrb[163].mxu0  ;;  %v13904_v38 = vadd.f32 %v13880_v55, %v18692_v43 }
0x1728   :  { %v13875_v3 = vadd.f32 %v13874_v0, %v13800_v63  ;;  %v13902_v2 = vadd.f32 %v13872_v7, %v18689_v21 }
0x1729   :  { %v13905_v50 = vadd.f32 %v13883_v47, %v18701_v58  ;;  %v13921_v30 = vrot.slane %v13904_v38, 6 }
0x172a   :  { %v13903_v37 = vadd.f32 %v13875_v3, %v18695_v24 }
0x172b   :  { %v13924_v57 = vrot.slane %v13905_v50, 5 }
0x172c   :  { %v13918_v9 = vrot.slane %v13903_v37, 7 }
0x172e   :  { %v13920_v34 = vsel %vm13919_vm7, %v13918_v9, %v13902_v2 }
0x172f   :  { %v13923_v60 = vsel %vm13922_vm8, %v13921_v30, %v13920_v34 }
0x1730   :  { %v13926_v5 = vsel %vm13925_vm9, %v13924_v57, %v13923_v60 }
0x1731   :  { %v15744_v43 = vpop.f32.mrb[164].mxu0  ;;  %v13940_v58 = vsel %vm13939_vm10, %v13926_v5, 0.0 }
0x1732   :  { %v13896_v48 = vadd.f32 %v15744_v43, %v13800_v63  ;;  %v13887_v24 = vpop.f32.mrb[165].mxu0  ;;  %13941 = vadd.xlane.f32.xlu1 %v13940_v58  ;;  %v15921_v43 = vld [vmem:[#allocation10] sm:$0xff]   ;;  %v15922_v58 = vld [vmem:[#allocation10 + $0x8] sm:$0xff]  }
0x1733   :  { %v13888_v33 = vadd.f32 %v13887_v24, %v13800_v63  ;;  %v15745_v21 = vpop.f32.mrb[166].mxu0  ;;  %15747 = vmatpush3.bf16.msra.mxu0 %v15921_v43 }
0x1734   :  { %v13899_v26 = vadd.f32 %v15745_v21, %v13800_v63  ;;  %v13890_v39 = vpop.f32.mrb[167].mxu0  ;;  %v13908_v36 = vadd.f32 %v13896_v48, %v18721_v20  ;;  %15748 = vmatprep.subr.bf16.mxu0 %v18967_v1 }
0x1735   :  { %v13906_v29 = vadd.f32 %v13888_v33, %v18709_v41  ;;  %v13891_v11 = vadd.f32 %v13890_v39, %v13800_v63 }
0x1736   :  { %v13909_v22 = vadd.f32 %v13899_v26, %v18707_v12  ;;  %v13931_v62 = vrot.slane %v13908_v36, 2 }
0x1737   :  { %v13907_v16 = vadd.f32 %v13891_v11, %v18717_v31  ;;  %v13927_v44 = vrot.slane %v13906_v29, 4  ;;  %15749 = vmatpush3.bf16.msra.mxu0 %v15922_v58  ;;  %v18993_v11 = vld [vmem:[#allocation25_spill] sm:$0xff] }
0x1738   :  { %v13934_v25 = vrot.slane %v13909_v22, 1 }
0x1739   :  { %v13928_v4 = vrot.slane %v13907_v16, 3 }
0x173b   :  { %v13930_v13 = vsel %vm13929_vm11, %v13928_v4, %v13927_v44 }
0x173c   :  { %v13933_v53 = vsel %vm13932_vm12, %v13931_v62, %v13930_v13  ;;  %v18994_v62 = vld [vmem:[#allocation26_spill] sm:$0xff] }
0x173d   :  { %v13936_v41 = vsel %vm13935_vm13, %v13934_v25, %v13933_v53 }
0x173e   :  { %v13944_v20 = vsel %vm13943_vm14, %v13936_v41, 0.0 }
0x173f   :  { %13945 = vadd.xlane.f32.xlu0 %v13944_v20 }
0x17bf   :  { %v13942_v12 = vpop.xlane.xlu1 %13941 }
0x17c0   :  { %v13947_v51 = vmul.f32 0.03125, %v13942_v12 }
0x17c2   :  { %v13951_v31 = vrot.slane %v13947_v51, 1  ;;  %v13952_v35 = vrot.slane %v13947_v51, 2  ;;  %v13953_v28 = vrot.slane %v13947_v51, 3  ;;  %v13966_v27 = vsub.f32 %v13902_v2, %v13947_v51 }
0x17c4   :  { %v13967_v40 = vsub.f32 %v13903_v37, %v13951_v31  ;;  %v13968_v19 = vsub.f32 %v13904_v38, %v13952_v35  ;;  %v13969_v17 = vsub.f32 %v13905_v50, %v13953_v28  ;;  %v13974_v45 = vmul.f32 %v13966_v27, %v13966_v27 }
0x17c6   :  { %v13975_v10 = vmul.f32 %v13967_v40, %v13967_v40  ;;  %v13976_v15 = vmul.f32 %v13968_v19, %v13968_v19  ;;  %v13977_v46 = vmul.f32 %v13969_v17, %v13969_v17 }
0x17c8   :  { %v13990_v54 = vrot.slane %v13975_v10, 7  ;;  %v13992_v52 = vrot.slane %v13976_v15, 6  ;;  %v13994_v23 = vrot.slane %v13977_v46, 5 }
0x17ca   :  { %v13991_v14 = vsel %vm13919_vm7, %v13990_v54, %v13974_v45 }
0x17cb   :  { %v13993_v18 = vsel %vm13922_vm8, %v13992_v52, %v13991_v14 }
0x17cc   :  { %v13946_v32 = vpop.xlane.xlu0 %13945  ;;  %v13995_v6 = vsel %vm13925_vm9, %v13994_v23, %v13993_v18 }
0x17cd   :  { %v13948_v42 = vmul.f32 0.03125, %v13946_v32  ;;  %v14005_v61 = vsel %vm13939_vm10, %v13995_v6, 0.0 }
0x17ce   :  { %14006 = vadd.xlane.f32.xlu1 %v14005_v61 }
0x17cf   :  { %v13954_v56 = vrot.slane %v13948_v42, 4  ;;  %v13955_v63 = vrot.slane %v13948_v42, 5  ;;  %v13956_v59 = vrot.slane %v13948_v42, 6  ;;  %v13957_v55 = vrot.slane %v13948_v42, 7 }
0x17d1   :  { %v18872_v8 = vsub.f32 %v13906_v29, %v13954_v56  ;;  %v18874_v49 = vsub.f32 %v13907_v16, %v13955_v63  ;;  %v18876_v47 = vsub.f32 %v13908_v36, %v13956_v59  ;;  %v18878_v0 = vsub.f32 %v13909_v22, %v13957_v55  ;;  %v18893_v29 = vld [vmem:[#allocation11 + $0x10] sm:$0xff] }
0x17d2   :  { %v14045_v36 = vrot.slane %v18893_v29, %v18993_v11  ;;  %v14057_v1 = vrot.slane %v18893_v29, %v18994_v62 }
0x17d3   :  { %v13978_v7 = vmul.f32 %v18872_v8, %v18872_v8  ;;  %v13979_v3 = vmul.f32 %v18874_v49, %v18874_v49  ;;  %v13980_v38 = vmul.f32 %v18876_v47, %v18876_v47  ;;  %v13981_v50 = vmul.f32 %v18878_v0, %v18878_v0 }
0x17d5   :  { %v13996_v37 = vrot.slane %v13978_v7, 4  ;;  %v13997_v2 = vrot.slane %v13979_v3, 3  ;;  %v13999_v9 = vrot.slane %v13980_v38, 2  ;;  %v14001_v57 = vrot.slane %v13981_v50, 1 }
0x17d7   :  { %v13998_v30 = vsel %vm13929_vm11, %v13997_v2, %v13996_v37 }
0x17d8   :  { %v14000_v34 = vsel %vm13932_vm12, %v13999_v9, %v13998_v30 }
0x17d9   :  { %v14002_v60 = vsel %vm13935_vm13, %v14001_v57, %v14000_v34 }
0x17da   :  { %v14008_v5 = vsel %vm13943_vm14, %v14002_v60, 0.0 }
0x17db   :  { %14009 = vadd.xlane.f32.xlu0 %v14008_v5 }
0x185b   :  { %v14007_v48 = vpop.xlane.xlu1 %14006 }
0x185c   :  { %v14011_v24 = vmul.f32 0.03125, %v14007_v48 }
0x185e   :  { %v14013_v33 = vadd.f32 1e-06, %v14011_v24 }
0x1860   :  { %16275 = vrsqrt.f32 %v14013_v33 }
0x1868   :  { %v14010_v21 = vpop.xlane.xlu0 %14009 }
0x1869   :  { %v14012_v26 = vmul.f32 0.03125, %v14010_v21 }
0x186a   :  { %v16276_v39 = vpop.eup %16275 }
0x186b   :  { %v14014_v22 = vadd.f32 1e-06, %v14012_v26  ;;  %v14019_v16 = vrot.slane %v16276_v39, 1  ;;  %v14020_v44 = vrot.slane %v16276_v39, 2  ;;  %v14021_v4 = vrot.slane %v16276_v39, 3 }
0x186c   :  { %v14034_v25 = vmul.f32 %v16276_v39, %v13966_v27 }
0x186d   :  { %16277 = vrsqrt.f32 %v14014_v22  ;;  %v14035_v13 = vmul.f32 %v14019_v16, %v13967_v40  ;;  %v14036_v53 = vmul.f32 %v14020_v44, %v13968_v19  ;;  %v14037_v41 = vmul.f32 %v14021_v4, %v13969_v17  ;;  %v18995_v4 = vld [vmem:[#allocation27_spill] sm:$0xff] }
0x186e   :  { %v14046_v20 = vmul.f32 %v14045_v36, %v14034_v25  ;;  %v14081_v62 = vrot.slane %v18893_v29, %v18995_v4 }
0x186f   :  { %v14047_v12 = vmul.f32 %v14045_v36, %v14035_v13  ;;  %v14048_v51 = vmul.f32 %v14045_v36, %v14036_v53  ;;  %v14049_v31 = vmul.f32 %v14045_v36, %v14037_v41 }
0x1870   :  { %v14058_v35 = vadd.f32 %v14057_v1, %v14046_v20 }
0x1871   :  { %v14059_v28 = vadd.f32 %v14057_v1, %v14047_v12  ;;  %v14060_v10 = vadd.f32 %v14057_v1, %v14048_v51  ;;  %v14061_v15 = vadd.f32 %v14057_v1, %v14049_v31 }
0x1872   :  { %v14066_v46 = vpack.c.bf16 %v14058_v35, %v14058_v35 }
0x1873   :  { %v14067_v45 = vpack.c.bf16 %v14059_v28, %v14059_v28  ;;  %v14068_v54 = vpack.c.bf16 %v14060_v10, %v14060_v10  ;;  %v14069_v52 = vpack.c.bf16 %v14061_v15, %v14061_v15 }
0x1874   :  { %v14090_v14 = vunpack.c.l.b16 %v14066_v46 }
0x1875   :  { %v14091_v23 = vunpack.c.l.b16 %v14067_v45  ;;  %v14092_v18 = vunpack.c.l.b16 %v14068_v54  ;;  %v14093_v32 = vunpack.c.l.b16 %v14069_v52 }
0x1876   :  { %v14098_v40 = vrot.slane %v14090_v14, 4 }
0x1877   :  { %v16278_v27 = vpop.eup %16277  ;;  %v14099_v19 = vrot.slane %v14091_v23, 3  ;;  %v14101_v17 = vrot.slane %v14092_v18, 2  ;;  %v14103_v50 = vrot.slane %v14093_v32, 1 }
0x1878   :  { %v14022_v6 = vrot.slane %v16278_v27, 4  ;;  %v14023_v42 = vrot.slane %v16278_v27, 5  ;;  %v14024_v61 = vrot.slane %v16278_v27, 6  ;;  %v14025_v56 = vrot.slane %v16278_v27, 7 }
0x1879   :  { %v14100_v63 = vsel %vm13929_vm11, %v14099_v19, %v14098_v40 }
0x187a   :  { %v14038_v59 = vmul.f32 %v14022_v6, %v18872_v8  ;;  %v14039_v55 = vmul.f32 %v14023_v42, %v18874_v49  ;;  %v14040_v7 = vmul.f32 %v14024_v61, %v18876_v47  ;;  %v14041_v3 = vmul.f32 %v14025_v56, %v18878_v0 }
0x187b   :  { %v14102_v38 = vsel %vm13932_vm12, %v14101_v17, %v14100_v63 }
0x187c   :  { %v14050_v37 = vmul.f32 %v14045_v36, %v14038_v59  ;;  %v14051_v2 = vmul.f32 %v14045_v36, %v14039_v55  ;;  %v14052_v9 = vmul.f32 %v14045_v36, %v14040_v7  ;;  %v14053_v30 = vmul.f32 %v14045_v36, %v14041_v3 }
0x187d   :  { %v14104_v57 = vsel %vm13935_vm13, %v14103_v50, %v14102_v38 }
0x187e   :  { %v14062_v34 = vadd.f32 %v14057_v1, %v14050_v37  ;;  %v14063_v60 = vadd.f32 %v14057_v1, %v14051_v2  ;;  %v14064_v5 = vadd.f32 %v14057_v1, %v14052_v9  ;;  %v14065_v43 = vadd.f32 %v14057_v1, %v14053_v30 }
0x1880   :  { %v14070_v8 = vpack.c.bf16 %v14062_v34, %v14062_v34  ;;  %v14071_v58 = vpack.c.bf16 %v14063_v60, %v14063_v60  ;;  %v14072_v49 = vpack.c.bf16 %v14064_v5, %v14064_v5  ;;  %v14073_v48 = vpack.c.bf16 %v14065_v43, %v14065_v43 }
0x1882   :  { %v14094_v47 = vunpack.c.l.b16 %v14070_v8  ;;  %v14095_v0 = vunpack.c.l.b16 %v14071_v58  ;;  %v14096_v24 = vunpack.c.l.b16 %v14072_v49  ;;  %v14097_v33 = vunpack.c.l.b16 %v14073_v48 }
0x1884   :  { %v14106_v21 = vsel %vm14105_vm15, %v14094_v47, %v14104_v57  ;;  %v14107_v26 = vrot.slane %v14095_v0, 7  ;;  %v14109_v39 = vrot.slane %v14096_v24, 6  ;;  %v14111_v36 = vrot.slane %v14097_v33, 5 }
0x1886   :  { %v14108_v11 = vsel %vm13919_vm7, %v14107_v26, %v14106_v21 }
0x1887   :  { %v14110_v22 = vsel %vm13922_vm8, %v14109_v39, %v14108_v11 }
0x1888   :  { %v14112_v16 = vsel %vm13925_vm9, %v14111_v36, %v14110_v22 }
0x1889   :  { %v14113_v44 = vpack.c.b16 %v14112_v16, %v14112_v16 }
0x188b   :  { %15751 = vmatmul.mubr.msk.bf16.vlgmr.msra.gmra.mrb[168].mxu0 %vm766_vm2, %v14113_v44 }
0x195e   :  { %v14163_v1 = vpop.f32.mrb[168].mxu0 }
0x195f   :  { %v14164_v25 = vadd.f32 %v14163_v1, %v14081_v62  ;;  %v15752_v13 = vpop.f32.mrb[169].mxu0 }
0x1960   :  { %v14166_v53 = vpop.f32.mrb[170].mxu0 }
0x1961   :  { %14169 = vst [vmem:[#allocation13] sm:$0xff] %v14164_v25  ;;  %v15753_v41 = vpop.f32.mrb[171].mxu0 }
0x1962   :  { %16433 = shalt.err (!%p16430_p10)
}
0x1963   :  { %s16434_s25 = scalar_lea.hbm %s18930_s6, 128 }
0x1964   :  { %p16435_p11 = scmp.ne.s32.totalorder %s18930_s6, %s16434_s25  ;;  %p16438_p12 = scmp.lt.u32.totalorder %s16434_s25, %s18930_s6 }
0x1966   :  { %p16440_p13 = pnand %p16438_p12, %p16435_p11 }
0x1968   :  { %16443 = shalt.err (!%p16440_p13)
}
0x1969   :  { %14179 = dma.vmem_to_hbm [thread:$0]  %s14177_s0, 128, %s18930_s6, [#allocation4]  }
0x196a   :  { %16452 = dma.done.wait [#allocation4], 128  }
0x196b   :  { %16453 = vsyncadd [#allocation4], 4294967168 }
0x196c   :  { %14183 = vsyncpa [#allocation3], 1 }
0x196d   :  { %14184 = vsyncpa [#allocation6], 1 }
0x196e   :  { %14185 = vsyncpa [#allocation9], 1 }
0x196f   :  { %14186 = vsyncpa [#allocation12], 1 }
0x1970   :  { %14187 = vsyncpa [#allocation4], 1 }

</bundles_post_ra>
